<compile_context>
chip_gen: v5e
topology: v5e:2x2
jax: 0.10.0
libtpu: 0.0.40
codegen_flags: <defaults>
</compile_context>

<pallas_src>
import jax
import jax.numpy as jnp
from jax import lax
from jax.experimental import pallas as pl
from jax.experimental.pallas import tpu as pltpu


# ----------------------------- fused Pallas kernel -----------------------------

def _build_rfb_kernel(H, W, O, Cin, B_blk, halo, stage_taps, stage_ks, epi_taps,
                      k_epi):
    """Builds the fused RFB kernel body.

    stage_taps: per fused tail stage, tuple of (stack_row, pad_row, rows, oh, ow)
    stage_ks:   per fused tail stage, K (stack rows consumed by that GEMM)
    epi_taps:   conv_cat taps (same tuple format)
    k_epi:      epilogue K = 9*4*O + Cin (conv_cat taps + conv_res input rows)
    """
    M = H * W
    slab = M + 2 * halo          # per-image width of the halo'd scratch
    C_pad = 4 * O                # rows of the halo'd scratch
    n_stage = len(stage_taps)

    def kernel(x_ref, widx_ref, b_ref, w_lead_ref, *rest):
        stage_w_refs = rest[:n_stage]
        w_epi_ref = rest[n_stage]
        o_ref = rest[n_stage + 1]
        pad_ref = rest[n_stage + 2]      # VMEM (4*O, B_blk*(M+2*halo)) bf16
        stack_ref = rest[n_stage + 3]    # VMEM (k_epi, B_blk*M)        bf16

        x = x_ref[0]                     # (Cin, B_blk*M) bf16
        w_col = widx_ref[...]            # (1, M) int32: column index of pixel m

        # Re-zero ONLY the halo column slabs every grid step (interior columns
        # are always overwritten before being read).  Deliberately not gated on
        # program_id: each TensorCore owns a separate scratch under megacore.
        zero_halo = jnp.zeros((C_pad, halo), pad_ref.dtype)
        for i in range(B_blk):
            base = i * slab
            pad_ref[:, base:base + halo] = zero_halo
            pad_ref[:, base + halo + M:base + slab] = zero_halo

        # Column-validity masks depend only on the horizontal tap offset; the
        # vertically out-of-image taps land in the zeroed halo columns.
        mask_cache = {}

        def col_mask(ow):
            if ow not in mask_cache:
                mask_cache[ow] = (w_col + ow >= 0) & (w_col + ow < W)
            return mask_cache[ow]

        def write_interior(act_f32, row_start):
            """Cast to bf16 once, store into the halo'd scratch interiors."""
            act = act_f32.astype(jnp.bfloat16)
            C = act.shape[0]
            for i in range(B_blk):
                base = i * slab + halo
                pad_ref[row_start:row_start + C, base:base + M] = \
                    act[:, i * M:(i + 1) * M]

        def gather(taps):
            """Sliced stores of masked, shifted windows into the K-stack."""
            for (srow, prow, rows, oh, ow) in taps:
                off = oh * W + ow                     # static flat offset
                for i in range(B_blk):
                    start = i * slab + halo + off
                    win = pad_ref[prow:prow + rows, start:start + M]
                    if ow != 0:
                        win = jnp.where(col_mask(ow), win, jnp.zeros_like(win))
                    stack_ref[srow:srow + rows, i * M:(i + 1) * M] = win

        def gemm(w_ref, K, brow, rows):
            acc = jnp.dot(w_ref[...], stack_ref[0:K, :],
                          preferred_element_type=jnp.float32)
            return acc + b_ref[brow:brow + rows, :]

        # ---- GEMM 1: the four branch-leading 1x1 convs fused: (4*O, Cin) ----
        lead = (jnp.dot(w_lead_ref[...], x, preferred_element_type=jnp.float32)
                + b_ref[0:4 * O, :])                           # (4*O, Mb) f32

        # ---- GEMMs 2-4: cross-branch fused tail stages (block-diagonal) ----
        act = lead[O:4 * O]                                    # [br1 | br2 | br3]
        brow = 4 * O
        for taps, K, w_ref in zip(stage_taps, stage_ks, stage_w_refs):
            write_interior(act, 0)
            gather(taps)
            act = gemm(w_ref, K, brow, 3 * O)
            brow += 3 * O

        # ---- GEMM 5: epilogue conv_cat(3x3) + conv_res(1x1) + bias + ReLU ----
        write_interior(lead[0:O], 0)                           # x_cat rows [0:O)
        write_interior(act, O)                                 # x_cat rows [O:4O)
        gather(epi_taps)
        stack_ref[k_epi - Cin:k_epi, :] = x                    # conv_res term
        out = gemm(w_epi_ref, k_epi, brow, O)
        o_ref[0] = jnp.maximum(out, 0.0)

    return kernel


# ------------------------------- forward wrapper --------------------------------

def _flat_w(w_hwio):
    """(kh, kw, ci, co) -> (co, kh*kw*ci), tap-major / channel-minor."""
    kh, kw, ci, co = w_hwio.shape
    return jnp.transpose(w_hwio, (3, 0, 1, 2)).reshape(co, kh * kw * ci)


def _block_diag(blocks):
    rows = sum(b.shape[0] for b in blocks)
    cols = sum(b.shape[1] for b in blocks)
    out = jnp.zeros((rows, cols), blocks[0].dtype)
    r = c = 0
    for b in blocks:
        out = out.at[r:r + b.shape[0], c:c + b.shape[1]].set(b)
        r += b.shape[0]
        c += b.shape[1]
    return out


def rfb_forward(x_nchw, params, *, batch_block=1):
    """RFB forward: (N, Cin, H, W) -> (N, O, H, W), one pallas_call total."""
    N, Cin, H, W = x_nchw.shape
    M = H * W
    O = params["conv_cat"][0].shape[-1]
    branches = params["branches"]

    assert N % batch_block == 0, (N, batch_block)
    NB = N // batch_block
    Mb = batch_block * M

    # ---- GEMM 1 weight: all four branch-leading 1x1 convs stacked on Cout ----
    w_lead = jnp.concatenate([_flat_w(br[0][0]) for br in branches],
                             axis=0).astype(jnp.bfloat16)           # (4*O, Cin)
    b_lead = jnp.concatenate([br[0][1] for br in branches], axis=0)

    # ---- GEMMs 2-4: block-diagonal cross-branch fusion of the tail stages ----
    stage_ws, stage_bs, stage_taps, stage_ks = [], [], [], []
    for s in (1, 2, 3):
        blocks, biases, taps, srow = [], [], [], 0
        for b in (1, 2, 3):
            w, bias, pad, dil = branches[b][s]
            blocks.append(_flat_w(w))
            biases.append(bias)
            kh, kw = int(w.shape[0]), int(w.shape[1])
            for i in range(kh):
                for j in range(kw):
                    oh = i * int(dil[0]) - int(pad[0])
                    ow = j * int(dil[1]) - int(pad[1])
                    taps.append((srow, (b - 1) * O, O, oh, ow))
                    srow += O
        stage_ws.append(_block_diag(blocks).astype(jnp.bfloat16))
        stage_bs.append(jnp.concatenate(biases, axis=0))
        stage_taps.append(tuple(taps))
        stage_ks.append(srow)

    # ---- GEMM 5 weight: conv_cat taps + conv_res rows fused along K ----
    wc, bc = params["conv_cat"]
    wr, br_bias = params["conv_res"]
    w_epi = jnp.concatenate([_flat_w(wc), _flat_w(wr)],
                            axis=1).astype(jnp.bfloat16)            # (O, 36*O+Cin)
    epi_taps, srow = [], 0
    for i in range(3):
        for j in range(3):
            epi_taps.append((srow, 0, 4 * O, i - 1, j - 1))
            srow += 4 * O
    k_epi = srow + Cin
    epi_taps = tuple(epi_taps)

    # ---- one packed (rows, 1) f32 bias slab: lead | stage1..3 | epilogue ----
    b_all = jnp.concatenate([b_lead] + stage_bs + [bc + br_bias], axis=0)
    b_all = b_all.astype(jnp.float32)[:, None]

    # ---- halo (flattened h*W+w units) covering the largest tap offset ----
    max_off = 0
    for taps in list(stage_taps) + [epi_taps]:
        for (_, _, _, oh, ow) in taps:
            max_off = max(max_off, abs(oh * W + ow))
    halo = max(128, -(-max_off // 128) * 128)
    assert halo >= max_off, (halo, max_off)

    # Column index of each flattened pixel (avoids int div/mod in-kernel).
    w_idx = jnp.tile(jnp.arange(W, dtype=jnp.int32), H)[None, :]    # (1, M)

    # x in bf16 (native MXU dtype, half the DMA bytes), batch folded onto lanes.
    xg = jnp.transpose(
        x_nchw.astype(jnp.bfloat16).reshape(NB, batch_block, Cin, M),
        (0, 2, 1, 3)).reshape(NB, Cin, Mb)

    weights = [w_lead] + stage_ws + [w_epi]
    kernel = _build_rfb_kernel(H, W, O, Cin, batch_block, halo,
                               tuple(stage_taps), tuple(stage_ks), epi_taps,
                               k_epi)

    in_specs = ([pl.BlockSpec((1, Cin, Mb), lambda g: (g, 0, 0)),   # x (batch fold)
                 pl.BlockSpec((1, M), lambda g: (0, 0)),            # column indices
                 pl.BlockSpec(b_all.shape, lambda g: (0, 0))]       # packed biases
                + [pl.BlockSpec(wgt.shape, lambda g: (0, 0)) for wgt in weights])

    out = pl.pallas_call(
        kernel,
        out_shape=jax.ShapeDtypeStruct((NB, O, Mb), jnp.float32),
        grid=(NB,),
        in_specs=in_specs,
        out_specs=pl.BlockSpec((1, O, Mb), lambda g: (g, 0, 0)),
        scratch_shapes=[
            pltpu.VMEM((4 * O, batch_block * (M + 2 * halo)), jnp.bfloat16),
            pltpu.VMEM((k_epi, Mb), jnp.bfloat16),
        ],
        compiler_params=pltpu.CompilerParams(
            dimension_semantics=("parallel",),
            vmem_limit_bytes=32 * 1024 * 1024),
    )(xg, w_idx, b_all, *weights)

    out = jnp.transpose(out.reshape(NB, O, batch_block, M), (0, 2, 1, 3))
    return out.reshape(N, O, H, W)                                  # NCHW


# ------------------------------ parameter init ----------------------------------

def _xavier_uniform(key, kh, kw, cin, cout):
    fan_in = cin * kh * kw
    fan_out = cout * kh * kw
    a = (6.0 / (fan_in + fan_out)) ** 0.5
    return jax.random.uniform(key, (kh, kw, cin, cout), jnp.float32, -a, a)


def _conv_bias(key, kh, kw, cin, cout):
    bound = 1.0 / float(cin * kh * kw) ** 0.5
    return jax.random.uniform(key, (cout,), jnp.float32, -bound, bound)


def init_rfb_params(key, in_channels, out_channels):
    C, O = in_channels, out_channels
    branch_specs = [
        [(1, 1, C, O, (0, 0), (1, 1))],
        [(1, 1, C, O, (0, 0), (1, 1)),
         (1, 3, O, O, (0, 1), (1, 1)),
         (3, 1, O, O, (1, 0), (1, 1)),
         (3, 3, O, O, (3, 3), (3, 3))],
        [(1, 1, C, O, (0, 0), (1, 1)),
         (1, 5, O, O, (0, 2), (1, 1)),
         (5, 1, O, O, (2, 0), (1, 1)),
         (3, 3, O, O, (5, 5), (5, 5))],
        [(1, 1, C, O, (0, 0), (1, 1)),
         (1, 7, O, O, (0, 3), (1, 1)),
         (7, 1, O, O, (3, 0), (1, 1)),
         (3, 3, O, O, (7, 7), (7, 7))],
    ]
    params = {"branches": []}
    for specs in branch_specs:
        convs = []
        for (kh, kw, cin, cout, pad, dil) in specs:
            key, kw_key, kb_key = jax.random.split(key, 3)
            convs.append((_xavier_uniform(kw_key, kh, kw, cin, cout),
                          _conv_bias(kb_key, kh, kw, cin, cout), pad, dil))
        params["branches"].append(convs)
    key, kw_key, kb_key = jax.random.split(key, 3)
    params["conv_cat"] = (_xavier_uniform(kw_key, 3, 3, 4 * O, O),
                          _conv_bias(kb_key, 3, 3, 4 * O, O))
    key, kw_key, kb_key = jax.random.split(key, 3)
    params["conv_res"] = (_xavier_uniform(kw_key, 1, 1, C, O),
                          _conv_bias(kb_key, 1, 1, C, O))
    return params


# ----------------------------- pure-JAX reference --------------------------------

def _conv_ref(x, w, b, pad, dil):
    return lax.conv_general_dilated(
        x, w, window_strides=(1, 1),
        padding=((pad[0], pad[0]), (pad[1], pad[1])),
        rhs_dilation=dil,
        dimension_numbers=("NHWC", "HWIO", "NHWC"),
        precision=lax.Precision.HIGHEST) + b


def rfb_ref(x_nchw, params):
    x = jnp.transpose(x_nchw, (0, 2, 3, 1)).astype(jnp.float32)
    outs = []
    for branch in params["branches"]:
        y = x
        for (w, b, pad, dil) in branch:
            y = _conv_ref(y, w, b, pad, dil)
        outs.append(y)
    x_cat = jnp.concatenate(outs, axis=-1)
    wc, bc = params["conv_cat"]
    wr, br = params["conv_res"]
    y = _conv_ref(x_cat, wc, bc, (1, 1), (1, 1)) + _conv_ref(x, wr, br, (0, 0), (1, 1))
    y = jnp.maximum(y, 0.0)
    return jnp.transpose(y, (0, 3, 1, 2))


# --------------------------------- main ------------------------------------------

if __name__ == "__main__":
    key = jax.random.PRNGKey(0)
    k_x, k_p = jax.random.split(key)

    in_channels, out_channels = 4, 8
    N, H, W = 2, 16, 16
    x = jax.random.normal(k_x, (N, in_channels, H, W), jnp.float32)   # NCHW

    params = init_rfb_params(k_p, in_channels, out_channels)
    ref = jax.block_until_ready(rfb_ref(x, params))

    # batch_block=1: grid=(N,) "parallel" (keeps both v7x TensorCores busy);
    # batch_block=2: batch folded onto lanes (wider GEMMs for 1-TC v5e/v6e).
    for bb in (1, 2):
        out = jax.block_until_ready(rfb_forward(x, params, batch_block=bb))
        assert out.shape == (N, out_channels, H, W), out.shape
        err = float(jnp.max(jnp.abs(out - ref)))
        # bf16 MXU operands (f32 accumulation) through 5 chained GEMMs vs. an
        # f32 HIGHEST-precision reference.
        assert jnp.allclose(out, ref, rtol=5e-2, atol=5e-2), (bb, err)

    print("KERNEL_OK")
</pallas_src>

<mosaic_0001>
module attributes {stable_mosaic.version = 11 : i64} {
  func.func @kernel(%arg0: i32, %arg1: memref<1x4x256xbf16, #tpu.memory_space<vmem>>, %arg2: memref<1x256xi32, #tpu.memory_space<vmem>>, %arg3: memref<112x1xf32, #tpu.memory_space<vmem>>, %arg4: memref<32x4xbf16, #tpu.memory_space<vmem>>, %arg5: memref<24x120xbf16, #tpu.memory_space<vmem>>, %arg6: memref<24x120xbf16, #tpu.memory_space<vmem>>, %arg7: memref<24x216xbf16, #tpu.memory_space<vmem>>, %arg8: memref<8x292xbf16, #tpu.memory_space<vmem>>, %arg9: memref<1x8x256xf32, #tpu.memory_space<vmem>>, %arg10: memref<32x512xbf16, #tpu.memory_space<vmem>>, %arg11: memref<292x256xbf16, #tpu.memory_space<vmem>>) attributes {dimension_semantics = [#tpu.dimension_semantics<parallel>], iteration_bounds = array<i64: 2>, scalar_prefetch = 0 : i64, scratch_operands = 2 : i64, tpu.core_type = #tpu.core_type<tc>, window_params = [{transform_indices = @transform_0, window_bounds = array<i64: 1, 4, 256>}, {pipeline_mode = #tpu.pipeline_mode<synchronous>, transform_indices = @transform_1, window_bounds = array<i64: 1, 256>}, {pipeline_mode = #tpu.pipeline_mode<synchronous>, transform_indices = @transform_2, window_bounds = array<i64: 112, 1>}, {pipeline_mode = #tpu.pipeline_mode<synchronous>, transform_indices = @transform_3, window_bounds = array<i64: 32, 4>}, {pipeline_mode = #tpu.pipeline_mode<synchronous>, transform_indices = @transform_4, window_bounds = array<i64: 24, 120>}, {pipeline_mode = #tpu.pipeline_mode<synchronous>, transform_indices = @transform_5, window_bounds = array<i64: 24, 120>}, {pipeline_mode = #tpu.pipeline_mode<synchronous>, transform_indices = @transform_6, window_bounds = array<i64: 24, 216>}, {pipeline_mode = #tpu.pipeline_mode<synchronous>, transform_indices = @transform_7, window_bounds = array<i64: 8, 292>}, {transform_indices = @transform_8, window_bounds = array<i64: 1, 8, 256>}]} {
    %c0 = arith.constant 0 : index
    %c0_0 = arith.constant 0 : index
    %c0_1 = arith.constant 0 : index
    %0 = vector.load %arg1[%c0, %c0_0, %c0_1] : memref<1x4x256xbf16, #tpu.memory_space<vmem>>, vector<1x4x256xbf16>
    %1 = vector.shape_cast %0 : vector<1x4x256xbf16> to vector<4x256xbf16>
    %c0_2 = arith.constant 0 : index
    %c0_3 = arith.constant 0 : index
    %2 = vector.load %arg2[%c0_2, %c0_3] : memref<1x256xi32, #tpu.memory_space<vmem>>, vector<1x256xi32>
    %cst = arith.constant 0.000000e+00 : bf16
    %3 = vector.broadcast %cst : bf16 to vector<32x128xbf16>
    %c0_4 = arith.constant 0 : index
    %c0_5 = arith.constant 0 : index
    %4 = vector.load %arg10[%c0_4, %c0_5] : memref<32x512xbf16, #tpu.memory_space<vmem>>, vector<32x128xbf16>
    tpu.vector_store %arg10[%c0_4, %c0_5], %3 {strides = array<i32>} : memref<32x512xbf16, #tpu.memory_space<vmem>>, vector<32x128xbf16>,
    %c0_6 = arith.constant 0 : index
    %c384 = arith.constant 384 : index
    %5 = vector.load %arg10[%c0_6, %c384] : memref<32x512xbf16, #tpu.memory_space<vmem>>, vector<32x128xbf16>
    tpu.vector_store %arg10[%c0_6, %c384], %3 {strides = array<i32>} : memref<32x512xbf16, #tpu.memory_space<vmem>>, vector<32x128xbf16>,
    %c0_7 = arith.constant 0 : index
    %c0_8 = arith.constant 0 : index
    %6 = vector.load %arg4[%c0_7, %c0_8] : memref<32x4xbf16, #tpu.memory_space<vmem>>, vector<32x4xbf16>
    %cst_9 = arith.constant dense<0.000000e+00> : vector<32x256xf32>
    %7 = tpu.matmul %6, %1, %cst_9 {dimension_numbers = #tpu.dot_dimension_numbers<[1], [0], [0], [1], [0, 0, 1, 1], [], []>} : vector<32x4xbf16>, vector<4x256xbf16>, vector<32x256xf32> -> vector<32x256xf32>
    %c0_10 = arith.constant 0 : index
    %c0_11 = arith.constant 0 : index
    %8 = vector.load %arg3[%c0_10, %c0_11] : memref<112x1xf32, #tpu.memory_space<vmem>>, vector<32x1xf32>
    %9 = vector.broadcast %8 : vector<32x1xf32> to vector<32x256xf32>
    %10 = arith.addf %7, %9 : vector<32x256xf32>
    %11 = vector.extract_strided_slice %10 {offsets = [8, 0], sizes = [24, 256], strides = [1, 1]} : vector<32x256xf32> to vector<24x256xf32>
    %12 = arith.truncf %11 : vector<24x256xf32> to vector<24x256xbf16>
    %c0_12 = arith.constant 0 : index
    %c128 = arith.constant 128 : index
    %13 = vector.load %arg10[%c0_12, %c128] : memref<32x512xbf16, #tpu.memory_space<vmem>>, vector<24x256xbf16>
    tpu.vector_store %arg10[%c0_12, %c128], %12 {strides = array<i32>} : memref<32x512xbf16, #tpu.memory_space<vmem>>, vector<24x256xbf16>,
    %c0_13 = arith.constant 0 : index
    %c127 = arith.constant 127 : index
    %14 = vector.load %arg10[%c0_13, %c127] : memref<32x512xbf16, #tpu.memory_space<vmem>>, vector<8x256xbf16>
    %c-1_i32 = arith.constant -1 : i32
    %15 = vector.broadcast %c-1_i32 : i32 to vector<1x256xi32>
    %16 = arith.addi %2, %15 : vector<1x256xi32>
    %c0_i32 = arith.constant 0 : i32
    %17 = vector.broadcast %c0_i32 : i32 to vector<1x256xi32>
    %18 = arith.cmpi sge, %16, %17 : vector<1x256xi32>
    %c-1_i32_14 = arith.constant -1 : i32
    %19 = vector.broadcast %c-1_i32_14 : i32 to vector<1x256xi32>
    %20 = arith.addi %2, %19 : vector<1x256xi32>
    %c16_i32 = arith.constant 16 : i32
    %21 = vector.broadcast %c16_i32 : i32 to vector<1x256xi32>
    %22 = arith.cmpi slt, %20, %21 : vector<1x256xi32>
    %23 = arith.andi %18, %22 : vector<1x256xi1>
    %cst_15 = arith.constant 0.000000e+00 : bf16
    %24 = vector.broadcast %cst_15 : bf16 to vector<8x256xbf16>
    %25 = vector.shape_cast %23 : vector<1x256xi1> to vector<1x256xi1>
    %26 = vector.broadcast %25 : vector<1x256xi1> to vector<8x256xi1>
    %27 = arith.select %26, %14, %24 : vector<8x256xi1>, vector<8x256xbf16>
    %c0_16 = arith.constant 0 : index
    %c0_17 = arith.constant 0 : index
    %28 = vector.load %arg11[%c0_16, %c0_17] : memref<292x256xbf16, #tpu.memory_space<vmem>>, vector<8x256xbf16>
    tpu.vector_store %arg11[%c0_16, %c0_17], %27 {strides = array<i32>} : memref<292x256xbf16, #tpu.memory_space<vmem>>, vector<8x256xbf16>,
    %c0_18 = arith.constant 0 : index
    %c128_19 = arith.constant 128 : index
    %29 = vector.load %arg10[%c0_18, %c128_19] : memref<32x512xbf16, #tpu.memory_space<vmem>>, vector<8x256xbf16>
    %c8 = arith.constant 8 : index
    %c0_20 = arith.constant 0 : index
    %30 = vector.load %arg11[%c8, %c0_20] : memref<292x256xbf16, #tpu.memory_space<vmem>>, vector<8x256xbf16>
    tpu.vector_store %arg11[%c8, %c0_20], %29 {strides = array<i32>} : memref<292x256xbf16, #tpu.memory_space<vmem>>, vector<8x256xbf16>,
    %c0_21 = arith.constant 0 : index
    %c129 = arith.constant 129 : index
    %31 = vector.load %arg10[%c0_21, %c129] : memref<32x512xbf16, #tpu.memory_space<vmem>>, vector<8x256xbf16>
    %c1_i32 = arith.constant 1 : i32
    %32 = vector.broadcast %c1_i32 : i32 to vector<1x256xi32>
    %33 = arith.addi %2, %32 : vector<1x256xi32>
    %c0_i32_22 = arith.constant 0 : i32
    %34 = vector.broadcast %c0_i32_22 : i32 to vector<1x256xi32>
    %35 = arith.cmpi sge, %33, %34 : vector<1x256xi32>
    %c1_i32_23 = arith.constant 1 : i32
    %36 = vector.broadcast %c1_i32_23 : i32 to vector<1x256xi32>
    %37 = arith.addi %2, %36 : vector<1x256xi32>
    %c16_i32_24 = arith.constant 16 : i32
    %38 = vector.broadcast %c16_i32_24 : i32 to vector<1x256xi32>
    %39 = arith.cmpi slt, %37, %38 : vector<1x256xi32>
    %40 = arith.andi %35, %39 : vector<1x256xi1>
    %cst_25 = arith.constant 0.000000e+00 : bf16
    %41 = vector.broadcast %cst_25 : bf16 to vector<8x256xbf16>
    %42 = vector.shape_cast %40 : vector<1x256xi1> to vector<1x256xi1>
    %43 = vector.broadcast %42 : vector<1x256xi1> to vector<8x256xi1>
    %44 = arith.select %43, %31, %41 : vector<8x256xi1>, vector<8x256xbf16>
    %c16 = arith.constant 16 : index
    %c0_26 = arith.constant 0 : index
    %45 = vector.load %arg11[%c16, %c0_26] : memref<292x256xbf16, #tpu.memory_space<vmem>>, vector<8x256xbf16>
    tpu.vector_store %arg11[%c16, %c0_26], %44 {strides = array<i32>} : memref<292x256xbf16, #tpu.memory_space<vmem>>, vector<8x256xbf16>,
    %c8_27 = arith.constant 8 : index
    %c126 = arith.constant 126 : index
    %46 = vector.load %arg10[%c8_27, %c126] : memref<32x512xbf16, #tpu.memory_space<vmem>>, vector<8x256xbf16>
    %c-2_i32 = arith.constant -2 : i32
    %47 = vector.broadcast %c-2_i32 : i32 to vector<1x256xi32>
    %48 = arith.addi %2, %47 : vector<1x256xi32>
    %c0_i32_28 = arith.constant 0 : i32
    %49 = vector.broadcast %c0_i32_28 : i32 to vector<1x256xi32>
    %50 = arith.cmpi sge, %48, %49 : vector<1x256xi32>
    %c-2_i32_29 = arith.constant -2 : i32
    %51 = vector.broadcast %c-2_i32_29 : i32 to vector<1x256xi32>
    %52 = arith.addi %2, %51 : vector<1x256xi32>
    %c16_i32_30 = arith.constant 16 : i32
    %53 = vector.broadcast %c16_i32_30 : i32 to vector<1x256xi32>
    %54 = arith.cmpi slt, %52, %53 : vector<1x256xi32>
    %55 = arith.andi %50, %54 : vector<1x256xi1>
    %cst_31 = arith.constant 0.000000e+00 : bf16
    %56 = vector.broadcast %cst_31 : bf16 to vector<8x256xbf16>
    %57 = vector.shape_cast %55 : vector<1x256xi1> to vector<1x256xi1>
    %58 = vector.broadcast %57 : vector<1x256xi1> to vector<8x256xi1>
    %59 = arith.select %58, %46, %56 : vector<8x256xi1>, vector<8x256xbf16>
    %c24 = arith.constant 24 : index
    %c0_32 = arith.constant 0 : index
    %60 = vector.load %arg11[%c24, %c0_32] : memref<292x256xbf16, #tpu.memory_space<vmem>>, vector<8x256xbf16>
    tpu.vector_store %arg11[%c24, %c0_32], %59 {strides = array<i32>} : memref<292x256xbf16, #tpu.memory_space<vmem>>, vector<8x256xbf16>,
    %c8_33 = arith.constant 8 : index
    %c127_34 = arith.constant 127 : index
    %61 = vector.load %arg10[%c8_33, %c127_34] : memref<32x512xbf16, #tpu.memory_space<vmem>>, vector<8x256xbf16>
    %cst_35 = arith.constant 0.000000e+00 : bf16
    %62 = vector.broadcast %cst_35 : bf16 to vector<8x256xbf16>
    %63 = vector.shape_cast %23 : vector<1x256xi1> to vector<1x256xi1>
    %64 = vector.broadcast %63 : vector<1x256xi1> to vector<8x256xi1>
    %65 = arith.select %64, %61, %62 : vector<8x256xi1>, vector<8x256xbf16>
    %c32 = arith.constant 32 : index
    %c0_36 = arith.constant 0 : index
    %66 = vector.load %arg11[%c32, %c0_36] : memref<292x256xbf16, #tpu.memory_space<vmem>>, vector<8x256xbf16>
    tpu.vector_store %arg11[%c32, %c0_36], %65 {strides = array<i32>} : memref<292x256xbf16, #tpu.memory_space<vmem>>, vector<8x256xbf16>,
    %c8_37 = arith.constant 8 : index
    %c128_38 = arith.constant 128 : index
    %67 = vector.load %arg10[%c8_37, %c128_38] : memref<32x512xbf16, #tpu.memory_space<vmem>>, vector<8x256xbf16>
    %c40 = arith.constant 40 : index
    %c0_39 = arith.constant 0 : index
    %68 = vector.load %arg11[%c40, %c0_39] : memref<292x256xbf16, #tpu.memory_space<vmem>>, vector<8x256xbf16>
    tpu.vector_store %arg11[%c40, %c0_39], %67 {strides = array<i32>} : memref<292x256xbf16, #tpu.memory_space<vmem>>, vector<8x256xbf16>,
    %c8_40 = arith.constant 8 : index
    %c129_41 = arith.constant 129 : index
    %69 = vector.load %arg10[%c8_40, %c129_41] : memref<32x512xbf16, #tpu.memory_space<vmem>>, vector<8x256xbf16>
    %cst_42 = arith.constant 0.000000e+00 : bf16
    %70 = vector.broadcast %cst_42 : bf16 to vector<8x256xbf16>
    %71 = vector.shape_cast %40 : vector<1x256xi1> to vector<1x256xi1>
    %72 = vector.broadcast %71 : vector<1x256xi1> to vector<8x256xi1>
    %73 = arith.select %72, %69, %70 : vector<8x256xi1>, vector<8x256xbf16>
    %c48 = arith.constant 48 : index
    %c0_43 = arith.constant 0 : index
    %74 = vector.load %arg11[%c48, %c0_43] : memref<292x256xbf16, #tpu.memory_space<vmem>>, vector<8x256xbf16>
    tpu.vector_store %arg11[%c48, %c0_43], %73 {strides = array<i32>} : memref<292x256xbf16, #tpu.memory_space<vmem>>, vector<8x256xbf16>,
    %c8_44 = arith.constant 8 : index
    %c130 = arith.constant 130 : index
    %75 = vector.load %arg10[%c8_44, %c130] : memref<32x512xbf16, #tpu.memory_space<vmem>>, vector<8x256xbf16>
    %c2_i32 = arith.constant 2 : i32
    %76 = vector.broadcast %c2_i32 : i32 to vector<1x256xi32>
    %77 = arith.addi %2, %76 : vector<1x256xi32>
    %c0_i32_45 = arith.constant 0 : i32
    %78 = vector.broadcast %c0_i32_45 : i32 to vector<1x256xi32>
    %79 = arith.cmpi sge, %77, %78 : vector<1x256xi32>
    %c2_i32_46 = arith.constant 2 : i32
    %80 = vector.broadcast %c2_i32_46 : i32 to vector<1x256xi32>
    %81 = arith.addi %2, %80 : vector<1x256xi32>
    %c16_i32_47 = arith.constant 16 : i32
    %82 = vector.broadcast %c16_i32_47 : i32 to vector<1x256xi32>
    %83 = arith.cmpi slt, %81, %82 : vector<1x256xi32>
    %84 = arith.andi %79, %83 : vector<1x256xi1>
    %cst_48 = arith.constant 0.000000e+00 : bf16
    %85 = vector.broadcast %cst_48 : bf16 to vector<8x256xbf16>
    %86 = vector.shape_cast %84 : vector<1x256xi1> to vector<1x256xi1>
    %87 = vector.broadcast %86 : vector<1x256xi1> to vector<8x256xi1>
    %88 = arith.select %87, %75, %85 : vector<8x256xi1>, vector<8x256xbf16>
    %c56 = arith.constant 56 : index
    %c0_49 = arith.constant 0 : index
    %89 = vector.load %arg11[%c56, %c0_49] : memref<292x256xbf16, #tpu.memory_space<vmem>>, vector<8x256xbf16>
    tpu.vector_store %arg11[%c56, %c0_49], %88 {strides = array<i32>} : memref<292x256xbf16, #tpu.memory_space<vmem>>, vector<8x256xbf16>,
    %c16_50 = arith.constant 16 : index
    %c125 = arith.constant 125 : index
    %90 = vector.load %arg10[%c16_50, %c125] : memref<32x512xbf16, #tpu.memory_space<vmem>>, vector<8x256xbf16>
    %c-3_i32 = arith.constant -3 : i32
    %91 = vector.broadcast %c-3_i32 : i32 to vector<1x256xi32>
    %92 = arith.addi %2, %91 : vector<1x256xi32>
    %c0_i32_51 = arith.constant 0 : i32
    %93 = vector.broadcast %c0_i32_51 : i32 to vector<1x256xi32>
    %94 = arith.cmpi sge, %92, %93 : vector<1x256xi32>
    %c-3_i32_52 = arith.constant -3 : i32
    %95 = vector.broadcast %c-3_i32_52 : i32 to vector<1x256xi32>
    %96 = arith.addi %2, %95 : vector<1x256xi32>
    %c16_i32_53 = arith.constant 16 : i32
    %97 = vector.broadcast %c16_i32_53 : i32 to vector<1x256xi32>
    %98 = arith.cmpi slt, %96, %97 : vector<1x256xi32>
    %99 = arith.andi %94, %98 : vector<1x256xi1>
    %cst_54 = arith.constant 0.000000e+00 : bf16
    %100 = vector.broadcast %cst_54 : bf16 to vector<8x256xbf16>
    %101 = vector.shape_cast %99 : vector<1x256xi1> to vector<1x256xi1>
    %102 = vector.broadcast %101 : vector<1x256xi1> to vector<8x256xi1>
    %103 = arith.select %102, %90, %100 : vector<8x256xi1>, vector<8x256xbf16>
    %c64 = arith.constant 64 : index
    %c0_55 = arith.constant 0 : index
    %104 = vector.load %arg11[%c64, %c0_55] : memref<292x256xbf16, #tpu.memory_space<vmem>>, vector<8x256xbf16>
    tpu.vector_store %arg11[%c64, %c0_55], %103 {strides = array<i32>} : memref<292x256xbf16, #tpu.memory_space<vmem>>, vector<8x256xbf16>,
    %c16_56 = arith.constant 16 : index
    %c126_57 = arith.constant 126 : index
    %105 = vector.load %arg10[%c16_56, %c126_57] : memref<32x512xbf16, #tpu.memory_space<vmem>>, vector<8x256xbf16>
    %cst_58 = arith.constant 0.000000e+00 : bf16
    %106 = vector.broadcast %cst_58 : bf16 to vector<8x256xbf16>
    %107 = vector.shape_cast %55 : vector<1x256xi1> to vector<1x256xi1>
    %108 = vector.broadcast %107 : vector<1x256xi1> to vector<8x256xi1>
    %109 = arith.select %108, %105, %106 : vector<8x256xi1>, vector<8x256xbf16>
    %c72 = arith.constant 72 : index
    %c0_59 = arith.constant 0 : index
    %110 = vector.load %arg11[%c72, %c0_59] : memref<292x256xbf16, #tpu.memory_space<vmem>>, vector<8x256xbf16>
    tpu.vector_store %arg11[%c72, %c0_59], %109 {strides = array<i32>} : memref<292x256xbf16, #tpu.memory_space<vmem>>, vector<8x256xbf16>,
    %c16_60 = arith.constant 16 : index
    %c127_61 = arith.constant 127 : index
    %111 = vector.load %arg10[%c16_60, %c127_61] : memref<32x512xbf16, #tpu.memory_space<vmem>>, vector<8x256xbf16>
    %cst_62 = arith.constant 0.000000e+00 : bf16
    %112 = vector.broadcast %cst_62 : bf16 to vector<8x256xbf16>
    %113 = vector.shape_cast %23 : vector<1x256xi1> to vector<1x256xi1>
    %114 = vector.broadcast %113 : vector<1x256xi1> to vector<8x256xi1>
    %115 = arith.select %114, %111, %112 : vector<8x256xi1>, vector<8x256xbf16>
    %c80 = arith.constant 80 : index
    %c0_63 = arith.constant 0 : index
    %116 = vector.load %arg11[%c80, %c0_63] : memref<292x256xbf16, #tpu.memory_space<vmem>>, vector<8x256xbf16>
    tpu.vector_store %arg11[%c80, %c0_63], %115 {strides = array<i32>} : memref<292x256xbf16, #tpu.memory_space<vmem>>, vector<8x256xbf16>,
    %c16_64 = arith.constant 16 : index
    %c128_65 = arith.constant 128 : index
    %117 = vector.load %arg10[%c16_64, %c128_65] : memref<32x512xbf16, #tpu.memory_space<vmem>>, vector<8x256xbf16>
    %c88 = arith.constant 88 : index
    %c0_66 = arith.constant 0 : index
    %118 = vector.load %arg11[%c88, %c0_66] : memref<292x256xbf16, #tpu.memory_space<vmem>>, vector<8x256xbf16>
    tpu.vector_store %arg11[%c88, %c0_66], %117 {strides = array<i32>} : memref<292x256xbf16, #tpu.memory_space<vmem>>, vector<8x256xbf16>,
    %c16_67 = arith.constant 16 : index
    %c129_68 = arith.constant 129 : index
    %119 = vector.load %arg10[%c16_67, %c129_68] : memref<32x512xbf16, #tpu.memory_space<vmem>>, vector<8x256xbf16>
    %cst_69 = arith.constant 0.000000e+00 : bf16
    %120 = vector.broadcast %cst_69 : bf16 to vector<8x256xbf16>
    %121 = vector.shape_cast %40 : vector<1x256xi1> to vector<1x256xi1>
    %122 = vector.broadcast %121 : vector<1x256xi1> to vector<8x256xi1>
    %123 = arith.select %122, %119, %120 : vector<8x256xi1>, vector<8x256xbf16>
    %c96 = arith.constant 96 : index
    %c0_70 = arith.constant 0 : index
    %124 = vector.load %arg11[%c96, %c0_70] : memref<292x256xbf16, #tpu.memory_space<vmem>>, vector<8x256xbf16>
    tpu.vector_store %arg11[%c96, %c0_70], %123 {strides = array<i32>} : memref<292x256xbf16, #tpu.memory_space<vmem>>, vector<8x256xbf16>,
    %c16_71 = arith.constant 16 : index
    %c130_72 = arith.constant 130 : index
    %125 = vector.load %arg10[%c16_71, %c130_72] : memref<32x512xbf16, #tpu.memory_space<vmem>>, vector<8x256xbf16>
    %cst_73 = arith.constant 0.000000e+00 : bf16
    %126 = vector.broadcast %cst_73 : bf16 to vector<8x256xbf16>
    %127 = vector.shape_cast %84 : vector<1x256xi1> to vector<1x256xi1>
    %128 = vector.broadcast %127 : vector<1x256xi1> to vector<8x256xi1>
    %129 = arith.select %128, %125, %126 : vector<8x256xi1>, vector<8x256xbf16>
    %c104 = arith.constant 104 : index
    %c0_74 = arith.constant 0 : index
    %130 = vector.load %arg11[%c104, %c0_74] : memref<292x256xbf16, #tpu.memory_space<vmem>>, vector<8x256xbf16>
    tpu.vector_store %arg11[%c104, %c0_74], %129 {strides = array<i32>} : memref<292x256xbf16, #tpu.memory_space<vmem>>, vector<8x256xbf16>,
    %c16_75 = arith.constant 16 : index
    %c131 = arith.constant 131 : index
    %131 = vector.load %arg10[%c16_75, %c131] : memref<32x512xbf16, #tpu.memory_space<vmem>>, vector<8x256xbf16>
    %c3_i32 = arith.constant 3 : i32
    %132 = vector.broadcast %c3_i32 : i32 to vector<1x256xi32>
    %133 = arith.addi %2, %132 : vector<1x256xi32>
    %c0_i32_76 = arith.constant 0 : i32
    %134 = vector.broadcast %c0_i32_76 : i32 to vector<1x256xi32>
    %135 = arith.cmpi sge, %133, %134 : vector<1x256xi32>
    %c3_i32_77 = arith.constant 3 : i32
    %136 = vector.broadcast %c3_i32_77 : i32 to vector<1x256xi32>
    %137 = arith.addi %2, %136 : vector<1x256xi32>
    %c16_i32_78 = arith.constant 16 : i32
    %138 = vector.broadcast %c16_i32_78 : i32 to vector<1x256xi32>
    %139 = arith.cmpi slt, %137, %138 : vector<1x256xi32>
    %140 = arith.andi %135, %139 : vector<1x256xi1>
    %cst_79 = arith.constant 0.000000e+00 : bf16
    %141 = vector.broadcast %cst_79 : bf16 to vector<8x256xbf16>
    %142 = vector.shape_cast %140 : vector<1x256xi1> to vector<1x256xi1>
    %143 = vector.broadcast %142 : vector<1x256xi1> to vector<8x256xi1>
    %144 = arith.select %143, %131, %141 : vector<8x256xi1>, vector<8x256xbf16>
    %c112 = arith.constant 112 : index
    %c0_80 = arith.constant 0 : index
    %145 = vector.load %arg11[%c112, %c0_80] : memref<292x256xbf16, #tpu.memory_space<vmem>>, vector<8x256xbf16>
    tpu.vector_store %arg11[%c112, %c0_80], %144 {strides = array<i32>} : memref<292x256xbf16, #tpu.memory_space<vmem>>, vector<8x256xbf16>,
    %c0_81 = arith.constant 0 : index
    %c0_82 = arith.constant 0 : index
    %146 = vector.load %arg5[%c0_81, %c0_82] : memref<24x120xbf16, #tpu.memory_space<vmem>>, vector<24x120xbf16>
    %c0_83 = arith.constant 0 : index
    %c0_84 = arith.constant 0 : index
    %147 = vector.load %arg11[%c0_83, %c0_84] : memref<292x256xbf16, #tpu.memory_space<vmem>>, vector<120x256xbf16>
    %cst_85 = arith.constant dense<0.000000e+00> : vector<24x256xf32>
    %148 = tpu.matmul %146, %147, %cst_85 {dimension_numbers = #tpu.dot_dimension_numbers<[1], [0], [0], [1], [0, 0, 1, 1], [], []>} : vector<24x120xbf16>, vector<120x256xbf16>, vector<24x256xf32> -> vector<24x256xf32>
    %c32_86 = arith.constant 32 : index
    %c0_87 = arith.constant 0 : index
    %149 = vector.load %arg3[%c32_86, %c0_87] : memref<112x1xf32, #tpu.memory_space<vmem>>, vector<24x1xf32>
    %150 = vector.broadcast %149 : vector<24x1xf32> to vector<24x256xf32>
    %151 = arith.addf %148, %150 : vector<24x256xf32>
    %152 = arith.truncf %151 : vector<24x256xf32> to vector<24x256xbf16>
    %c0_88 = arith.constant 0 : index
    %c128_89 = arith.constant 128 : index
    %153 = vector.load %arg10[%c0_88, %c128_89] : memref<32x512xbf16, #tpu.memory_space<vmem>>, vector<24x256xbf16>
    tpu.vector_store %arg10[%c0_88, %c128_89], %152 {strides = array<i32>} : memref<32x512xbf16, #tpu.memory_space<vmem>>, vector<24x256xbf16>,
    %c0_90 = arith.constant 0 : index
    %c112_91 = arith.constant 112 : index
    %154 = vector.load %arg10[%c0_90, %c112_91] : memref<32x512xbf16, #tpu.memory_space<vmem>>, vector<8x256xbf16>
    %c0_92 = arith.constant 0 : index
    %c0_93 = arith.constant 0 : index
    %155 = vector.load %arg11[%c0_92, %c0_93] : memref<292x256xbf16, #tpu.memory_space<vmem>>, vector<8x256xbf16>
    tpu.vector_store %arg11[%c0_92, %c0_93], %154 {strides = array<i32>} : memref<292x256xbf16, #tpu.memory_space<vmem>>, vector<8x256xbf16>,
    %c0_94 = arith.constant 0 : index
    %c128_95 = arith.constant 128 : index
    %156 = vector.load %arg10[%c0_94, %c128_95] : memref<32x512xbf16, #tpu.memory_space<vmem>>, vector<8x256xbf16>
    %c8_96 = arith.constant 8 : index
    %c0_97 = arith.constant 0 : index
    %157 = vector.load %arg11[%c8_96, %c0_97] : memref<292x256xbf16, #tpu.memory_space<vmem>>, vector<8x256xbf16>
    tpu.vector_store %arg11[%c8_96, %c0_97], %156 {strides = array<i32>} : memref<292x256xbf16, #tpu.memory_space<vmem>>, vector<8x256xbf16>,
    %c0_98 = arith.constant 0 : index
    %c144 = arith.constant 144 : index
    %158 = vector.load %arg10[%c0_98, %c144] : memref<32x512xbf16, #tpu.memory_space<vmem>>, vector<8x256xbf16>
    %c16_99 = arith.constant 16 : index
    %c0_100 = arith.constant 0 : index
    %159 = vector.load %arg11[%c16_99, %c0_100] : memref<292x256xbf16, #tpu.memory_space<vmem>>, vector<8x256xbf16>
    tpu.vector_store %arg11[%c16_99, %c0_100], %158 {strides = array<i32>} : memref<292x256xbf16, #tpu.memory_space<vmem>>, vector<8x256xbf16>,
    %c8_101 = arith.constant 8 : index
    %c96_102 = arith.constant 96 : index
    %160 = vector.load %arg10[%c8_101, %c96_102] : memref<32x512xbf16, #tpu.memory_space<vmem>>, vector<8x256xbf16>
    %c24_103 = arith.constant 24 : index
    %c0_104 = arith.constant 0 : index
    %161 = vector.load %arg11[%c24_103, %c0_104] : memref<292x256xbf16, #tpu.memory_space<vmem>>, vector<8x256xbf16>
    tpu.vector_store %arg11[%c24_103, %c0_104], %160 {strides = array<i32>} : memref<292x256xbf16, #tpu.memory_space<vmem>>, vector<8x256xbf16>,
    %c8_105 = arith.constant 8 : index
    %c112_106 = arith.constant 112 : index
    %162 = vector.load %arg10[%c8_105, %c112_106] : memref<32x512xbf16, #tpu.memory_space<vmem>>, vector<8x256xbf16>
    %c32_107 = arith.constant 32 : index
    %c0_108 = arith.constant 0 : index
    %163 = vector.load %arg11[%c32_107, %c0_108] : memref<292x256xbf16, #tpu.memory_space<vmem>>, vector<8x256xbf16>
    tpu.vector_store %arg11[%c32_107, %c0_108], %162 {strides = array<i32>} : memref<292x256xbf16, #tpu.memory_space<vmem>>, vector<8x256xbf16>,
    %c8_109 = arith.constant 8 : index
    %c128_110 = arith.constant 128 : index
    %164 = vector.load %arg10[%c8_109, %c128_110] : memref<32x512xbf16, #tpu.memory_space<vmem>>, vector<8x256xbf16>
    %c40_111 = arith.constant 40 : index
    %c0_112 = arith.constant 0 : index
    %165 = vector.load %arg11[%c40_111, %c0_112] : memref<292x256xbf16, #tpu.memory_space<vmem>>, vector<8x256xbf16>
    tpu.vector_store %arg11[%c40_111, %c0_112], %164 {strides = array<i32>} : memref<292x256xbf16, #tpu.memory_space<vmem>>, vector<8x256xbf16>,
    %c8_113 = arith.constant 8 : index
    %c144_114 = arith.constant 144 : index
    %166 = vector.load %arg10[%c8_113, %c144_114] : memref<32x512xbf16, #tpu.memory_space<vmem>>, vector<8x256xbf16>
    %c48_115 = arith.constant 48 : index
    %c0_116 = arith.constant 0 : index
    %167 = vector.load %arg11[%c48_115, %c0_116] : memref<292x256xbf16, #tpu.memory_space<vmem>>, vector<8x256xbf16>
    tpu.vector_store %arg11[%c48_115, %c0_116], %166 {strides = array<i32>} : memref<292x256xbf16, #tpu.memory_space<vmem>>, vector<8x256xbf16>,
    %c8_117 = arith.constant 8 : index
    %c160 = arith.constant 160 : index
    %168 = vector.load %arg10[%c8_117, %c160] : memref<32x512xbf16, #tpu.memory_space<vmem>>, vector<8x256xbf16>
    %c56_118 = arith.constant 56 : index
    %c0_119 = arith.constant 0 : index
    %169 = vector.load %arg11[%c56_118, %c0_119] : memref<292x256xbf16, #tpu.memory_space<vmem>>, vector<8x256xbf16>
    tpu.vector_store %arg11[%c56_118, %c0_119], %168 {strides = array<i32>} : memref<292x256xbf16, #tpu.memory_space<vmem>>, vector<8x256xbf16>,
    %c16_120 = arith.constant 16 : index
    %c80_121 = arith.constant 80 : index
    %170 = vector.load %arg10[%c16_120, %c80_121] : memref<32x512xbf16, #tpu.memory_space<vmem>>, vector<8x256xbf16>
    %c64_122 = arith.constant 64 : index
    %c0_123 = arith.constant 0 : index
    %171 = vector.load %arg11[%c64_122, %c0_123] : memref<292x256xbf16, #tpu.memory_space<vmem>>, vector<8x256xbf16>
    tpu.vector_store %arg11[%c64_122, %c0_123], %170 {strides = array<i32>} : memref<292x256xbf16, #tpu.memory_space<vmem>>, vector<8x256xbf16>,
    %c16_124 = arith.constant 16 : index
    %c96_125 = arith.constant 96 : index
    %172 = vector.load %arg10[%c16_124, %c96_125] : memref<32x512xbf16, #tpu.memory_space<vmem>>, vector<8x256xbf16>
    %c72_126 = arith.constant 72 : index
    %c0_127 = arith.constant 0 : index
    %173 = vector.load %arg11[%c72_126, %c0_127] : memref<292x256xbf16, #tpu.memory_space<vmem>>, vector<8x256xbf16>
    tpu.vector_store %arg11[%c72_126, %c0_127], %172 {strides = array<i32>} : memref<292x256xbf16, #tpu.memory_space<vmem>>, vector<8x256xbf16>,
    %c16_128 = arith.constant 16 : index
    %c112_129 = arith.constant 112 : index
    %174 = vector.load %arg10[%c16_128, %c112_129] : memref<32x512xbf16, #tpu.memory_space<vmem>>, vector<8x256xbf16>
    %c80_130 = arith.constant 80 : index
    %c0_131 = arith.constant 0 : index
    %175 = vector.load %arg11[%c80_130, %c0_131] : memref<292x256xbf16, #tpu.memory_space<vmem>>, vector<8x256xbf16>
    tpu.vector_store %arg11[%c80_130, %c0_131], %174 {strides = array<i32>} : memref<292x256xbf16, #tpu.memory_space<vmem>>, vector<8x256xbf16>,
    %c16_132 = arith.constant 16 : index
    %c128_133 = arith.constant 128 : index
    %176 = vector.load %arg10[%c16_132, %c128_133] : memref<32x512xbf16, #tpu.memory_space<vmem>>, vector<8x256xbf16>
    %c88_134 = arith.constant 88 : index
    %c0_135 = arith.constant 0 : index
    %177 = vector.load %arg11[%c88_134, %c0_135] : memref<292x256xbf16, #tpu.memory_space<vmem>>, vector<8x256xbf16>
    tpu.vector_store %arg11[%c88_134, %c0_135], %176 {strides = array<i32>} : memref<292x256xbf16, #tpu.memory_space<vmem>>, vector<8x256xbf16>,
    %c16_136 = arith.constant 16 : index
    %c144_137 = arith.constant 144 : index
    %178 = vector.load %arg10[%c16_136, %c144_137] : memref<32x512xbf16, #tpu.memory_space<vmem>>, vector<8x256xbf16>
    %c96_138 = arith.constant 96 : index
    %c0_139 = arith.constant 0 : index
    %179 = vector.load %arg11[%c96_138, %c0_139] : memref<292x256xbf16, #tpu.memory_space<vmem>>, vector<8x256xbf16>
    tpu.vector_store %arg11[%c96_138, %c0_139], %178 {strides = array<i32>} : memref<292x256xbf16, #tpu.memory_space<vmem>>, vector<8x256xbf16>,
    %c16_140 = arith.constant 16 : index
    %c160_141 = arith.constant 160 : index
    %180 = vector.load %arg10[%c16_140, %c160_141] : memref<32x512xbf16, #tpu.memory_space<vmem>>, vector<8x256xbf16>
    %c104_142 = arith.constant 104 : index
    %c0_143 = arith.constant 0 : index
    %181 = vector.load %arg11[%c104_142, %c0_143] : memref<292x256xbf16, #tpu.memory_space<vmem>>, vector<8x256xbf16>
    tpu.vector_store %arg11[%c104_142, %c0_143], %180 {strides = array<i32>} : memref<292x256xbf16, #tpu.memory_space<vmem>>, vector<8x256xbf16>,
    %c16_144 = arith.constant 16 : index
    %c176 = arith.constant 176 : index
    %182 = vector.load %arg10[%c16_144, %c176] : memref<32x512xbf16, #tpu.memory_space<vmem>>, vector<8x256xbf16>
    %c112_145 = arith.constant 112 : index
    %c0_146 = arith.constant 0 : index
    %183 = vector.load %arg11[%c112_145, %c0_146] : memref<292x256xbf16, #tpu.memory_space<vmem>>, vector<8x256xbf16>
    tpu.vector_store %arg11[%c112_145, %c0_146], %182 {strides = array<i32>} : memref<292x256xbf16, #tpu.memory_space<vmem>>, vector<8x256xbf16>,
    %c0_147 = arith.constant 0 : index
    %c0_148 = arith.constant 0 : index
    %184 = vector.load %arg6[%c0_147, %c0_148] : memref<24x120xbf16, #tpu.memory_space<vmem>>, vector<24x120xbf16>
    %c0_149 = arith.constant 0 : index
    %c0_150 = arith.constant 0 : index
    %185 = vector.load %arg11[%c0_149, %c0_150] : memref<292x256xbf16, #tpu.memory_space<vmem>>, vector<120x256xbf16>
    %cst_151 = arith.constant dense<0.000000e+00> : vector<24x256xf32>
    %186 = tpu.matmul %184, %185, %cst_151 {dimension_numbers = #tpu.dot_dimension_numbers<[1], [0], [0], [1], [0, 0, 1, 1], [], []>} : vector<24x120xbf16>, vector<120x256xbf16>, vector<24x256xf32> -> vector<24x256xf32>
    %c56_152 = arith.constant 56 : index
    %c0_153 = arith.constant 0 : index
    %187 = vector.load %arg3[%c56_152, %c0_153] : memref<112x1xf32, #tpu.memory_space<vmem>>, vector<24x1xf32>
    %188 = vector.broadcast %187 : vector<24x1xf32> to vector<24x256xf32>
    %189 = arith.addf %186, %188 : vector<24x256xf32>
    %190 = arith.truncf %189 : vector<24x256xf32> to vector<24x256xbf16>
    %c0_154 = arith.constant 0 : index
    %c128_155 = arith.constant 128 : index
    %191 = vector.load %arg10[%c0_154, %c128_155] : memref<32x512xbf16, #tpu.memory_space<vmem>>, vector<24x256xbf16>
    tpu.vector_store %arg10[%c0_154, %c128_155], %190 {strides = array<i32>} : memref<32x512xbf16, #tpu.memory_space<vmem>>, vector<24x256xbf16>,
    %c0_156 = arith.constant 0 : index
    %c77 = arith.constant 77 : index
    %192 = vector.load %arg10[%c0_156, %c77] : memref<32x512xbf16, #tpu.memory_space<vmem>>, vector<8x256xbf16>
    %cst_157 = arith.constant 0.000000e+00 : bf16
    %193 = vector.broadcast %cst_157 : bf16 to vector<8x256xbf16>
    %194 = vector.shape_cast %99 : vector<1x256xi1> to vector<1x256xi1>
    %195 = vector.broadcast %194 : vector<1x256xi1> to vector<8x256xi1>
    %196 = arith.select %195, %192, %193 : vector<8x256xi1>, vector<8x256xbf16>
    %c0_158 = arith.constant 0 : index
    %c0_159 = arith.constant 0 : index
    %197 = vector.load %arg11[%c0_158, %c0_159] : memref<292x256xbf16, #tpu.memory_space<vmem>>, vector<8x256xbf16>
    tpu.vector_store %arg11[%c0_158, %c0_159], %196 {strides = array<i32>} : memref<292x256xbf16, #tpu.memory_space<vmem>>, vector<8x256xbf16>,
    %c0_160 = arith.constant 0 : index
    %c80_161 = arith.constant 80 : index
    %198 = vector.load %arg10[%c0_160, %c80_161] : memref<32x512xbf16, #tpu.memory_space<vmem>>, vector<8x256xbf16>
    %c8_162 = arith.constant 8 : index
    %c0_163 = arith.constant 0 : index
    %199 = vector.load %arg11[%c8_162, %c0_163] : memref<292x256xbf16, #tpu.memory_space<vmem>>, vector<8x256xbf16>
    tpu.vector_store %arg11[%c8_162, %c0_163], %198 {strides = array<i32>} : memref<292x256xbf16, #tpu.memory_space<vmem>>, vector<8x256xbf16>,
    %c0_164 = arith.constant 0 : index
    %c83 = arith.constant 83 : index
    %200 = vector.load %arg10[%c0_164, %c83] : memref<32x512xbf16, #tpu.memory_space<vmem>>, vector<8x256xbf16>
    %cst_165 = arith.constant 0.000000e+00 : bf16
    %201 = vector.broadcast %cst_165 : bf16 to vector<8x256xbf16>
    %202 = vector.shape_cast %140 : vector<1x256xi1> to vector<1x256xi1>
    %203 = vector.broadcast %202 : vector<1x256xi1> to vector<8x256xi1>
    %204 = arith.select %203, %200, %201 : vector<8x256xi1>, vector<8x256xbf16>
    %c16_166 = arith.constant 16 : index
    %c0_167 = arith.constant 0 : index
    %205 = vector.load %arg11[%c16_166, %c0_167] : memref<292x256xbf16, #tpu.memory_space<vmem>>, vector<8x256xbf16>
    tpu.vector_store %arg11[%c16_166, %c0_167], %204 {strides = array<i32>} : memref<292x256xbf16, #tpu.memory_space<vmem>>, vector<8x256xbf16>,
    %c0_168 = arith.constant 0 : index
    %c125_169 = arith.constant 125 : index
    %206 = vector.load %arg10[%c0_168, %c125_169] : memref<32x512xbf16, #tpu.memory_space<vmem>>, vector<8x256xbf16>
    %cst_170 = arith.constant 0.000000e+00 : bf16
    %207 = vector.broadcast %cst_170 : bf16 to vector<8x256xbf16>
    %208 = vector.shape_cast %99 : vector<1x256xi1> to vector<1x256xi1>
    %209 = vector.broadcast %208 : vector<1x256xi1> to vector<8x256xi1>
    %210 = arith.select %209, %206, %207 : vector<8x256xi1>, vector<8x256xbf16>
    %c24_171 = arith.constant 24 : index
    %c0_172 = arith.constant 0 : index
    %211 = vector.load %arg11[%c24_171, %c0_172] : memref<292x256xbf16, #tpu.memory_space<vmem>>, vector<8x256xbf16>
    tpu.vector_store %arg11[%c24_171, %c0_172], %210 {strides = array<i32>} : memref<292x256xbf16, #tpu.memory_space<vmem>>, vector<8x256xbf16>,
    %c0_173 = arith.constant 0 : index
    %c128_174 = arith.constant 128 : index
    %212 = vector.load %arg10[%c0_173, %c128_174] : memref<32x512xbf16, #tpu.memory_space<vmem>>, vector<8x256xbf16>
    %c32_175 = arith.constant 32 : index
    %c0_176 = arith.constant 0 : index
    %213 = vector.load %arg11[%c32_175, %c0_176] : memref<292x256xbf16, #tpu.memory_space<vmem>>, vector<8x256xbf16>
    tpu.vector_store %arg11[%c32_175, %c0_176], %212 {strides = array<i32>} : memref<292x256xbf16, #tpu.memory_space<vmem>>, vector<8x256xbf16>,
    %c0_177 = arith.constant 0 : index
    %c131_178 = arith.constant 131 : index
    %214 = vector.load %arg10[%c0_177, %c131_178] : memref<32x512xbf16, #tpu.memory_space<vmem>>, vector<8x256xbf16>
    %cst_179 = arith.constant 0.000000e+00 : bf16
    %215 = vector.broadcast %cst_179 : bf16 to vector<8x256xbf16>
    %216 = vector.shape_cast %140 : vector<1x256xi1> to vector<1x256xi1>
    %217 = vector.broadcast %216 : vector<1x256xi1> to vector<8x256xi1>
    %218 = arith.select %217, %214, %215 : vector<8x256xi1>, vector<8x256xbf16>
    %c40_180 = arith.constant 40 : index
    %c0_181 = arith.constant 0 : index
    %219 = vector.load %arg11[%c40_180, %c0_181] : memref<292x256xbf16, #tpu.memory_space<vmem>>, vector<8x256xbf16>
    tpu.vector_store %arg11[%c40_180, %c0_181], %218 {strides = array<i32>} : memref<292x256xbf16, #tpu.memory_space<vmem>>, vector<8x256xbf16>,
    %c0_182 = arith.constant 0 : index
    %c173 = arith.constant 173 : index
    %220 = vector.load %arg10[%c0_182, %c173] : memref<32x512xbf16, #tpu.memory_space<vmem>>, vector<8x256xbf16>
    %cst_183 = arith.constant 0.000000e+00 : bf16
    %221 = vector.broadcast %cst_183 : bf16 to vector<8x256xbf16>
    %222 = vector.shape_cast %99 : vector<1x256xi1> to vector<1x256xi1>
    %223 = vector.broadcast %222 : vector<1x256xi1> to vector<8x256xi1>
    %224 = arith.select %223, %220, %221 : vector<8x256xi1>, vector<8x256xbf16>
    %c48_184 = arith.constant 48 : index
    %c0_185 = arith.constant 0 : index
    %225 = vector.load %arg11[%c48_184, %c0_185] : memref<292x256xbf16, #tpu.memory_space<vmem>>, vector<8x256xbf16>
    tpu.vector_store %arg11[%c48_184, %c0_185], %224 {strides = array<i32>} : memref<292x256xbf16, #tpu.memory_space<vmem>>, vector<8x256xbf16>,
    %c0_186 = arith.constant 0 : index
    %c176_187 = arith.constant 176 : index
    %226 = vector.load %arg10[%c0_186, %c176_187] : memref<32x512xbf16, #tpu.memory_space<vmem>>, vector<8x256xbf16>
    %c56_188 = arith.constant 56 : index
    %c0_189 = arith.constant 0 : index
    %227 = vector.load %arg11[%c56_188, %c0_189] : memref<292x256xbf16, #tpu.memory_space<vmem>>, vector<8x256xbf16>
    tpu.vector_store %arg11[%c56_188, %c0_189], %226 {strides = array<i32>} : memref<292x256xbf16, #tpu.memory_space<vmem>>, vector<8x256xbf16>,
    %c0_190 = arith.constant 0 : index
    %c179 = arith.constant 179 : index
    %228 = vector.load %arg10[%c0_190, %c179] : memref<32x512xbf16, #tpu.memory_space<vmem>>, vector<8x256xbf16>
    %cst_191 = arith.constant 0.000000e+00 : bf16
    %229 = vector.broadcast %cst_191 : bf16 to vector<8x256xbf16>
    %230 = vector.shape_cast %140 : vector<1x256xi1> to vector<1x256xi1>
    %231 = vector.broadcast %230 : vector<1x256xi1> to vector<8x256xi1>
    %232 = arith.select %231, %228, %229 : vector<8x256xi1>, vector<8x256xbf16>
    %c64_192 = arith.constant 64 : index
    %c0_193 = arith.constant 0 : index
    %233 = vector.load %arg11[%c64_192, %c0_193] : memref<292x256xbf16, #tpu.memory_space<vmem>>, vector<8x256xbf16>
    tpu.vector_store %arg11[%c64_192, %c0_193], %232 {strides = array<i32>} : memref<292x256xbf16, #tpu.memory_space<vmem>>, vector<8x256xbf16>,
    %c8_194 = arith.constant 8 : index
    %c43 = arith.constant 43 : index
    %234 = vector.load %arg10[%c8_194, %c43] : memref<32x512xbf16, #tpu.memory_space<vmem>>, vector<8x256xbf16>
    %c-5_i32 = arith.constant -5 : i32
    %235 = vector.broadcast %c-5_i32 : i32 to vector<1x256xi32>
    %236 = arith.addi %2, %235 : vector<1x256xi32>
    %c0_i32_195 = arith.constant 0 : i32
    %237 = vector.broadcast %c0_i32_195 : i32 to vector<1x256xi32>
    %238 = arith.cmpi sge, %236, %237 : vector<1x256xi32>
    %c-5_i32_196 = arith.constant -5 : i32
    %239 = vector.broadcast %c-5_i32_196 : i32 to vector<1x256xi32>
    %240 = arith.addi %2, %239 : vector<1x256xi32>
    %c16_i32_197 = arith.constant 16 : i32
    %241 = vector.broadcast %c16_i32_197 : i32 to vector<1x256xi32>
    %242 = arith.cmpi slt, %240, %241 : vector<1x256xi32>
    %243 = arith.andi %238, %242 : vector<1x256xi1>
    %cst_198 = arith.constant 0.000000e+00 : bf16
    %244 = vector.broadcast %cst_198 : bf16 to vector<8x256xbf16>
    %245 = vector.shape_cast %243 : vector<1x256xi1> to vector<1x256xi1>
    %246 = vector.broadcast %245 : vector<1x256xi1> to vector<8x256xi1>
    %247 = arith.select %246, %234, %244 : vector<8x256xi1>, vector<8x256xbf16>
    %c72_199 = arith.constant 72 : index
    %c0_200 = arith.constant 0 : index
    %248 = vector.load %arg11[%c72_199, %c0_200] : memref<292x256xbf16, #tpu.memory_space<vmem>>, vector<8x256xbf16>
    tpu.vector_store %arg11[%c72_199, %c0_200], %247 {strides = array<i32>} : memref<292x256xbf16, #tpu.memory_space<vmem>>, vector<8x256xbf16>,
    %c8_201 = arith.constant 8 : index
    %c48_202 = arith.constant 48 : index
    %249 = vector.load %arg10[%c8_201, %c48_202] : memref<32x512xbf16, #tpu.memory_space<vmem>>, vector<8x256xbf16>
    %c80_203 = arith.constant 80 : index
    %c0_204 = arith.constant 0 : index
    %250 = vector.load %arg11[%c80_203, %c0_204] : memref<292x256xbf16, #tpu.memory_space<vmem>>, vector<8x256xbf16>
    tpu.vector_store %arg11[%c80_203, %c0_204], %249 {strides = array<i32>} : memref<292x256xbf16, #tpu.memory_space<vmem>>, vector<8x256xbf16>,
    %c8_205 = arith.constant 8 : index
    %c53 = arith.constant 53 : index
    %251 = vector.load %arg10[%c8_205, %c53] : memref<32x512xbf16, #tpu.memory_space<vmem>>, vector<8x256xbf16>
    %c5_i32 = arith.constant 5 : i32
    %252 = vector.broadcast %c5_i32 : i32 to vector<1x256xi32>
    %253 = arith.addi %2, %252 : vector<1x256xi32>
    %c0_i32_206 = arith.constant 0 : i32
    %254 = vector.broadcast %c0_i32_206 : i32 to vector<1x256xi32>
    %255 = arith.cmpi sge, %253, %254 : vector<1x256xi32>
    %c5_i32_207 = arith.constant 5 : i32
    %256 = vector.broadcast %c5_i32_207 : i32 to vector<1x256xi32>
    %257 = arith.addi %2, %256 : vector<1x256xi32>
    %c16_i32_208 = arith.constant 16 : i32
    %258 = vector.broadcast %c16_i32_208 : i32 to vector<1x256xi32>
    %259 = arith.cmpi slt, %257, %258 : vector<1x256xi32>
    %260 = arith.andi %255, %259 : vector<1x256xi1>
    %cst_209 = arith.constant 0.000000e+00 : bf16
    %261 = vector.broadcast %cst_209 : bf16 to vector<8x256xbf16>
    %262 = vector.shape_cast %260 : vector<1x256xi1> to vector<1x256xi1>
    %263 = vector.broadcast %262 : vector<1x256xi1> to vector<8x256xi1>
    %264 = arith.select %263, %251, %261 : vector<8x256xi1>, vector<8x256xbf16>
    %c88_210 = arith.constant 88 : index
    %c0_211 = arith.constant 0 : index
    %265 = vector.load %arg11[%c88_210, %c0_211] : memref<292x256xbf16, #tpu.memory_space<vmem>>, vector<8x256xbf16>
    tpu.vector_store %arg11[%c88_210, %c0_211], %264 {strides = array<i32>} : memref<292x256xbf16, #tpu.memory_space<vmem>>, vector<8x256xbf16>,
    %c8_212 = arith.constant 8 : index
    %c123 = arith.constant 123 : index
    %266 = vector.load %arg10[%c8_212, %c123] : memref<32x512xbf16, #tpu.memory_space<vmem>>, vector<8x256xbf16>
    %cst_213 = arith.constant 0.000000e+00 : bf16
    %267 = vector.broadcast %cst_213 : bf16 to vector<8x256xbf16>
    %268 = vector.shape_cast %243 : vector<1x256xi1> to vector<1x256xi1>
    %269 = vector.broadcast %268 : vector<1x256xi1> to vector<8x256xi1>
    %270 = arith.select %269, %266, %267 : vector<8x256xi1>, vector<8x256xbf16>
    %c96_214 = arith.constant 96 : index
    %c0_215 = arith.constant 0 : index
    %271 = vector.load %arg11[%c96_214, %c0_215] : memref<292x256xbf16, #tpu.memory_space<vmem>>, vector<8x256xbf16>
    tpu.vector_store %arg11[%c96_214, %c0_215], %270 {strides = array<i32>} : memref<292x256xbf16, #tpu.memory_space<vmem>>, vector<8x256xbf16>,
    %c8_216 = arith.constant 8 : index
    %c128_217 = arith.constant 128 : index
    %272 = vector.load %arg10[%c8_216, %c128_217] : memref<32x512xbf16, #tpu.memory_space<vmem>>, vector<8x256xbf16>
    %c104_218 = arith.constant 104 : index
    %c0_219 = arith.constant 0 : index
    %273 = vector.load %arg11[%c104_218, %c0_219] : memref<292x256xbf16, #tpu.memory_space<vmem>>, vector<8x256xbf16>
    tpu.vector_store %arg11[%c104_218, %c0_219], %272 {strides = array<i32>} : memref<292x256xbf16, #tpu.memory_space<vmem>>, vector<8x256xbf16>,
    %c8_220 = arith.constant 8 : index
    %c133 = arith.constant 133 : index
    %274 = vector.load %arg10[%c8_220, %c133] : memref<32x512xbf16, #tpu.memory_space<vmem>>, vector<8x256xbf16>
    %cst_221 = arith.constant 0.000000e+00 : bf16
    %275 = vector.broadcast %cst_221 : bf16 to vector<8x256xbf16>
    %276 = vector.shape_cast %260 : vector<1x256xi1> to vector<1x256xi1>
    %277 = vector.broadcast %276 : vector<1x256xi1> to vector<8x256xi1>
    %278 = arith.select %277, %274, %275 : vector<8x256xi1>, vector<8x256xbf16>
    %c112_222 = arith.constant 112 : index
    %c0_223 = arith.constant 0 : index
    %279 = vector.load %arg11[%c112_222, %c0_223] : memref<292x256xbf16, #tpu.memory_space<vmem>>, vector<8x256xbf16>
    tpu.vector_store %arg11[%c112_222, %c0_223], %278 {strides = array<i32>} : memref<292x256xbf16, #tpu.memory_space<vmem>>, vector<8x256xbf16>,
    %c8_224 = arith.constant 8 : index
    %c203 = arith.constant 203 : index
    %280 = vector.load %arg10[%c8_224, %c203] : memref<32x512xbf16, #tpu.memory_space<vmem>>, vector<8x256xbf16>
    %cst_225 = arith.constant 0.000000e+00 : bf16
    %281 = vector.broadcast %cst_225 : bf16 to vector<8x256xbf16>
    %282 = vector.shape_cast %243 : vector<1x256xi1> to vector<1x256xi1>
    %283 = vector.broadcast %282 : vector<1x256xi1> to vector<8x256xi1>
    %284 = arith.select %283, %280, %281 : vector<8x256xi1>, vector<8x256xbf16>
    %c120 = arith.constant 120 : index
    %c0_226 = arith.constant 0 : index
    %285 = vector.load %arg11[%c120, %c0_226] : memref<292x256xbf16, #tpu.memory_space<vmem>>, vector<8x256xbf16>
    tpu.vector_store %arg11[%c120, %c0_226], %284 {strides = array<i32>} : memref<292x256xbf16, #tpu.memory_space<vmem>>, vector<8x256xbf16>,
    %c8_227 = arith.constant 8 : index
    %c208 = arith.constant 208 : index
    %286 = vector.load %arg10[%c8_227, %c208] : memref<32x512xbf16, #tpu.memory_space<vmem>>, vector<8x256xbf16>
    %c128_228 = arith.constant 128 : index
    %c0_229 = arith.constant 0 : index
    %287 = vector.load %arg11[%c128_228, %c0_229] : memref<292x256xbf16, #tpu.memory_space<vmem>>, vector<8x256xbf16>
    tpu.vector_store %arg11[%c128_228, %c0_229], %286 {strides = array<i32>} : memref<292x256xbf16, #tpu.memory_space<vmem>>, vector<8x256xbf16>,
    %c8_230 = arith.constant 8 : index
    %c213 = arith.constant 213 : index
    %288 = vector.load %arg10[%c8_230, %c213] : memref<32x512xbf16, #tpu.memory_space<vmem>>, vector<8x256xbf16>
    %cst_231 = arith.constant 0.000000e+00 : bf16
    %289 = vector.broadcast %cst_231 : bf16 to vector<8x256xbf16>
    %290 = vector.shape_cast %260 : vector<1x256xi1> to vector<1x256xi1>
    %291 = vector.broadcast %290 : vector<1x256xi1> to vector<8x256xi1>
    %292 = arith.select %291, %288, %289 : vector<8x256xi1>, vector<8x256xbf16>
    %c136 = arith.constant 136 : index
    %c0_232 = arith.constant 0 : index
    %293 = vector.load %arg11[%c136, %c0_232] : memref<292x256xbf16, #tpu.memory_space<vmem>>, vector<8x256xbf16>
    tpu.vector_store %arg11[%c136, %c0_232], %292 {strides = array<i32>} : memref<292x256xbf16, #tpu.memory_space<vmem>>, vector<8x256xbf16>,
    %c16_233 = arith.constant 16 : index
    %c9 = arith.constant 9 : index
    %294 = vector.load %arg10[%c16_233, %c9] : memref<32x512xbf16, #tpu.memory_space<vmem>>, vector<8x256xbf16>
    %c-7_i32 = arith.constant -7 : i32
    %295 = vector.broadcast %c-7_i32 : i32 to vector<1x256xi32>
    %296 = arith.addi %2, %295 : vector<1x256xi32>
    %c0_i32_234 = arith.constant 0 : i32
    %297 = vector.broadcast %c0_i32_234 : i32 to vector<1x256xi32>
    %298 = arith.cmpi sge, %296, %297 : vector<1x256xi32>
    %c-7_i32_235 = arith.constant -7 : i32
    %299 = vector.broadcast %c-7_i32_235 : i32 to vector<1x256xi32>
    %300 = arith.addi %2, %299 : vector<1x256xi32>
    %c16_i32_236 = arith.constant 16 : i32
    %301 = vector.broadcast %c16_i32_236 : i32 to vector<1x256xi32>
    %302 = arith.cmpi slt, %300, %301 : vector<1x256xi32>
    %303 = arith.andi %298, %302 : vector<1x256xi1>
    %cst_237 = arith.constant 0.000000e+00 : bf16
    %304 = vector.broadcast %cst_237 : bf16 to vector<8x256xbf16>
    %305 = vector.shape_cast %303 : vector<1x256xi1> to vector<1x256xi1>
    %306 = vector.broadcast %305 : vector<1x256xi1> to vector<8x256xi1>
    %307 = arith.select %306, %294, %304 : vector<8x256xi1>, vector<8x256xbf16>
    %c144_238 = arith.constant 144 : index
    %c0_239 = arith.constant 0 : index
    %308 = vector.load %arg11[%c144_238, %c0_239] : memref<292x256xbf16, #tpu.memory_space<vmem>>, vector<8x256xbf16>
    tpu.vector_store %arg11[%c144_238, %c0_239], %307 {strides = array<i32>} : memref<292x256xbf16, #tpu.memory_space<vmem>>, vector<8x256xbf16>,
    %c16_240 = arith.constant 16 : index
    %c16_241 = arith.constant 16 : index
    %309 = vector.load %arg10[%c16_240, %c16_241] : memref<32x512xbf16, #tpu.memory_space<vmem>>, vector<8x256xbf16>
    %c152 = arith.constant 152 : index
    %c0_242 = arith.constant 0 : index
    %310 = vector.load %arg11[%c152, %c0_242] : memref<292x256xbf16, #tpu.memory_space<vmem>>, vector<8x256xbf16>
    tpu.vector_store %arg11[%c152, %c0_242], %309 {strides = array<i32>} : memref<292x256xbf16, #tpu.memory_space<vmem>>, vector<8x256xbf16>,
    %c16_243 = arith.constant 16 : index
    %c23 = arith.constant 23 : index
    %311 = vector.load %arg10[%c16_243, %c23] : memref<32x512xbf16, #tpu.memory_space<vmem>>, vector<8x256xbf16>
    %c7_i32 = arith.constant 7 : i32
    %312 = vector.broadcast %c7_i32 : i32 to vector<1x256xi32>
    %313 = arith.addi %2, %312 : vector<1x256xi32>
    %c0_i32_244 = arith.constant 0 : i32
    %314 = vector.broadcast %c0_i32_244 : i32 to vector<1x256xi32>
    %315 = arith.cmpi sge, %313, %314 : vector<1x256xi32>
    %c7_i32_245 = arith.constant 7 : i32
    %316 = vector.broadcast %c7_i32_245 : i32 to vector<1x256xi32>
    %317 = arith.addi %2, %316 : vector<1x256xi32>
    %c16_i32_246 = arith.constant 16 : i32
    %318 = vector.broadcast %c16_i32_246 : i32 to vector<1x256xi32>
    %319 = arith.cmpi slt, %317, %318 : vector<1x256xi32>
    %320 = arith.andi %315, %319 : vector<1x256xi1>
    %cst_247 = arith.constant 0.000000e+00 : bf16
    %321 = vector.broadcast %cst_247 : bf16 to vector<8x256xbf16>
    %322 = vector.shape_cast %320 : vector<1x256xi1> to vector<1x256xi1>
    %323 = vector.broadcast %322 : vector<1x256xi1> to vector<8x256xi1>
    %324 = arith.select %323, %311, %321 : vector<8x256xi1>, vector<8x256xbf16>
    %c160_248 = arith.constant 160 : index
    %c0_249 = arith.constant 0 : index
    %325 = vector.load %arg11[%c160_248, %c0_249] : memref<292x256xbf16, #tpu.memory_space<vmem>>, vector<8x256xbf16>
    tpu.vector_store %arg11[%c160_248, %c0_249], %324 {strides = array<i32>} : memref<292x256xbf16, #tpu.memory_space<vmem>>, vector<8x256xbf16>,
    %c16_250 = arith.constant 16 : index
    %c121 = arith.constant 121 : index
    %326 = vector.load %arg10[%c16_250, %c121] : memref<32x512xbf16, #tpu.memory_space<vmem>>, vector<8x256xbf16>
    %cst_251 = arith.constant 0.000000e+00 : bf16
    %327 = vector.broadcast %cst_251 : bf16 to vector<8x256xbf16>
    %328 = vector.shape_cast %303 : vector<1x256xi1> to vector<1x256xi1>
    %329 = vector.broadcast %328 : vector<1x256xi1> to vector<8x256xi1>
    %330 = arith.select %329, %326, %327 : vector<8x256xi1>, vector<8x256xbf16>
    %c168 = arith.constant 168 : index
    %c0_252 = arith.constant 0 : index
    %331 = vector.load %arg11[%c168, %c0_252] : memref<292x256xbf16, #tpu.memory_space<vmem>>, vector<8x256xbf16>
    tpu.vector_store %arg11[%c168, %c0_252], %330 {strides = array<i32>} : memref<292x256xbf16, #tpu.memory_space<vmem>>, vector<8x256xbf16>,
    %c16_253 = arith.constant 16 : index
    %c128_254 = arith.constant 128 : index
    %332 = vector.load %arg10[%c16_253, %c128_254] : memref<32x512xbf16, #tpu.memory_space<vmem>>, vector<8x256xbf16>
    %c176_255 = arith.constant 176 : index
    %c0_256 = arith.constant 0 : index
    %333 = vector.load %arg11[%c176_255, %c0_256] : memref<292x256xbf16, #tpu.memory_space<vmem>>, vector<8x256xbf16>
    tpu.vector_store %arg11[%c176_255, %c0_256], %332 {strides = array<i32>} : memref<292x256xbf16, #tpu.memory_space<vmem>>, vector<8x256xbf16>,
    %c16_257 = arith.constant 16 : index
    %c135 = arith.constant 135 : index
    %334 = vector.load %arg10[%c16_257, %c135] : memref<32x512xbf16, #tpu.memory_space<vmem>>, vector<8x256xbf16>
    %cst_258 = arith.constant 0.000000e+00 : bf16
    %335 = vector.broadcast %cst_258 : bf16 to vector<8x256xbf16>
    %336 = vector.shape_cast %320 : vector<1x256xi1> to vector<1x256xi1>
    %337 = vector.broadcast %336 : vector<1x256xi1> to vector<8x256xi1>
    %338 = arith.select %337, %334, %335 : vector<8x256xi1>, vector<8x256xbf16>
    %c184 = arith.constant 184 : index
    %c0_259 = arith.constant 0 : index
    %339 = vector.load %arg11[%c184, %c0_259] : memref<292x256xbf16, #tpu.memory_space<vmem>>, vector<8x256xbf16>
    tpu.vector_store %arg11[%c184, %c0_259], %338 {strides = array<i32>} : memref<292x256xbf16, #tpu.memory_space<vmem>>, vector<8x256xbf16>,
    %c16_260 = arith.constant 16 : index
    %c233 = arith.constant 233 : index
    %340 = vector.load %arg10[%c16_260, %c233] : memref<32x512xbf16, #tpu.memory_space<vmem>>, vector<8x256xbf16>
    %cst_261 = arith.constant 0.000000e+00 : bf16
    %341 = vector.broadcast %cst_261 : bf16 to vector<8x256xbf16>
    %342 = vector.shape_cast %303 : vector<1x256xi1> to vector<1x256xi1>
    %343 = vector.broadcast %342 : vector<1x256xi1> to vector<8x256xi1>
    %344 = arith.select %343, %340, %341 : vector<8x256xi1>, vector<8x256xbf16>
    %c192 = arith.constant 192 : index
    %c0_262 = arith.constant 0 : index
    %345 = vector.load %arg11[%c192, %c0_262] : memref<292x256xbf16, #tpu.memory_space<vmem>>, vector<8x256xbf16>
    tpu.vector_store %arg11[%c192, %c0_262], %344 {strides = array<i32>} : memref<292x256xbf16, #tpu.memory_space<vmem>>, vector<8x256xbf16>,
    %c16_263 = arith.constant 16 : index
    %c240 = arith.constant 240 : index
    %346 = vector.load %arg10[%c16_263, %c240] : memref<32x512xbf16, #tpu.memory_space<vmem>>, vector<8x256xbf16>
    %c200 = arith.constant 200 : index
    %c0_264 = arith.constant 0 : index
    %347 = vector.load %arg11[%c200, %c0_264] : memref<292x256xbf16, #tpu.memory_space<vmem>>, vector<8x256xbf16>
    tpu.vector_store %arg11[%c200, %c0_264], %346 {strides = array<i32>} : memref<292x256xbf16, #tpu.memory_space<vmem>>, vector<8x256xbf16>,
    %c16_265 = arith.constant 16 : index
    %c247 = arith.constant 247 : index
    %348 = vector.load %arg10[%c16_265, %c247] : memref<32x512xbf16, #tpu.memory_space<vmem>>, vector<8x256xbf16>
    %cst_266 = arith.constant 0.000000e+00 : bf16
    %349 = vector.broadcast %cst_266 : bf16 to vector<8x256xbf16>
    %350 = vector.shape_cast %320 : vector<1x256xi1> to vector<1x256xi1>
    %351 = vector.broadcast %350 : vector<1x256xi1> to vector<8x256xi1>
    %352 = arith.select %351, %348, %349 : vector<8x256xi1>, vector<8x256xbf16>
    %c208_267 = arith.constant 208 : index
    %c0_268 = arith.constant 0 : index
    %353 = vector.load %arg11[%c208_267, %c0_268] : memref<292x256xbf16, #tpu.memory_space<vmem>>, vector<8x256xbf16>
    tpu.vector_store %arg11[%c208_267, %c0_268], %352 {strides = array<i32>} : memref<292x256xbf16, #tpu.memory_space<vmem>>, vector<8x256xbf16>,
    %c0_269 = arith.constant 0 : index
    %c0_270 = arith.constant 0 : index
    %354 = vector.load %arg7[%c0_269, %c0_270] : memref<24x216xbf16, #tpu.memory_space<vmem>>, vector<24x216xbf16>
    %c0_271 = arith.constant 0 : index
    %c0_272 = arith.constant 0 : index
    %355 = vector.load %arg11[%c0_271, %c0_272] : memref<292x256xbf16, #tpu.memory_space<vmem>>, vector<216x256xbf16>
    %cst_273 = arith.constant dense<0.000000e+00> : vector<24x256xf32>
    %356 = tpu.matmul %354, %355, %cst_273 {dimension_numbers = #tpu.dot_dimension_numbers<[1], [0], [0], [1], [0, 0, 1, 1], [], []>} : vector<24x216xbf16>, vector<216x256xbf16>, vector<24x256xf32> -> vector<24x256xf32>
    %c80_274 = arith.constant 80 : index
    %c0_275 = arith.constant 0 : index
    %357 = vector.load %arg3[%c80_274, %c0_275] : memref<112x1xf32, #tpu.memory_space<vmem>>, vector<24x1xf32>
    %358 = vector.broadcast %357 : vector<24x1xf32> to vector<24x256xf32>
    %359 = arith.addf %356, %358 : vector<24x256xf32>
    %360 = vector.extract_strided_slice %10 {offsets = [0, 0], sizes = [8, 256], strides = [1, 1]} : vector<32x256xf32> to vector<8x256xf32>
    %361 = arith.truncf %360 : vector<8x256xf32> to vector<8x256xbf16>
    %c0_276 = arith.constant 0 : index
    %c128_277 = arith.constant 128 : index
    %362 = vector.load %arg10[%c0_276, %c128_277] : memref<32x512xbf16, #tpu.memory_space<vmem>>, vector<8x256xbf16>
    tpu.vector_store %arg10[%c0_276, %c128_277], %361 {strides = array<i32>} : memref<32x512xbf16, #tpu.memory_space<vmem>>, vector<8x256xbf16>,
    %363 = arith.truncf %359 : vector<24x256xf32> to vector<24x256xbf16>
    %c8_278 = arith.constant 8 : index
    %c128_279 = arith.constant 128 : index
    %364 = vector.load %arg10[%c8_278, %c128_279] : memref<32x512xbf16, #tpu.memory_space<vmem>>, vector<24x256xbf16>
    tpu.vector_store %arg10[%c8_278, %c128_279], %363 {strides = array<i32>} : memref<32x512xbf16, #tpu.memory_space<vmem>>, vector<24x256xbf16>,
    %c0_280 = arith.constant 0 : index
    %c111 = arith.constant 111 : index
    %365 = vector.load %arg10[%c0_280, %c111] : memref<32x512xbf16, #tpu.memory_space<vmem>>, vector<32x256xbf16>
    %cst_281 = arith.constant 0.000000e+00 : bf16
    %366 = vector.broadcast %cst_281 : bf16 to vector<32x256xbf16>
    %367 = vector.shape_cast %23 : vector<1x256xi1> to vector<1x256xi1>
    %368 = vector.broadcast %367 : vector<1x256xi1> to vector<32x256xi1>
    %369 = arith.select %368, %365, %366 : vector<32x256xi1>, vector<32x256xbf16>
    %c0_282 = arith.constant 0 : index
    %c0_283 = arith.constant 0 : index
    %370 = vector.load %arg11[%c0_282, %c0_283] : memref<292x256xbf16, #tpu.memory_space<vmem>>, vector<32x256xbf16>
    tpu.vector_store %arg11[%c0_282, %c0_283], %369 {strides = array<i32>} : memref<292x256xbf16, #tpu.memory_space<vmem>>, vector<32x256xbf16>,
    %c0_284 = arith.constant 0 : index
    %c112_285 = arith.constant 112 : index
    %371 = vector.load %arg10[%c0_284, %c112_285] : memref<32x512xbf16, #tpu.memory_space<vmem>>, vector<32x256xbf16>
    %c32_286 = arith.constant 32 : index
    %c0_287 = arith.constant 0 : index
    %372 = vector.load %arg11[%c32_286, %c0_287] : memref<292x256xbf16, #tpu.memory_space<vmem>>, vector<32x256xbf16>
    tpu.vector_store %arg11[%c32_286, %c0_287], %371 {strides = array<i32>} : memref<292x256xbf16, #tpu.memory_space<vmem>>, vector<32x256xbf16>,
    %c0_288 = arith.constant 0 : index
    %c113 = arith.constant 113 : index
    %373 = vector.load %arg10[%c0_288, %c113] : memref<32x512xbf16, #tpu.memory_space<vmem>>, vector<32x256xbf16>
    %cst_289 = arith.constant 0.000000e+00 : bf16
    %374 = vector.broadcast %cst_289 : bf16 to vector<32x256xbf16>
    %375 = vector.shape_cast %40 : vector<1x256xi1> to vector<1x256xi1>
    %376 = vector.broadcast %375 : vector<1x256xi1> to vector<32x256xi1>
    %377 = arith.select %376, %373, %374 : vector<32x256xi1>, vector<32x256xbf16>
    %c64_290 = arith.constant 64 : index
    %c0_291 = arith.constant 0 : index
    %378 = vector.load %arg11[%c64_290, %c0_291] : memref<292x256xbf16, #tpu.memory_space<vmem>>, vector<32x256xbf16>
    tpu.vector_store %arg11[%c64_290, %c0_291], %377 {strides = array<i32>} : memref<292x256xbf16, #tpu.memory_space<vmem>>, vector<32x256xbf16>,
    %c0_292 = arith.constant 0 : index
    %c127_293 = arith.constant 127 : index
    %379 = vector.load %arg10[%c0_292, %c127_293] : memref<32x512xbf16, #tpu.memory_space<vmem>>, vector<32x256xbf16>
    %cst_294 = arith.constant 0.000000e+00 : bf16
    %380 = vector.broadcast %cst_294 : bf16 to vector<32x256xbf16>
    %381 = vector.shape_cast %23 : vector<1x256xi1> to vector<1x256xi1>
    %382 = vector.broadcast %381 : vector<1x256xi1> to vector<32x256xi1>
    %383 = arith.select %382, %379, %380 : vector<32x256xi1>, vector<32x256xbf16>
    %c96_295 = arith.constant 96 : index
    %c0_296 = arith.constant 0 : index
    %384 = vector.load %arg11[%c96_295, %c0_296] : memref<292x256xbf16, #tpu.memory_space<vmem>>, vector<32x256xbf16>
    tpu.vector_store %arg11[%c96_295, %c0_296], %383 {strides = array<i32>} : memref<292x256xbf16, #tpu.memory_space<vmem>>, vector<32x256xbf16>,
    %c0_297 = arith.constant 0 : index
    %c128_298 = arith.constant 128 : index
    %385 = vector.load %arg10[%c0_297, %c128_298] : memref<32x512xbf16, #tpu.memory_space<vmem>>, vector<32x256xbf16>
    %c128_299 = arith.constant 128 : index
    %c0_300 = arith.constant 0 : index
    %386 = vector.load %arg11[%c128_299, %c0_300] : memref<292x256xbf16, #tpu.memory_space<vmem>>, vector<32x256xbf16>
    tpu.vector_store %arg11[%c128_299, %c0_300], %385 {strides = array<i32>} : memref<292x256xbf16, #tpu.memory_space<vmem>>, vector<32x256xbf16>,
    %c0_301 = arith.constant 0 : index
    %c129_302 = arith.constant 129 : index
    %387 = vector.load %arg10[%c0_301, %c129_302] : memref<32x512xbf16, #tpu.memory_space<vmem>>, vector<32x256xbf16>
    %cst_303 = arith.constant 0.000000e+00 : bf16
    %388 = vector.broadcast %cst_303 : bf16 to vector<32x256xbf16>
    %389 = vector.shape_cast %40 : vector<1x256xi1> to vector<1x256xi1>
    %390 = vector.broadcast %389 : vector<1x256xi1> to vector<32x256xi1>
    %391 = arith.select %390, %387, %388 : vector<32x256xi1>, vector<32x256xbf16>
    %c160_304 = arith.constant 160 : index
    %c0_305 = arith.constant 0 : index
    %392 = vector.load %arg11[%c160_304, %c0_305] : memref<292x256xbf16, #tpu.memory_space<vmem>>, vector<32x256xbf16>
    tpu.vector_store %arg11[%c160_304, %c0_305], %391 {strides = array<i32>} : memref<292x256xbf16, #tpu.memory_space<vmem>>, vector<32x256xbf16>,
    %c0_306 = arith.constant 0 : index
    %c143 = arith.constant 143 : index
    %393 = vector.load %arg10[%c0_306, %c143] : memref<32x512xbf16, #tpu.memory_space<vmem>>, vector<32x256xbf16>
    %cst_307 = arith.constant 0.000000e+00 : bf16
    %394 = vector.broadcast %cst_307 : bf16 to vector<32x256xbf16>
    %395 = vector.shape_cast %23 : vector<1x256xi1> to vector<1x256xi1>
    %396 = vector.broadcast %395 : vector<1x256xi1> to vector<32x256xi1>
    %397 = arith.select %396, %393, %394 : vector<32x256xi1>, vector<32x256xbf16>
    %c192_308 = arith.constant 192 : index
    %c0_309 = arith.constant 0 : index
    %398 = vector.load %arg11[%c192_308, %c0_309] : memref<292x256xbf16, #tpu.memory_space<vmem>>, vector<32x256xbf16>
    tpu.vector_store %arg11[%c192_308, %c0_309], %397 {strides = array<i32>} : memref<292x256xbf16, #tpu.memory_space<vmem>>, vector<32x256xbf16>,
    %c0_310 = arith.constant 0 : index
    %c144_311 = arith.constant 144 : index
    %399 = vector.load %arg10[%c0_310, %c144_311] : memref<32x512xbf16, #tpu.memory_space<vmem>>, vector<32x256xbf16>
    %c224 = arith.constant 224 : index
    %c0_312 = arith.constant 0 : index
    %400 = vector.load %arg11[%c224, %c0_312] : memref<292x256xbf16, #tpu.memory_space<vmem>>, vector<32x256xbf16>
    tpu.vector_store %arg11[%c224, %c0_312], %399 {strides = array<i32>} : memref<292x256xbf16, #tpu.memory_space<vmem>>, vector<32x256xbf16>,
    %c0_313 = arith.constant 0 : index
    %c145 = arith.constant 145 : index
    %401 = vector.load %arg10[%c0_313, %c145] : memref<32x512xbf16, #tpu.memory_space<vmem>>, vector<32x256xbf16>
    %cst_314 = arith.constant 0.000000e+00 : bf16
    %402 = vector.broadcast %cst_314 : bf16 to vector<32x256xbf16>
    %403 = vector.shape_cast %40 : vector<1x256xi1> to vector<1x256xi1>
    %404 = vector.broadcast %403 : vector<1x256xi1> to vector<32x256xi1>
    %405 = arith.select %404, %401, %402 : vector<32x256xi1>, vector<32x256xbf16>
    %c256 = arith.constant 256 : index
    %c0_315 = arith.constant 0 : index
    %406 = vector.load %arg11[%c256, %c0_315] : memref<292x256xbf16, #tpu.memory_space<vmem>>, vector<32x256xbf16>
    tpu.vector_store %arg11[%c256, %c0_315], %405 {strides = array<i32>} : memref<292x256xbf16, #tpu.memory_space<vmem>>, vector<32x256xbf16>,
    %c288 = arith.constant 288 : index
    %c0_316 = arith.constant 0 : index
    %407 = vector.load %arg11[%c288, %c0_316] : memref<292x256xbf16, #tpu.memory_space<vmem>>, vector<4x256xbf16>
    tpu.vector_store %arg11[%c288, %c0_316], %1 {strides = array<i32>} : memref<292x256xbf16, #tpu.memory_space<vmem>>, vector<4x256xbf16>,
    %c0_317 = arith.constant 0 : index
    %c0_318 = arith.constant 0 : index
    %408 = vector.load %arg8[%c0_317, %c0_318] : memref<8x292xbf16, #tpu.memory_space<vmem>>, vector<8x292xbf16>
    %c0_319 = arith.constant 0 : index
    %c0_320 = arith.constant 0 : index
    %409 = vector.load %arg11[%c0_319, %c0_320] : memref<292x256xbf16, #tpu.memory_space<vmem>>, vector<292x256xbf16>
    %cst_321 = arith.constant dense<0.000000e+00> : vector<8x256xf32>
    %410 = tpu.matmul %408, %409, %cst_321 {dimension_numbers = #tpu.dot_dimension_numbers<[1], [0], [0], [1], [0, 0, 1, 1], [], []>} : vector<8x292xbf16>, vector<292x256xbf16>, vector<8x256xf32> -> vector<8x256xf32>
    %c104_322 = arith.constant 104 : index
    %c0_323 = arith.constant 0 : index
    %411 = vector.load %arg3[%c104_322, %c0_323] : memref<112x1xf32, #tpu.memory_space<vmem>>, vector<8x1xf32>
    %412 = vector.broadcast %411 : vector<8x1xf32> to vector<8x256xf32>
    %413 = arith.addf %410, %412 : vector<8x256xf32>
    %cst_324 = arith.constant 0.000000e+00 : f32
    %414 = vector.broadcast %cst_324 : f32 to vector<8x256xf32>
    %415 = arith.maximumf %413, %414 : vector<8x256xf32>
    %c0_325 = arith.constant 0 : index
    %c0_326 = arith.constant 0 : index
    %c0_327 = arith.constant 0 : index
    %416 = vector.load %arg9[%c0_325, %c0_326, %c0_327] : memref<1x8x256xf32, #tpu.memory_space<vmem>>, vector<1x8x256xf32>
    %417 = vector.shape_cast %416 : vector<1x8x256xf32> to vector<8x256xf32>
    %418 = vector.shape_cast %415 : vector<8x256xf32> to vector<1x8x256xf32>
    tpu.vector_store %arg9[%c0_325, %c0_326, %c0_327], %418 {strides = array<i32>} : memref<1x8x256xf32, #tpu.memory_space<vmem>>, vector<1x8x256xf32>,
    return
  }
  func.func @transform_0(%arg0: i32) -> (i32, i32, i32) {
    %c0_i32 = arith.constant 0 : i32
    %c0_i32_0 = arith.constant 0 : i32
    %c0_i32_1 = arith.constant 0 : i32
    return %arg0, %c0_i32, %c0_i32_0 : i32, i32, i32
  }
  func.func @transform_1(%arg0: i32) -> (i32, i32) {
    %c0_i32 = arith.constant 0 : i32
    %c0_i32_0 = arith.constant 0 : i32
    %c0_i32_1 = arith.constant 0 : i32
    return %c0_i32, %c0_i32_0 : i32, i32
  }
  func.func @transform_2(%arg0: i32) -> (i32, i32) {
    %c0_i32 = arith.constant 0 : i32
    %c0_i32_0 = arith.constant 0 : i32
    %c0_i32_1 = arith.constant 0 : i32
    return %c0_i32, %c0_i32_0 : i32, i32
  }
  func.func @transform_3(%arg0: i32) -> (i32, i32) {
    %c0_i32 = arith.constant 0 : i32
    %c0_i32_0 = arith.constant 0 : i32
    %c0_i32_1 = arith.constant 0 : i32
    return %c0_i32, %c0_i32_0 : i32, i32
  }
  func.func @transform_4(%arg0: i32) -> (i32, i32) {
    %c0_i32 = arith.constant 0 : i32
    %c0_i32_0 = arith.constant 0 : i32
    %c0_i32_1 = arith.constant 0 : i32
    return %c0_i32, %c0_i32_0 : i32, i32
  }
  func.func @transform_5(%arg0: i32) -> (i32, i32) {
    %c0_i32 = arith.constant 0 : i32
    %c0_i32_0 = arith.constant 0 : i32
    %c0_i32_1 = arith.constant 0 : i32
    return %c0_i32, %c0_i32_0 : i32, i32
  }
  func.func @transform_6(%arg0: i32) -> (i32, i32) {
    %c0_i32 = arith.constant 0 : i32
    %c0_i32_0 = arith.constant 0 : i32
    %c0_i32_1 = arith.constant 0 : i32
    return %c0_i32, %c0_i32_0 : i32, i32
  }
  func.func @transform_7(%arg0: i32) -> (i32, i32) {
    %c0_i32 = arith.constant 0 : i32
    %c0_i32_0 = arith.constant 0 : i32
    %c0_i32_1 = arith.constant 0 : i32
    return %c0_i32, %c0_i32_0 : i32, i32
  }
  func.func @transform_8(%arg0: i32) -> (i32, i32, i32) {
    %c0_i32 = arith.constant 0 : i32
    %c0_i32_0 = arith.constant 0 : i32
    %c0_i32_1 = arith.constant 0 : i32
    return %arg0, %c0_i32, %c0_i32_0 : i32, i32, i32
  }
}

</mosaic_0001>

<bundles_post_ra>
// kernel: tpu_custom_call.1
= control target key start
LH: loop header
LB: loop body
LE: loop exit
PB: predicated region body
PF: predicated region fallthrough
CT: control target
= control target key end

     0   :  { %13 = vsyncpa [#allocation5], 0  ;;  %s5653_s0 = inlined_call_operand.vmem [shape: bf16[2,4,256], index: 0, kind: input, shape index: {}]   ;;  %s5654_s1 = inlined_call_operand.vmem [shape: s32[1,256], index: 1, kind: input, shape index: {}]   ;;  %s5655_s2 = inlined_call_operand.vmem [shape: f32[112,1], index: 2, kind: input, shape index: {}]   ;;  %s5656_s3 = inlined_call_operand.vmem [shape: bf16[32,4], index: 3, kind: input, shape index: {}]   ;;  %s5657_s4 = inlined_call_operand.vmem [shape: bf16[24,120], index: 4, kind: input, shape index: {}]   ;;  %s5658_s5 = inlined_call_operand.vmem [shape: bf16[24,120], index: 5, kind: input, shape index: {}]   ;;  %s5659_s6 = inlined_call_operand.vmem [shape: bf16[24,216], index: 6, kind: input, shape index: {}]   ;;  %s5660_s7 = inlined_call_operand.vmem [shape: bf16[8,292], index: 7, kind: input, shape index: {}]   ;;  %s5661_s8 = inlined_call_operand.hbm [shape: f32[2,8,256], index: 8, kind: output, shape index: {}]  }
   0x1   :  { %15 = vsyncpa [#allocation5 + $0x1], 0  ;;  %s4121_s27 = smov 0   ;;  %s4123_s28 = smov 0  }
   0x2   :  { %s4125_s29 = smov 0   ;;  %s4127_s30 = smov 0  }
   0x3 LB: > { %s4142_s9 = sadd.s32 4294967295, %s4041_s30   ;;  %s3331_s10 = sadd.s32 4294967294, %s4041_s30   ;;  %s4041_s30 = sphi %s4127_s30, %s5903_s30   ;;  %s4037_s29 = sphi %s4125_s29, %s5902_s29   ;;  %s4033_s28 = sphi %s4123_s28, %s5901_s28   ;;  %s4029_s27 = sphi %s4121_s27, %s5900_s27  }
   0x4   : > { %s4146_s11 = sadd.s32 1, %s4041_s30   ;;  %s201_s12 = sadd.s32 1, %s4037_s29 }
   0x5   : > { %s198_s13 = ssub.s32 %s4041_s30, %s4146_s11  ;;  %p211_p0 = scmp.ne.s32.totalorder %s4037_s29, %s4033_s28 }
   0x6   : > { %p199_p1 = scmp.eq.s32.totalorder %s198_s13, 0  ;;  %p212_p2 = scmp.eq.s32.totalorder %s4142_s9, 1 }
   0x7   : > { %p217_p3 = scmp.ne.s32.totalorder %s4033_s28, %s4029_s27  ;;  %p218_p4 = scmp.eq.s32.totalorder %s3331_s10, 1 }
   0x8   : > { %s4157_s14 = scalar_select %p199_p1, %s4037_s29, %s201_s12  }
   0x9   : > { %p4159_p5 = por %p212_p2, %p211_p0  ;;  %p4163_p6 = por %p218_p4, %p217_p3 }
   0xa   : > { %p3334_p7 = scmp.ge.s32.totalorder %s4041_s30, 1  ;;  %p265_p8 = scmp.lt.s32.totalorder %s4041_s30, 3 }
   0xc   : > { %p266_p9 = pnand %p3334_p7, %p265_p8 }
   0xd   : > { %p299_p10 = scmp.lt.s32.totalorder (!%p266_p9), %s4142_s9, 1  ;;  %s5685_s26 = smov (!%p266_p9), 1  }
   0xe   : > { %269 = sbr.rel (%p266_p9) target bundleno = 1575 (0x627), region = 52  ;;  %s5676_s13 = smov (!%p266_p9), 127  }
   0xf   : > { %s5706_s17 = smov (!%p266_p9), 3   ;;  %s4047_s20 = smov (!%p266_p9), 2  }
  0x10   : > { %s4049_s24 = smov (!%p266_p9), 125   ;;  %s4050_s23 = smov (!%p266_p9), 96  }
  0x11   : > { %s5688_s19 = smov (!%p266_p9), 112   ;;  %s5692_s10 = smov (!%p266_p9), 75  }
  0x12   : > { %s4060_s12 = smov (!%p266_p9), 123   ;;  %s4061_s18 = smov (!%p266_p9), 53  }
  0x13   : > { %v4173_v0 = vld [vmem:[%s5654_s1] sm:$0x3]  ;;  %v4043_v1 = vmov 0   ;;  %v324_v2 = vld [vmem:[%s5655_s2 + $0x18] sm:$0xff]  ;;  %s300_s21 = scalar_select %p299_p10, %s4142_s9, 1  ;;  %vm5662_vm0 = vcmask 1041408  }
  0x14   : > { %309 = vst [vmem:[#allocation2] sm:$0xf] %v4043_v1  ;;  %3915 = vset.pattern.permute.xlu0 %v4043_v1  ;;  %3916 = vset.pattern.permute.xlu2 %v4043_v1  ;;  %v467_v3 = vadd.s32 1, %v4173_v0  ;;  %v751_v4 = vadd.s32 3, %v4173_v0  ;;  %v417_v5 = vadd.s32 4294967295, %v4173_v0  ;;  %v593_v6 = vadd.s32 2, %v4173_v0 }
  0x15   : > { %310 = vst [vmem:[#allocation2 + $0x10] sm:$0xf] %v4043_v1  ;;  %342 = vperm.xlu0 %3915, %v324_v2   ;;  %3927 = vset.pattern.permute.xlu1 %v4043_v1  ;;  %s3745_s22 = sshll.u32 %s300_s21, 2  ;;  %v512_v18 = vadd.s32 4294967294, %v4173_v0  ;;  %v3746_v25 = vld [vmem:[%s5656_s3] sm:$0xff]  ;;  %v638_v27 = vadd.s32 4294967293, %v4173_v0  ;;  %v4280_v50 = vunpack.c.l.b16 %v4043_v1  ;;  %v4283_v51 = vunpack.c.h.b16 %v4043_v1 }
  0x16   : > { %311 = vst [vmem:[#allocation2 + $0x20] sm:$0xf] %v4043_v1  ;;  %vm468_vm1 = vcmp.ge.s32.totalorder %v467_v3, 0  ;;  %vm469_vm2 = vcmp.lt.s32.totalorder %v467_v3, 16  ;;  %s303_s25 = scalar_lea.vmem %s5653_s0, %s3745_s22  ;;  %vm418_vm4 = vcmp.ge.s32.totalorder %v417_v5, 0  ;;  %vm419_vm5 = vcmp.lt.s32.totalorder %v417_v5, 16 }
  0x17   : > { %312 = vst [vmem:[#allocation2 + $0x30] sm:$0xf] %v4043_v1  ;;  %vm470_vm3 = vmand %vm468_vm1, %vm469_vm2  ;;  %vm594_vm6 = vcmp.ge.s32.totalorder %v593_v6, 0  ;;  %vm595_vm7 = vcmp.lt.s32.totalorder %v593_v6, 16  ;;  %v307_v7 = vld [vmem:[%s303_s25] sm:$0xf] }
  0x18   : > { %313 = vst [vmem:[#allocation2 + $0xc] sm:$0xf] %v4043_v1  ;;  %v471_v8 = vsel %vm470_vm3, 1, %v4043_v1  ;;  %vm420_vm8 = vmand %vm418_vm4, %vm419_vm5  ;;  %vm752_vm9 = vcmp.ge.s32.totalorder %v751_v4, 0  ;;  %vm753_vm11 = vcmp.lt.s32.totalorder %v751_v4, 16  ;;  %v323_v37 = vld [vmem:[%s5655_s2 + $0x10] sm:$0xff] }
  0x19   : > { %314 = vst [vmem:[#allocation2 + $0x1c] sm:$0xf] %v4043_v1  ;;  %v472_v9 = vperm.slane %v471_v8, 0  ;;  %v473_v10 = vperm.slane %v471_v8, 1  ;;  %v421_v11 = vsel %vm420_vm8, 1, %v4043_v1  ;;  %vm596_vm10 = vmand %vm594_vm6, %vm595_vm7  ;;  %vm513_vm6 = vcmp.ge.s32.totalorder %v512_v18, 0 }
  0x1a   : > { %356 = vst [vmem:[#allocation1] ss:$4 sm:$0xff] %v307_v7  ;;  %v422_v12 = vperm.slane %v421_v11, 0  ;;  %v423_v13 = vperm.slane %v421_v11, 1  ;;  %v597_v14 = vsel %vm596_vm10, 1, %v4043_v1  ;;  %vm754_vm12 = vmand %vm752_vm9, %vm753_vm11  ;;  %vm514_vm7 = vcmp.lt.s32.totalorder %v512_v18, 16 }
  0x1b   : > { %315 = vst [vmem:[#allocation2 + $0x2c] sm:$0xf] %v4043_v1  ;;  %vm474_vm13 = vcmp.eq.s32.totalorder %v472_v9, 1  ;;  %vm475_vm14 = vcmp.eq.s32.totalorder %v473_v10, 1  ;;  %v598_v15 = vperm.slane %v597_v14, 0  ;;  %v599_v16 = vperm.slane %v597_v14, 1  ;;  %vm515_vm10 = vmand %vm513_vm6, %vm514_vm7 }
  0x1c   : > { %316 = vst [vmem:[#allocation2 + $0x3c] sm:$0xf] %v4043_v1  ;;  %vm476_vm15 = vmpackc.low %vm475_vm14, %vm474_vm13  ;;  %vm424_vm1 = vcmp.eq.s32.totalorder %v422_v12, 1  ;;  %vm425_vm2 = vcmp.eq.s32.totalorder %v423_v13, 1  ;;  %v755_v17 = vsel %vm754_vm12, 1, %v4043_v1  ;;  %vm359_vm8 = vcmask 31744  }
  0x1d   : > { %v4203_v19 = vsel %vm476_vm15, 65537, %v4043_v1  ;;  %vm426_vm3 = vmpackc.low %vm425_vm2, %vm424_vm1  ;;  %vm4205_vm4 = vcmp.eq.s32.totalorder %v598_v15, 1  ;;  %vm4209_vm5 = vcmp.eq.s32.totalorder %v599_v16, 1  ;;  %v756_v22 = vperm.slane %v755_v17, 0  ;;  %s4048_s21 = smov 126   ;;  %v322_v46 = vld [vmem:[%s5655_s2 + $0x8] sm:$0xff] }
  0x1e   : > { %478 = vrot.lane.b32.xlu1 %v4203_v19, %s5685_s26  ;;  %v4216_v23 = vsel %vm426_vm3, 65537, %v4043_v1  ;;  %v757_v24 = vperm.slane %v755_v17, 1  ;;  %vm602_vm11 = vmpackc.low %vm4209_vm5, %vm4205_vm4  ;;  %v516_v32 = vsel %vm515_vm10, 1, %v4043_v1  ;;  %vm639_vm14 = vcmp.ge.s32.totalorder %v638_v27, 0  ;;  %v3747_v47 = vld [vmem:[%s5656_s3 + $0x8] sm:$0xff]  ;;  %s5709_s22 = smov 48  }
  0x1f   : > { %428 = vrot.lane.b32.xlu2 %v4216_v23, %s5676_s13  ;;  %vm4223_vm9 = vcmp.eq.s32.totalorder %v756_v22, 1  ;;  %v517_v33 = vperm.slane %v516_v32, 0  ;;  %v518_v34 = vperm.slane %v516_v32, 1  ;;  %vm640_vm15 = vcmp.lt.s32.totalorder %v638_v27, 16  ;;  %s4055_s25 = smov 32  }
  0x20   : > { %vm759_vm12 = vcmp.eq.s32.totalorder %v757_v24, 1  ;;  %v603_v35 = vsel %vm602_vm11, 65537, %v4043_v1  ;;  %vm641_vm1 = vmand %vm639_vm14, %vm640_vm15  ;;  %v576_v55 = vld [vmem:[#allocation2 + $0x1c] sm:$0xf]  ;;  %v5738_v57 = vmov 0 }
  0x21   : > { %v357_v28 = vld.sshfl [vmem:[#allocation1] sm:$0xff pattern:$0x73625140]  ;;  %v358_v29 = vld.sshfl [vmem:[#allocation1 + $0x8] sm:$0xff pattern:$0x73625140]  ;;  %vm760_vm13 = vmpackc.low %vm759_vm12, %vm4223_vm9 }
  0x22   : > { %v367_v30 = vsel %vm5662_vm0, %v357_v28, 0  ;;  %v369_v31 = vsel %vm5662_vm0, %v358_v29, 0  ;;  %2919 = vst [vmem:[#allocation1] ss:$2 sm:$0xff] %v307_v7  ;;  %v4239_v36 = vsel %vm760_vm13, 65537, %v4043_v1  ;;  %vm4246_vm2 = vcmp.eq.s32.totalorder %v517_v33, 1 }
  0x23   : > { %378 = vmatpush.bf16.msra.mxu2 %v367_v30  ;;  %397 = vmatpush.bf16.msra.mxu1 %v369_v31  ;;  %vm4250_vm3 = vcmp.eq.s32.totalorder %v518_v34, 1  ;;  %v642_v40 = vsel %vm641_vm1, 1, %v4043_v1  ;;  %v718_v56 = vld [vmem:[#allocation2 + $0x2c] sm:$0xf]  ;;  %v592_v10 = vld [vmem:[#allocation2 + $0x1c] sm:$0xf] }
  0x24   : > { %762 = vrot.lane.b32.xlu0 %v4239_v36, %s5706_s17  ;;  %v643_v41 = vperm.slane %v642_v40, 0  ;;  %v644_v42 = vperm.slane %v642_v40, 1  ;;  %vm521_vm4 = vmpackc.low %vm4250_vm3, %vm4246_vm2  ;;  %v750_v7 = vld [vmem:[#allocation2 + $0x2c] sm:$0xf]  ;;  %vm5664_vm2 = vcmask 15360   ;;  %vm5665_vm3 = vcmask 7168  }
  0x25   : > { %v522_v44 = vsel %vm521_vm4, 65537, %v4043_v1  ;;  %v734_v11 = vld [vmem:[#allocation2 + $0x2c] sm:$0xf]  ;;  %vm5671_vm4 = vcmask 1039360  }
  0x26   : > { %3346 = vmatmul.msk.bf16.vlgmr.msra.gmra.mxu2 %vm359_vm8, %v3746_v25  ;;  %3348 = vmatmul.msk.bf16.vlgmr.msra.gmra.mxu1 %vm359_vm8, %v3746_v25  ;;  %vm645_vm5 = vcmp.eq.s32.totalorder %v643_v41, 1  ;;  %vm646_vm6 = vcmp.eq.s32.totalorder %v644_v42, 1 }
  0x27   : > { %604 = vrot.lane.b32.xlu1 %v603_v35, %s4047_s20  ;;  %337 = vperm.xlu2 %3916, %v323_v37   ;;  %vm647_vm7 = vmpackc.low %vm646_vm6, %vm645_vm5 }
  0x28   : > { %v4264_v45 = vsel %vm647_vm7, 65537, %v4043_v1 }
  0x29   : > { %v2920_v43 = vld.sshfl [vmem:[#allocation1] sm:$0xff pattern:$0x75643120] }
  0x2a   : > { %2922 = vst [vmem:[#allocation3 + $0x120] sm:$0x33] %v2920_v43 }
  0x2c   : > { %523 = vrot.lane.b32.xlu0 %v522_v44, %s4048_s21 }
  0x2f   : > { %649 = vrot.lane.b32.xlu1 %v4264_v45, %s4049_s24  ;;  %332 = vperm.xlu2 %3916, %v322_v46   ;;  %v5748_v46 = vmov 0 }
  0x36   : > { %3347 = vmatmul.msk.bf16.gmra.mxu2 %vm359_vm8, %v3747_v47  ;;  %3349 = vmatmul.msk.bf16.gmra.mxu1 %vm359_vm8, %v3747_v47 }
  0x79   : > { %v429_v4 = vpop.permute.xlu2 %428 }
  0x7a   : > { %v430_v34 = vrot.slane %v429_v4, 4 }
  0x7c   : > { %v432_v41 = vsel %vm5671_vm4, %v430_v34, %v429_v4  ;;  %v440_v43 = vunpack.c.l.b16 %v430_v34  ;;  %v441_v44 = vunpack.c.h.b16 %v430_v34 }
  0x7d   : > { %v433_v47 = vunpack.c.l.b16 %v432_v41 }
  0x81   : > { %v338_v17 = vpop.permute.xlu2 %337 }
  0x87   : > { %v4277_v48 = vpop.permute.xlu0 %342 }
  0x89   : > { %v333_v21 = vpop.permute.xlu2 %332 }
  0x90   : > { %v479_v49 = vpop.permute.xlu1 %478 }
  0x91   : > { %v480_v52 = vrot.slane %v479_v49, 4 }
  0x93   : > { %v489_v53 = vunpack.c.l.b16 %v480_v52  ;;  %v490_v54 = vunpack.c.h.b16 %v480_v52  ;;  %v481_v27 = vsel %vm5665_vm3, %v480_v52, %v479_v49  ;;  %v434_v49 = vunpack.c.h.b16 %v432_v41 }
  0x94   : > { %v482_v32 = vunpack.c.l.b16 %v481_v27  ;;  %v483_v33 = vunpack.c.h.b16 %v481_v27  ;;  %vm5668_vm3 = vcmask 1022976  }
  0x95   : > { %vm493_vm9 = vcmp.ne.s32.totalorder %v489_v53, %v4280_v50  ;;  %vm494_vm10 = vcmp.ne.s32.totalorder %v490_v54, %v4283_v51  ;;  %vm438_vm0 = vcmp.ne.s32.totalorder %v434_v49, %v4283_v51 }
  0x96   : > { %vm4287_vm11 = vmpackc.low %vm494_vm10, %vm493_vm9  ;;  %v4291_v58 = vpop.permute.xlu0 %762  ;;  %vm486_vm7 = vcmp.ne.s32.totalorder %v482_v32, %v4280_v50  ;;  %vm487_vm9 = vcmp.ne.s32.totalorder %v483_v33, %v4283_v51 }
  0x97   : > { %v5739_v57 = vsel %vm4287_vm11, 4294967295, %v5738_v57  ;;  %v578_v59 = vsel %vm4287_vm11, %v576_v55, 0  ;;  %v720_v60 = vsel %vm4287_vm11, %v718_v56, 0  ;;  %v4298_v61 = vrot.slane %v4291_v58, 4 }
  0x98   : > { %v3917_v62 = vpack.i.bf16 %v578_v59, %v720_v60 }
  0x99   : > { %v605_v63 = vpop.permute.xlu1 %604  ;;  %v773_v2 = vunpack.c.l.b16 %v4298_v61  ;;  %v774_v3 = vunpack.c.h.b16 %v4298_v61 }
  0x9a   : > { %v606_v0 = vrot.slane %v605_v63, 4  ;;  %3918 = vrot.lane.b32.xlu0 %v3917_v62, %s5676_s13  ;;  %v5750_v62 = vmov 0 }
  0x9b   : > { %vm4304_vm8 = vcmp.ne.s32.totalorder %v773_v2, %v4280_v50  ;;  %vm4309_vm12 = vcmp.ne.s32.totalorder %v774_v3, %v4283_v51 }
  0x9c   : > { %v615_v5 = vunpack.c.l.b16 %v606_v0  ;;  %v616_v6 = vunpack.c.h.b16 %v606_v0  ;;  %vm5663_vm13 = vmpackc.low %vm4309_vm12, %vm4304_vm8  ;;  %v607_v24 = vsel %vm5664_vm2, %v606_v0, %v605_v63 }
  0x9d   : > { %v781_v12 = vsel %vm5663_vm13, %v750_v7, 0  ;;  %v608_v29 = vunpack.c.l.b16 %v607_v24  ;;  %v609_v30 = vunpack.c.h.b16 %v607_v24 }
  0x9e   : > { %vm619_vm14 = vcmp.ne.s32.totalorder %v615_v5, %v4280_v50  ;;  %vm620_vm15 = vcmp.ne.s32.totalorder %v616_v6, %v4283_v51  ;;  %786 = vrot.lane.b32.xlu1 %v781_v12, %s4049_s24  ;;  %v524_v0 = vpop.permute.xlu0 %523 }
  0x9f   : > { %vm621_vm1 = vmpackc.low %vm620_vm15, %vm619_vm14  ;;  %vm4337_vm5 = vcmp.ne.s32.totalorder %v608_v29, %v4280_v50  ;;  %vm4342_vm6 = vcmp.ne.s32.totalorder %v609_v30, %v4283_v51  ;;  %vm444_vm15 = vcmp.ne.s32.totalorder %v440_v43, %v4280_v50  ;;  %v5758_v29 = vmov 0 }
  0xa0   : > { %v623_v13 = vsel %vm621_vm1, %v592_v10, 0  ;;  %v736_v14 = vsel %vm621_vm1, %v734_v11, 0  ;;  %vm614_vm10 = vmpackc.low %vm4342_vm6, %vm4337_vm5  ;;  %vm445_vm1 = vcmp.ne.s32.totalorder %v441_v44, %v4283_v51  ;;  %v525_v11 = vrot.slane %v524_v0, 4 }
  0xa1   : > { %v3922_v15 = vpack.i.bf16 %v623_v13, %v736_v14  ;;  %vm4353_vm14 = vmpackc.low %vm487_vm9, %vm486_vm7  ;;  %vm5666_vm7 = vcmask 23552   ;;  %vm437_vm9 = vcmp.ne.s32.totalorder %v433_v47, %v4280_v50  ;;  %v650_v60 = vpop.permute.xlu1 %649  ;;  %v5760_v30 = vmov 0 }
  0xa2   : > { %v5749_v46 = vsel %vm4353_vm14, 4294967295, %v5748_v46  ;;  %vm4372_vm13 = vmpackc.low %vm445_vm1, %vm444_vm15  ;;  %v765_v63 = vsel %vm5666_vm7, %v4298_v61, %v4291_v58  ;;  %v651_v4 = vrot.slane %v650_v60, 4 }
  0xa3   : > { %v4325_v16 = vpop.f32.mrf.mxu1  ;;  %3923 = vrot.lane.b32.xlu2 %v3922_v15, %s4048_s21  ;;  %v5751_v62 = vsel %vm4372_vm13, 4294967295, %v5750_v62  ;;  %vm4379_vm2 = vmpackc.low %vm438_vm0, %vm437_vm9  ;;  %v766_v7 = vunpack.c.l.b16 %v765_v63  ;;  %v767_v10 = vunpack.c.h.b16 %v765_v63  ;;  %vm5669_vm0 = vcmask 1031168  }
  0xa4   : > { %v653_v12 = vsel %vm5668_vm3, %v651_v4, %v650_v60  ;;  %v527_v13 = vsel %vm5669_vm0, %v525_v11, %v524_v0  ;;  %v661_v34 = vunpack.c.l.b16 %v651_v4 }
  0xa5   : > { %vm4401_vm5 = vcmp.ne.s32.totalorder %v766_v7, %v4280_v50  ;;  %vm4406_vm6 = vcmp.ne.s32.totalorder %v767_v10, %v4283_v51  ;;  %v529_v24 = vunpack.c.h.b16 %v527_v13 }
  0xa6   : > { %vm4470_vm0 = vcmp.ne.s32.totalorder %v661_v34, %v4280_v50 }
  0xa7   : > { %vm4442_vm7 = vcmp.ne.s32.totalorder %v529_v24, %v4283_v51 }
  0xa9   : > { %v4328_v18 = vpop.f32.mrf.mxu2 }
  0xab   : > { %v401_v20 = vpop.f32.mrf.mxu1 }
  0xac   : > { %v402_v25 = vadd.f32 %v401_v20, %v333_v21  ;;  %v655_v20 = vunpack.c.h.b16 %v653_v12 }
  0xae   : > { %vm4432_vm1 = vcmp.ne.s32.totalorder %v655_v20, %v4283_v51 }
  0xaf   : > { %v5761_v30 = vsel %vm4432_vm1, 4294967295, %v5760_v30 }
  0xb1   : > { %v382_v22 = vpop.f32.mrf.mxu2 }
  0xb2   : > { %v383_v26 = vadd.f32 %v382_v22, %v333_v21  ;;  %v528_v22 = vunpack.c.l.b16 %v527_v13 }
  0xb3   : > { %v404_v31 = vpop.f32.mrf.mxu1 }
  0xb4   : > { %v4332_v28 = vpack.c.bf16 %v402_v25, %v383_v26  ;;  %v405_v35 = vadd.f32 %v404_v31, %v338_v17  ;;  %vm4437_vm9 = vcmp.ne.s32.totalorder %v528_v22, %v4280_v50 }
  0xb5   : > { %vm5672_vm3 = vmpackc.low %vm4442_vm7, %vm4437_vm9 }
  0xb6   : > { %412 = vst [vmem:[#allocation2 + $0x4] sm:$0xff] %v4332_v28 }
  0xb7   : > { %464 = vst [vmem:[#allocation3 + $0x8] sm:$0xff] %v4332_v28 }
  0xb9   : > { %v385_v39 = vpop.f32.mrf.mxu2 }
  0xba   : > { %v386_v40 = vadd.f32 %v385_v39, %v338_v17  ;;  %v654_v17 = vunpack.c.l.b16 %v653_v12  ;;  %v535_v39 = vunpack.c.l.b16 %v525_v11 }
  0xbb   : > { %v406_v54 = vpop.f32.mrf.mxu1 }
  0xbc   : > { %v410_v42 = vpack.c.bf16 %v405_v35, %v386_v40  ;;  %v407_v56 = vadd.f32 %v406_v54, %v4277_v48  ;;  %vm4427_vm15 = vcmp.ne.s32.totalorder %v654_v17, %v4280_v50  ;;  %v662_v35 = vunpack.c.h.b16 %v651_v4 }
  0xbd   : > { %v5759_v29 = vsel %vm4427_vm15, 4294967295, %v5758_v29  ;;  %v536_v40 = vunpack.c.h.b16 %v525_v11  ;;  %vm4480_vm4 = vcmp.ne.s32.totalorder %v535_v39, %v4280_v50  ;;  %v415_v63 = vld [vmem:[#allocation2] sm:$0xff]  ;;  %v416_v0 = vld [vmem:[#allocation2 + $0x8] sm:$0xf] }
  0xbe   : > { %413 = vst [vmem:[#allocation2 + $0x14] sm:$0xff] %v410_v42  ;;  %v622_v52 = vsel %vm614_vm10, %v410_v42, 0  ;;  %v577_v53 = vsel %vm4353_vm14, %v410_v42, 0  ;;  %v448_v4 = vsel %vm4372_vm13, %v416_v0, 0 }
  0xbf   : > { %574 = vst [vmem:[#allocation3 + $0x28] sm:$0xff] %v410_v42  ;;  %626 = vrot.lane.b32.xlu1 %v622_v52, %s4048_s21  ;;  %581 = vrot.lane.b32.xlu0 %v577_v53, %s5676_s13  ;;  %v496_v53 = vsel %vm4353_vm14, %v4332_v28, 0 }
  0xc1   : > { %v387_v55 = vpop.f32.mrf.mxu2 }
  0xc2   : > { %v388_v59 = vadd.f32 %v387_v55, %v4277_v48  ;;  %v466_v55 = vld [vmem:[#allocation2 + $0xc] sm:$0xf] }
  0xc4   : > { %v411_v2 = vpack.c.bf16 %v407_v56, %v388_v59  ;;  %v497_v59 = vsel %vm4287_vm11, %v466_v55, 0 }
  0xc5   : > { %v4383_v5 = vld [vmem:[#allocation2 + $0x10] sm:$0xff]  ;;  %v558_v6 = vld [vmem:[#allocation2 + $0x18] sm:$0xf] }
  0xc6   : > { %414 = vst [vmem:[#allocation2 + $0x24] sm:$0xff] %v411_v2  ;;  %v559_v48 = vsel %vm4379_vm2, %v4383_v5, 0  ;;  %v735_v58 = vsel %vm614_vm10, %v411_v2, 0  ;;  %v560_v61 = vsel %vm4372_vm13, %v558_v6, 0  ;;  %v719_v25 = vsel %vm4353_vm14, %v411_v2, 0  ;;  %vm5667_vm10 = vmpackc.low %vm4406_vm6, %vm4401_vm5  ;;  %v812_v6 = vld [vmem:[%s5655_s2 + $0x20] sm:$0xff] }
  0xc7   : > { %716 = vst [vmem:[#allocation3 + $0x58] sm:$0xff] %v411_v2  ;;  %563 = vrot.lane.b32.xlu2 %v559_v48, %s5685_s26  ;;  %739 = vrot.lane.b32.xlu1 %v735_v58, %s4048_s21  ;;  %v780_v27 = vsel %vm5667_vm10, %v411_v2, 0  ;;  %vm5670_vm10 = vmpackc.low %vm4432_vm1, %vm4427_vm15  ;;  %v511_v56 = vld [vmem:[#allocation2 + $0x18] sm:$0xf]  ;;  %v447_v2 = vsel %vm4379_vm2, %v415_v63, 0  ;;  %s5711_s21 = smov 80  }
  0xc8   : > { %565 = vrot.lane.b32.xlu0 %v560_v61, %s5685_s26 }
  0xcd   : > { %v700_v21 = vld [vmem:[#allocation2 + $0x28] sm:$0xf]  ;;  %v636_v33 = vld [vmem:[#allocation2 + $0x20] sm:$0xff] }
  0xce   : > { %v702_v26 = vsel %vm4372_vm13, %v700_v21, 0  ;;  %v668_v37 = vsel %vm5670_vm10, %v636_v33, 0  ;;  %v685_v38 = vsel %vm5672_vm3, %v636_v33, 0  ;;  %v701_v41 = vsel %vm4379_vm2, %v636_v33, 0  ;;  %v684_v47 = vld [vmem:[#allocation2 + $0x28] sm:$0xf] }
  0xcf   : > { %723 = vrot.lane.b32.xlu2 %v719_v25, %s5676_s13  ;;  %707 = vrot.lane.b32.xlu1 %v702_v26, %s5685_s26  ;;  %vm4475_vm10 = vcmp.ne.s32.totalorder %v662_v35, %v4283_v51  ;;  %vm540_vm3 = vcmp.ne.s32.totalorder %v536_v40, %v4283_v51  ;;  %v637_v49 = vld [vmem:[#allocation2 + $0x28] sm:$0xf]  ;;  %vm5708_vm13 = vcmask 916480  }
  0xd0   : > { %784 = vrot.lane.b32.xlu0 %v780_v27, %s4049_s24  ;;  %vm5675_vm15 = vmpackc.low %vm4475_vm10, %vm4470_vm0 }
  0xd1   : > { %vm541_vm1 = vmpackc.low %vm540_vm3, %vm4480_vm4  ;;  %v669_v54 = vsel %vm5675_vm15, %v637_v49, 0  ;;  %vm457_vm4 = vcmask 1043456  }
  0xd2   : > { %v686_v52 = vsel %vm541_vm1, %v684_v47, 0  ;;  %v543_v60 = vsel %vm541_vm1, %v511_v56, 0  ;;  %vm5772_vm3 = vmpackc.low %vm4442_vm7, %vm4437_vm9  ;;  %vm5773_vm7 = vcmask 1039360   ;;  %vm5774_vm1 = vcmask 1031168  }
  0xd3   : > { %v542_v28 = vsel %vm5772_vm3, %v4383_v5, 0  ;;  %v813_v5 = vld [vmem:[%s5655_s2 + $0x28] sm:$0xff]  ;;  %vm5775_vm9 = vmmov %vm5773_vm7 }
  0xd4   : > { %vm5776_vm3 = vmmov %vm5774_vm1 }
  0xd7   : > { %672 = vrot.lane.b32.xlu2 %v668_v37, %s5706_s17  ;;  %689 = vrot.lane.b32.xlu1 %v685_v38, %s4047_s20 }
  0xd8   : > { %705 = vrot.lane.b32.xlu0 %v701_v41, %s5685_s26 }
  0xdf   : > { %691 = vrot.lane.b32.xlu2 %v686_v52, %s4047_s20  ;;  %500 = vrot.lane.b32.xlu1 %v496_v53, %s5676_s13 }
  0xe0   : > { %674 = vrot.lane.b32.xlu0 %v669_v54, %s5706_s17  ;;  %s5789_s17 = smov 121  }
  0xe7   : > { %502 = vrot.lane.b32.xlu2 %v497_v59, %s5676_s13  ;;  %548 = vrot.lane.b32.xlu1 %v543_v60, %s4047_s20  ;;  %s5698_s13 = smov 51  }
  0xe8   : > { %546 = vrot.lane.b32.xlu0 %v542_v28, %s4047_s20  ;;  %s4053_s20 = smov 16  }
  0xef   : > { %451 = vrot.lane.b32.xlu2 %v447_v2, %s5685_s26 }
  0xf0   : > { %453 = vrot.lane.b32.xlu0 %v448_v4, %s5685_s26  ;;  %s5690_s26 = smov 105  }
  0xf7   : > { %822 = vperm.xlu2 %3916, %v813_v5  }
  0xf8   : > { %817 = vperm.xlu0 %3915, %v812_v6  }
  0xfd   : > { %v3924_v48 = vpop.permute.xlu2 %3923 }
  0xfe   : > { %v3926_v21 = vunpack.i.h.bf16 %v3924_v48  ;;  %v3925_v37 = vunpack.i.l.bf16 %v3924_v48 }
 0x100   : > { %v631_v25 = vrot.slane %v3926_v21, 4  ;;  %v744_v40 = vrot.slane %v3925_v37, 4 }
 0x10c   : > { %v3919_v61 = vpop.permute.xlu0 %3918 }
 0x10d   : > { %v3920_v7 = vunpack.i.l.bf16 %v3919_v61  ;;  %v3921_v22 = vunpack.i.h.bf16 %v3919_v61 }
 0x10f   : > { %v728_v11 = vrot.slane %v3920_v7, 4  ;;  %v586_v31 = vrot.slane %v3921_v22, 4 }
 0x110   : > { %v787_v10 = vpop.permute.xlu1 %786 }
 0x111   : > { %v789_v28 = vrot.slane %v787_v10, 4 }
 0x121   : > { %v564_v58 = vpop.permute.xlu2 %563 }
 0x122   : > { %v567_v47 = vrot.slane %v564_v58, 4 }
 0x129   : > { %v724_v12 = vpop.permute.xlu2 %723 }
 0x12a   : > { %v727_v13 = vrot.slane %v724_v12, 4 }
 0x12c   : > { %v729_v17 = vsel %vm457_vm4, %v727_v13, %v728_v11 }
 0x12d   : > { %v730_v20 = vsel %vm5773_vm7, %v724_v12, %v729_v17  ;;  %vm5777_vm7 = vcmask 7168  }
 0x12e   : > { %732 = vst [vmem:[#allocation3 + $0x60] sm:$0xff] %v730_v20 }
 0x131   : > { %v627_v24 = vpop.permute.xlu1 %626  ;;  %v582_v27 = vpop.permute.xlu0 %581 }
 0x132   : > { %v630_v26 = vrot.slane %v627_v24, 4  ;;  %v585_v32 = vrot.slane %v582_v27, 4  ;;  %v673_v49 = vpop.permute.xlu2 %672 }
 0x134   : > { %v632_v33 = vsel %vm457_vm4, %v630_v26, %v631_v25  ;;  %v587_v35 = vsel %vm457_vm4, %v585_v32, %v586_v31 }
 0x135   : > { %v633_v34 = vsel %vm5774_vm1, %v627_v24, %v632_v33  ;;  %v588_v38 = vsel %vm5775_vm9, %v582_v27, %v587_v35  ;;  %vm5778_vm1 = vcmask 1022976   ;;  %vm5779_vm9 = vcmask 15360   ;;  %v3404_v27 = vld [vmem:[#allocation3 + $0x60] sm:$0xf]  ;;  %v3761_v31 = vld [vmem:[#allocation3 + $0x64] sm:$0xf] }
 0x136   : > { %635 = vst [vmem:[#allocation3 + $0x38] sm:$0xff] %v633_v34 }
 0x137   : > { %590 = vst [vmem:[#allocation3 + $0x30] sm:$0xff] %v588_v38 }
 0x139   : > { %v740_v39 = vpop.permute.xlu1 %739 }
 0x13a   : > { %v743_v41 = vrot.slane %v740_v39, 4  ;;  %v566_v44 = vpop.permute.xlu0 %565  ;;  %v692_v0 = vpop.permute.xlu2 %691 }
 0x13b   : > { %v568_v52 = vrot.slane %v566_v44, 4  ;;  %v694_v11 = vrot.slane %v692_v0, 4 }
 0x13c   : > { %v745_v53 = vsel %vm457_vm4, %v743_v41, %v744_v40  ;;  %v676_v41 = vrot.slane %v673_v49, 4 }
 0x13d   : > { %v746_v54 = vsel %vm5776_vm3, %v740_v39, %v745_v53  ;;  %v569_v55 = vsel %vm457_vm4, %v567_v47, %v568_v52  ;;  %vm5780_vm3 = vmmov %vm5777_vm7 }
 0x13e   : > { %748 = vst [vmem:[#allocation3 + $0x68] sm:$0xff] %v746_v54  ;;  %v570_v56 = vsel %vm5777_vm7, %v564_v58, %v569_v55  ;;  %vm5781_vm7 = vcmask 1039360   ;;  %v3760_v54 = vld [vmem:[#allocation3 + $0x54] sm:$0xf0]  ;;  %v3398_v55 = vld [vmem:[#allocation3 + $0x58] sm:$0xf0] }
 0x13f   : > { %572 = vst [vmem:[#allocation3 + $0x20] sm:$0xff] %v570_v56 }
 0x141   : > { %v708_v59 = vpop.permute.xlu1 %707 }
 0x142   : > { %v785_v60 = vpop.permute.xlu0 %784  ;;  %v710_v58 = vrot.slane %v708_v59, 4  ;;  %v503_v35 = vpop.permute.xlu2 %502 }
 0x143   : > { %v788_v63 = vrot.slane %v785_v60, 4  ;;  %v505_v38 = vrot.slane %v503_v35, 4  ;;  %v1121_v35 = vld [vmem:[#allocation2 + $0x2c] sm:$0xf] }
 0x145   : > { %v790_v2 = vsel %vm457_vm4, %v788_v63, %v789_v28  ;;  %v3762_v17 = vld [vmem:[#allocation3 + $0x64] sm:$0xf0]  ;;  %v3406_v22 = vld [vmem:[#allocation3 + $0x68] sm:$0xf0] }
 0x146   : > { %v791_v4 = vsel %vm5778_vm1, %v785_v60, %v790_v2  ;;  %v3405_v33 = vor.u32 %v3762_v17, %v3404_v27  ;;  %v3409_v34 = vor.u32 %v3761_v31, %v3406_v22  ;;  %vm5782_vm1 = vcmask 23552   ;;  %v3756_v17 = vld [vmem:[#allocation3 + $0x34] sm:$0xf0]  ;;  %v3372_v31 = vld [vmem:[#allocation3 + $0x20] sm:$0xf] }
 0x147   : > { %v881_v5 = vunpack.c.l.b16 %v791_v4  ;;  %v882_v6 = vunpack.c.h.b16 %v791_v4 }
 0x149   : > { %v690_v48 = vpop.permute.xlu1 %689  ;;  %v897_v61 = vpack.c.b16 %v881_v5, %v881_v5  ;;  %v898_v7 = vpack.c.b16 %v882_v6, %v882_v6 }
 0x14a   : > { %v693_v12 = vrot.slane %v690_v48, 4  ;;  %v706_v13 = vpop.permute.xlu0 %705 }
 0x14b   : > { %v709_v20 = vrot.slane %v706_v13, 4  ;;  %v922_v21 = vsel %vm457_vm4, %v897_v61, 0  ;;  %v925_v10 = vsel %vm457_vm4, %v898_v7, 0 }
 0x14c   : > { %v695_v24 = vsel %vm457_vm4, %v693_v12, %v694_v11  ;;  %927 = vmatpush.bf16.msrb.mxu2 %v922_v21  ;;  %945 = vmatpush.bf16.msra.mxu3 %v925_v10  ;;  %v3755_v21 = vld [vmem:[#allocation3 + $0x34] sm:$0xf]  ;;  %v3382_v10 = vld [vmem:[#allocation3 + $0x38] sm:$0xf0] }
 0x14d   : > { %v696_v25 = vsel %vm5779_vm9, %v690_v48, %v695_v24  ;;  %v711_v26 = vsel %vm457_vm4, %v709_v20, %v710_v58  ;;  %v452_v58 = vpop.permute.xlu2 %451  ;;  %v3380_v20 = vld [vmem:[#allocation3 + $0x30] sm:$0xf]  ;;  %v3385_v27 = vor.u32 %v3755_v21, %v3382_v10 }
 0x14e   : > { %698 = vst [vmem:[#allocation3 + $0x48] sm:$0xff] %v696_v25  ;;  %v712_v32 = vsel %vm5780_vm3, %v706_v13, %v711_v26  ;;  %v455_v24 = vrot.slane %v452_v58, 4  ;;  %v3381_v26 = vor.u32 %v3756_v17, %v3380_v20 }
 0x14f   : > { %714 = vst [vmem:[#allocation3 + $0x50] sm:$0xff] %v712_v32  ;;  %v3753_v32 = vld [vmem:[#allocation3 + $0x24] sm:$0xf] }
 0x150   : > { %928 = vmatpush.bf16.msrb.mxu2 %v3405_v33  ;;  %946 = vmatpush.bf16.msra.mxu3 %v3409_v34  ;;  %v814_v33 = vld [vmem:[%s5655_s2 + $0x30] sm:$0xff]  ;;  %v1047_v34 = vld [vmem:[#allocation2 + $0x1c] sm:$0xf] }
 0x151   : > { %v501_v37 = vpop.permute.xlu1 %500  ;;  %827 = vperm.xlu1 %3927, %v814_v33  }
 0x152   : > { %v675_v39 = vpop.permute.xlu0 %674  ;;  %v504_v40 = vrot.slane %v501_v37, 4 }
 0x153   : > { %v677_v44 = vrot.slane %v675_v39, 4 }
 0x154   : > { %v506_v47 = vsel %vm457_vm4, %v504_v40, %v505_v38  ;;  %v3933_v38 = vpack.i.bf16 %v1047_v34, %v1121_v35  ;;  %v3754_v40 = vld [vmem:[#allocation3 + $0x24] sm:$0xf0] }
 0x155   : > { %v678_v52 = vsel %vm457_vm4, %v676_v41, %v677_v44  ;;  %v507_v53 = vsel %vm5781_vm7, %v501_v37, %v506_v47  ;;  %v3758_v48 = vld [vmem:[#allocation3 + $0x44] sm:$0xf0]  ;;  %v3374_v41 = vld [vmem:[#allocation3 + $0x28] sm:$0xf0]  ;;  %v3373_v44 = vor.u32 %v3754_v40, %v3372_v31  ;;  %vm5678_vm7 = vcmask 982016  }
 0x156   : > { %v680_v56 = vsel %vm5782_vm1, %v673_v49, %v678_v52  ;;  %509 = vst [vmem:[#allocation3 + $0x10] sm:$0xff] %v507_v53  ;;  %v3396_v59 = vld [vmem:[#allocation3 + $0x50] sm:$0xf]  ;;  %v3759_v60 = vld [vmem:[#allocation3 + $0x54] sm:$0xf]  ;;  %v3377_v47 = vor.u32 %v3753_v32, %v3374_v41  ;;  %3934 = vrot.lane.b32.xlu0 %v3933_v38, %s4050_s23 }
 0x157   : > { %682 = vst [vmem:[#allocation3 + $0x40] sm:$0xff] %v680_v56  ;;  %v3397_v28 = vor.u32 %v3760_v54, %v3396_v59  ;;  %v3401_v63 = vor.u32 %v3759_v60, %v3398_v55  ;;  %v3390_v49 = vld [vmem:[#allocation3 + $0x48] sm:$0xf0]  ;;  %v3750_v60 = vld [vmem:[#allocation3 + $0x4] sm:$0xf0] }
 0x159   : > { %v549_v0 = vpop.permute.xlu1 %548  ;;  %929 = vmatpush.bf16.msrb.mxu2 %v3397_v28  ;;  %947 = vmatpush.bf16.msra.mxu3 %v3401_v63 }
 0x15a   : > { %v547_v2 = vpop.permute.xlu0 %546  ;;  %v551_v4 = vrot.slane %v549_v0, 4  ;;  %v3358_v0 = vld [vmem:[#allocation3 + $0x8] sm:$0xf0] }
 0x15b   : > { %v550_v5 = vrot.slane %v547_v2, 4 }
 0x15d   : > { %v552_v6 = vsel %vm457_vm4, %v550_v5, %v551_v4  ;;  %v3364_v54 = vld [vmem:[#allocation3 + $0x10] sm:$0xf]  ;;  %v3751_v55 = vld [vmem:[#allocation3 + $0x14] sm:$0xf]  ;;  %v3748_v5 = vld [vmem:[%s5657_s4] sm:$0xff] }
 0x15e   : > { %v554_v61 = vsel %vm5779_vm9, %v547_v2, %v552_v6  ;;  %v3388_v7 = vld [vmem:[#allocation3 + $0x40] sm:$0xf]  ;;  %v3757_v11 = vld [vmem:[#allocation3 + $0x44] sm:$0xf] }
 0x15f   : > { %556 = vst [vmem:[#allocation3 + $0x18] sm:$0xff] %v554_v61  ;;  %v3389_v12 = vor.u32 %v3758_v48, %v3388_v7  ;;  %v3393_v13 = vor.u32 %v3757_v11, %v3390_v49  ;;  %v796_v6 = vld [vmem:[%s5657_s4 + $0x8] sm:$0xf]  ;;  %v1033_v7 = vld [vmem:[#allocation2 + $0x1c] sm:$0xf] }
 0x160   : > { %v835_v48 = vunpack.c.l.b16 %v796_v6  ;;  %v1107_v11 = vld [vmem:[#allocation2 + $0x2c] sm:$0xf]  ;;  %v1169_v6 = vld [vmem:[%s5655_s2 + $0x48] sm:$0xff] }
 0x161   : > { %930 = vmatpush.bf16.msrb.mxu2 %v3389_v12  ;;  %948 = vmatpush.bf16.msra.mxu3 %v3393_v13  ;;  %v3928_v49 = vpack.i.bf16 %v1033_v7, %v1107_v11  ;;  %v1135_v12 = vld [vmem:[#allocation2 + $0x2c] sm:$0xf] }
 0x162   : > { %v454_v22 = vpop.permute.xlu0 %453  ;;  %v837_v61 = vpack.c.b16 %v835_v48, %v835_v48  ;;  %1140 = vrot.lane.b32.xlu2 %v1135_v12, %s5711_s21 }
 0x163   : > { %v456_v25 = vrot.slane %v454_v22, 4  ;;  %3929 = vrot.lane.b32.xlu1 %v3928_v49, %s5688_s19  ;;  %v823_v22 = vpop.permute.xlu2 %822 }
 0x165   : > { %v458_v37 = vsel %vm457_vm4, %v455_v24, %v456_v25  ;;  %931 = vmatpush.bf16.msrb.mxu2 %v3381_v26  ;;  %949 = vmatpush.bf16.msra.mxu3 %v3385_v27 }
 0x166   : > { %v460_v39 = vsel %vm5780_vm3, %v452_v58, %v458_v37  ;;  %v3752_v52 = vld [vmem:[#allocation3 + $0x14] sm:$0xf0]  ;;  %v3366_v53 = vld [vmem:[#allocation3 + $0x18] sm:$0xf0] }
 0x167   : > { %462 = vst [vmem:[#allocation3] sm:$0xff] %v460_v39  ;;  %v3365_v56 = vor.u32 %v3752_v52, %v3364_v54  ;;  %v3369_v59 = vor.u32 %v3751_v55, %v3366_v53  ;;  %v4580_v54 = vld [vmem:[%s5654_s1] sm:$0x3] }
 0x168   : > { %v1526_v55 = vadd.s32 4294967291, %v4580_v54 }
 0x169   : > { %932 = vmatpush.bf16.msrb.mxu2 %v3373_v44  ;;  %950 = vmatpush.bf16.msra.mxu3 %v3377_v47 }
 0x16a   : > { %v818_v13 = vpop.permute.xlu0 %817  ;;  %vm1527_vm1 = vcmp.ge.s32.totalorder %v1526_v55, 0  ;;  %vm1528_vm9 = vcmp.lt.s32.totalorder %v1526_v55, 16 }
 0x16b   : > { %vm1529_vm3 = vmand %vm1527_vm1, %vm1528_vm9 }
 0x16d   : > { %933 = vmatpush.bf16.msrb.mxu2 %v3365_v56  ;;  %951 = vmatpush.bf16.msra.mxu3 %v3369_v59  ;;  %v987_v59 = vld [vmem:[#allocation2 + $0xc] sm:$0xf] }
 0x16e   : > { %v3356_v28 = vld [vmem:[#allocation3] sm:$0xf]  ;;  %v3749_v63 = vld [vmem:[#allocation3 + $0x4] sm:$0xf] }
 0x16f   : > { %v3357_v2 = vor.u32 %v3750_v60, %v3356_v28  ;;  %v3361_v4 = vor.u32 %v3749_v63, %v3358_v0  ;;  %v1530_v28 = vsel %vm1529_vm3, 1, %v4043_v1 }
 0x170   : > { %v1531_v63 = vperm.slane %v1530_v28, 0  ;;  %v1532_v0 = vperm.slane %v1530_v28, 1 }
 0x171   : > { %934 = vmatpush.bf16.msrb.mxu2 %v3357_v2  ;;  %952 = vmatpush.bf16.msra.mxu3 %v3361_v4  ;;  %v1168_v2 = vld [vmem:[%s5655_s2 + $0x40] sm:$0xff] }
 0x172   : > { %vm1533_vm15 = vcmp.eq.s32.totalorder %v1531_v63, 1  ;;  %vm1534_vm1 = vcmp.eq.s32.totalorder %v1532_v0, 1  ;;  %v1788_v0 = vadd.s32 4294967289, %v4580_v54 }
 0x173   : > { %vm1535_vm9 = vmpackc.low %vm1534_vm1, %vm1533_vm15  ;;  %vm1057_vm15 = vcmask 785408  }
 0x174   : > { %3410 = vmatmul.msk.bf16.vlgmr.msrb.gmra.mxu2 %vm5678_vm7, %v3748_v5  ;;  %3412 = vmatmul.msk.bf16.vlgmr.msra.gmra.mxu3 %vm5678_vm7, %v3748_v5  ;;  %v4596_v48 = vsel %vm1535_vm9, 65537, %v4043_v1 }
 0x184   : > { %3411 = vmatmul.msk.bf16.gmra.mxu2 %vm5678_vm7, %v837_v61  ;;  %3413 = vmatmul.msk.bf16.gmra.mxu3 %vm5678_vm7, %v837_v61  ;;  %v1167_v61 = vld [vmem:[%s5655_s2 + $0x38] sm:$0xff] }
 0x1bc   : > { %v4605_v7 = vpop.permute.xlu2 %1140 }
 0x1c3   : > { %v828_v32 = vpop.permute.xlu1 %827 }
 0x1c8   : > { %v3935_v11 = vpop.permute.xlu0 %3934 }
 0x1c9   : > { %v3937_v49 = vunpack.i.h.bf16 %v3935_v11 }
 0x1cb   : > { %v1055_v12 = vrot.slane %v3937_v49, 4 }
 0x1f7   : > { %v936_v17 = vpop.f32.mrf.mxu2  ;;  %v954_v58 = vpop.f32.mrf.mxu3 }
 0x1f8   : > { %v937_v20 = vadd.f32 %v936_v17, %v818_v13  ;;  %v955_v21 = vadd.f32 %v954_v58, %v818_v13  ;;  %v3936_v58 = vunpack.i.l.bf16 %v3935_v11 }
 0x1fa   : > { %v963_v10 = vpack.c.bf16 %v955_v21, %v937_v20 }
 0x1fc   : > { %966 = vst [vmem:[#allocation2 + $0x4] sm:$0xff] %v963_v10 }
 0x1fd   : > { %985 = vst [vmem:[#allocation3 + $0x8] sm:$0xff] %v963_v10 }
 0x1ff   : > { %v938_v24 = vpop.f32.mrf.mxu2  ;;  %v956_v25 = vpop.f32.mrf.mxu3 }
 0x200   : > { %v939_v26 = vadd.f32 %v938_v24, %v823_v22  ;;  %v957_v27 = vadd.f32 %v956_v25, %v823_v22 }
 0x202   : > { %v964_v31 = vpack.c.bf16 %v957_v27, %v939_v26  ;;  %v3930_v27 = vpop.permute.xlu1 %3929 }
 0x203   : > { %v969_v4 = vld [vmem:[#allocation2] sm:$0xff]  ;;  %v970_v5 = vld [vmem:[#allocation2 + $0x8] sm:$0xf] }
 0x204   : > { %967 = vst [vmem:[#allocation2 + $0x14] sm:$0xff] %v964_v31  ;;  %1050 = vrot.lane.b32.xlu2 %v964_v31, %s4050_s23  ;;  %1036 = vrot.lane.b32.xlu1 %v964_v31, %s5688_s19 }
 0x205   : > { %1031 = vst [vmem:[#allocation3 + $0x28] sm:$0xff] %v964_v31  ;;  %v1587_v31 = vadd.s32 5, %v4580_v54 }
 0x207   : > { %v941_v33 = vpop.f32.mrf.mxu2  ;;  %v959_v34 = vpop.f32.mrf.mxu3  ;;  %vm1588_vm3 = vcmp.ge.s32.totalorder %v1587_v31, 0  ;;  %vm1589_vm1 = vcmp.lt.s32.totalorder %v1587_v31, 16 }
 0x208   : > { %v942_v35 = vadd.f32 %v941_v33, %v828_v32  ;;  %v960_v37 = vadd.f32 %v959_v34, %v828_v32  ;;  %vm1590_vm9 = vmand %vm1588_vm3, %vm1589_vm1  ;;  %v3932_v33 = vunpack.i.h.bf16 %v3930_v27 }
 0x209   : > { %v1591_v32 = vsel %vm1590_vm9, 1, %v4043_v1 }
 0x20a   : > { %v965_v38 = vpack.c.bf16 %v960_v37, %v942_v35  ;;  %v1592_v34 = vperm.slane %v1591_v32, 0  ;;  %v1593_v35 = vperm.slane %v1591_v32, 1 }
 0x20b   : > { %v1016_v39 = vld [vmem:[#allocation2 + $0x10] sm:$0xff]  ;;  %v1017_v40 = vld [vmem:[#allocation2 + $0x18] sm:$0xf] }
 0x20c   : > { %968 = vst [vmem:[#allocation2 + $0x24] sm:$0xff] %v965_v38  ;;  %1020 = vrot.lane.b32.xlu0 %v1016_v39, %s4053_s20  ;;  %1124 = vrot.lane.b32.xlu2 %v965_v38, %s4050_s23  ;;  %v1002_v60 = vld [vmem:[#allocation2 + $0x18] sm:$0xf]  ;;  %s5704_s23 = smov 45   ;;  %vm1594_vm7 = vcmp.eq.s32.totalorder %v1592_v34, 1  ;;  %vm1595_vm14 = vcmp.eq.s32.totalorder %v1593_v35, 1 }
 0x20d   : > { %1022 = vrot.lane.b32.xlu1 %v1017_v40, %s4053_s20  ;;  %1105 = vst [vmem:[#allocation3 + $0x58] sm:$0xff] %v965_v38  ;;  %vm1596_vm11 = vmpackc.low %vm1595_vm14, %vm1594_vm7  ;;  %vm5715_vm14 = vcmask 130048   ;;  %vm1789_vm7 = vcmp.ge.s32.totalorder %v1788_v0, 0 }
 0x20e   : > { %v4614_v40 = vsel %vm1596_vm11, 65537, %v4043_v1  ;;  %vm5687_vm11 = vcmask 654336  }
 0x20f   : > { %v943_v41 = vpop.f32.mrf.mxu2  ;;  %v961_v44 = vpop.f32.mrf.mxu3 }
 0x213   : > { %v1091_v47 = vld [vmem:[#allocation2 + $0x28] sm:$0xf]  ;;  %v1061_v52 = vld [vmem:[#allocation2 + $0x20] sm:$0xff] }
 0x214   : > { %1110 = vrot.lane.b32.xlu0 %v965_v38, %s5688_s19  ;;  %1096 = vrot.lane.b32.xlu2 %v1091_v47, %s4053_s20  ;;  %v1077_v53 = vld [vmem:[#allocation2 + $0x28] sm:$0xf] }
 0x215   : > { %1138 = vrot.lane.b32.xlu1 %v965_v38, %s5711_s21  ;;  %v1062_v56 = vld [vmem:[#allocation2 + $0x28] sm:$0xf]  ;;  %v1041_v38 = vrot.slane %v3932_v33, 4  ;;  %s5809_s21 = smov 45  }
 0x21c   : > { %1065 = vrot.lane.b32.xlu0 %v1061_v52, %s5709_s22  ;;  %1080 = vrot.lane.b32.xlu2 %v1061_v52, %s4055_s25 }
 0x21d   : > { %1094 = vrot.lane.b32.xlu1 %v1061_v52, %s4053_s20 }
 0x224   : > { %1082 = vrot.lane.b32.xlu0 %v1077_v53, %s4055_s25  ;;  %990 = vrot.lane.b32.xlu2 %v963_v10, %s5688_s19  ;;  %v1129_v10 = vrot.slane %v3936_v58, 4 }
 0x225   : > { %1067 = vrot.lane.b32.xlu1 %v1062_v56, %s5709_s22  ;;  %s4071_s22 = smov 85  }
 0x22c   : > { %992 = vrot.lane.b32.xlu0 %v987_v59, %s5688_s19  ;;  %1007 = vrot.lane.b32.xlu2 %v1002_v60, %s4055_s25  ;;  %v3931_v60 = vunpack.i.l.bf16 %v3930_v27  ;;  %v1849_v27 = vadd.s32 7, %v4580_v54  ;;  %s5713_s19 = smov 121  }
 0x22d   : > { %1005 = vrot.lane.b32.xlu1 %v1016_v39, %s4055_s25  ;;  %s5694_s25 = smov 5  }
 0x234   : > { %973 = vrot.lane.b32.xlu0 %v969_v4, %s4053_s20  ;;  %1177 = vperm.xlu2 %3916, %v1168_v2   ;;  %v1143_v2 = vrot.slane %v4605_v7, 4  ;;  %v1115_v4 = vrot.slane %v3931_v60, 4 }
 0x235   : > { %975 = vrot.lane.b32.xlu1 %v970_v5, %s4053_s20 }
 0x23c   : > { %1182 = vperm.xlu2 %3916, %v1169_v6   ;;  %1672 = vrot.lane.b32.xlu0 %v4614_v40, %s5694_s25  ;;  %s4066_s25 = smov 77  }
 0x23d   : > { %1706 = vrot.lane.b32.xlu1 %v4596_v48, %s5692_s10  ;;  %s4065_s10 = smov 23  }
 0x244   : > { %1634 = vrot.lane.b32.xlu0 %v4596_v48, %s4060_s12 }
 0x245   : > { %1172 = vperm.xlu1 %3927, %v1167_v61  }
 0x24c   : > { %1598 = vrot.lane.b32.xlu0 %v4614_v40, %s4061_s18 }
 0x24d   : > { %1492 = vrot.lane.b32.xlu1 %v4239_v36, %s5698_s13  ;;  %s4068_s13 = smov 9  }
 0x255   : > { %1444 = vrot.lane.b32.xlu1 %v4264_v45, %s5704_s23  ;;  %s5814_s23 = smov 51  }
 0x25e   : > { %v1051_v13 = vpop.permute.xlu2 %1050 }
 0x25f   : > { %v1054_v17 = vrot.slane %v1051_v13, 4 }
 0x261   : > { %v1056_v20 = vsel %vm457_vm4, %v1054_v17, %v1055_v12 }
 0x262   : > { %v1058_v21 = vsel %vm1057_vm15, %v1051_v13, %v1056_v20 }
 0x263   : > { %1060 = vst [vmem:[#allocation3 + $0x38] sm:$0xff] %v1058_v21 }
 0x266   : > { %v1125_v22 = vpop.permute.xlu2 %1124 }
 0x267   : > { %v1128_v24 = vrot.slane %v1125_v22, 4 }
 0x269   : > { %v1130_v25 = vsel %vm457_vm4, %v1128_v24, %v1129_v10 }
 0x26a   : > { %v1131_v26 = vsel %vm1057_vm15, %v1125_v22, %v1130_v25  ;;  %vm1790_vm15 = vcmp.lt.s32.totalorder %v1788_v0, 16 }
 0x26b   : > { %1133 = vst [vmem:[#allocation3 + $0x68] sm:$0xff] %v1131_v26  ;;  %vm1791_vm3 = vmand %vm1789_vm7, %vm1790_vm15  ;;  %vm1850_vm15 = vcmp.ge.s32.totalorder %v1849_v27, 0 }
 0x26c   : > { %v1792_v13 = vsel %vm1791_vm3, 1, %v4043_v1  ;;  %vm1851_vm3 = vcmp.lt.s32.totalorder %v1849_v27, 16 }
 0x26d   : > { %v1793_v58 = vperm.slane %v1792_v13, 0  ;;  %v1794_v10 = vperm.slane %v1792_v13, 1  ;;  %v3462_v13 = vld [vmem:[#allocation3 + $0x58] sm:$0xf0] }
 0x26e   : > { %v1097_v52 = vpop.permute.xlu2 %1096 }
 0x26f   : > { %vm4635_vm1 = vcmp.eq.s32.totalorder %v1793_v58, 1  ;;  %v1099_v31 = vrot.slane %v1097_v52, 4  ;;  %vm1796_vm9 = vcmp.eq.s32.totalorder %v1794_v10, 1 }
 0x270   : > { %vm1797_vm7 = vmpackc.low %vm1796_vm9, %vm4635_vm1 }
 0x276   : > { %v1037_v37 = vpop.permute.xlu1 %1036  ;;  %v4628_v11 = vpop.permute.xlu2 %1080 }
 0x277   : > { %v1040_v39 = vrot.slane %v1037_v37, 4 }
 0x279   : > { %v1042_v41 = vsel %vm457_vm4, %v1040_v39, %v1041_v38  ;;  %v3470_v38 = vld [vmem:[#allocation3 + $0x68] sm:$0xf0]  ;;  %v4645_v39 = vsel %vm1797_vm7, 65537, %v4043_v1  ;;  %vm1012_vm7 = vcmask 261120  }
 0x27a   : > { %v1043_v44 = vsel %vm5708_vm13, %v1037_v37, %v1042_v41  ;;  %v3777_v37 = vld [vmem:[#allocation3 + $0x64] sm:$0xf0]  ;;  %1968 = vrot.lane.b32.xlu0 %v4645_v39, %s5690_s26  ;;  %1896 = vrot.lane.b32.xlu1 %v4645_v39, %s5713_s19  ;;  %s5696_s26 = smov 119   ;;  %s5790_s19 = smov 80  }
 0x27b   : > { %1045 = vst [vmem:[#allocation3 + $0x30] sm:$0xff] %v1043_v44 }
 0x27e   : > { %v1021_v47 = vpop.permute.xlu0 %1020 }
 0x27f   : > { %v1024_v53 = vrot.slane %v1021_v47, 4  ;;  %v1023_v55 = vpop.permute.xlu1 %1022 }
 0x280   : > { %v1025_v56 = vrot.slane %v1023_v55, 4 }
 0x282   : > { %v1026_v59 = vsel %vm457_vm4, %v1024_v53, %v1025_v56  ;;  %1324 = vrot.lane.b32.xlu1 %v4264_v45, %s4066_s25 }
 0x283   : > { %v1027_v28 = vsel %vm5715_vm14, %v1021_v47, %v1026_v59  ;;  %v991_v47 = vpop.permute.xlu2 %990 }
 0x284   : > { %1029 = vst [vmem:[#allocation3 + $0x20] sm:$0xff] %v1027_v28 }
 0x286   : > { %v1111_v63 = vpop.permute.xlu0 %1110 }
 0x287   : > { %v1114_v5 = vrot.slane %v1111_v63, 4  ;;  %v1139_v6 = vpop.permute.xlu1 %1138 }
 0x288   : > { %v1142_v61 = vrot.slane %v1139_v6, 4 }
 0x289   : > { %v1116_v49 = vsel %vm457_vm4, %v1114_v5, %v1115_v4 }
 0x28a   : > { %v1117_v12 = vsel %vm5708_vm13, %v1111_v63, %v1116_v49  ;;  %v1144_v7 = vsel %vm457_vm4, %v1142_v61, %v1143_v2  ;;  %v1084_v63 = vrot.slane %v4628_v11, 4 }
 0x28b   : > { %1119 = vst [vmem:[#allocation3 + $0x60] sm:$0xff] %v1117_v12  ;;  %v1146_v17 = vsel %vm5687_vm11, %v1139_v6, %v1144_v7  ;;  %vm1852_vm11 = vmand %vm1850_vm15, %vm1851_vm3  ;;  %vm5724_vm3 = vcmask 392192   ;;  %v3775_v7 = vld [vmem:[#allocation3 + $0x54] sm:$0xf0]  ;;  %v1008_v10 = vpop.permute.xlu2 %1007 }
 0x28c   : > { %v1236_v20 = vunpack.c.l.b16 %v1146_v17  ;;  %v1237_v21 = vunpack.c.h.b16 %v1146_v17  ;;  %v1853_v56 = vsel %vm1852_vm11, 1, %v4043_v1  ;;  %v1010_v27 = vrot.slane %v1008_v10, 4  ;;  %v3765_v10 = vld [vmem:[#allocation3 + $0x4] sm:$0xf0] }
 0x28d   : > { %v1854_v59 = vperm.slane %v1853_v56, 0  ;;  %v1855_v60 = vperm.slane %v1853_v56, 1  ;;  %v3446_v56 = vld [vmem:[#allocation3 + $0x38] sm:$0xf0]  ;;  %vm5716_vm11 = vcmask 613376  }
 0x28e   : > { %v1066_v24 = vpop.permute.xlu0 %1065  ;;  %v1252_v25 = vpack.c.b16 %v1236_v20, %v1236_v20  ;;  %v1253_v26 = vpack.c.b16 %v1237_v21, %v1237_v21 }
 0x28f   : > { %v1095_v32 = vpop.permute.xlu1 %1094  ;;  %vm1856_vm1 = vcmp.eq.s32.totalorder %v1854_v59, 1  ;;  %vm1857_vm9 = vcmp.eq.s32.totalorder %v1855_v60, 1  ;;  %v1069_v4 = vrot.slane %v1066_v24, 4 }
 0x290   : > { %v1098_v33 = vrot.slane %v1095_v32, 4  ;;  %v1275_v34 = vsel %vm457_vm4, %v1252_v25, 0  ;;  %v1278_v35 = vsel %vm457_vm4, %v1253_v26, 0  ;;  %vm1858_vm15 = vmpackc.low %vm1857_vm9, %vm1856_vm1 }
 0x291   : > { %1280 = vmatpush.bf16.msra.mxu0 %v1275_v34  ;;  %1298 = vmatpush.bf16.msrb.mxu1 %v1278_v35  ;;  %v1859_v6 = vsel %vm1858_vm15, 65537, %v4043_v1  ;;  %vm5785_vm15 = vcmask 982016  }
 0x292   : > { %v1100_v54 = vsel %vm457_vm4, %v1098_v33, %v1099_v31  ;;  %v3468_v41 = vld [vmem:[#allocation3 + $0x60] sm:$0xf]  ;;  %v3776_v44 = vld [vmem:[#allocation3 + $0x64] sm:$0xf]  ;;  %2016 = vrot.lane.b32.xlu2 %v1859_v6, %s5696_s26  ;;  %1860 = vrot.lane.b32.xlu0 %v1859_v6, %s4065_s10  ;;  %s5700_s26 = smov 43  }
 0x293   : > { %v1101_v52 = vsel %vm5715_vm14, %v1095_v32, %v1100_v54  ;;  %v3469_v53 = vor.u32 %v3777_v37, %v3468_v41  ;;  %v3473_v55 = vor.u32 %v3776_v44, %v3470_v38  ;;  %v3444_v44 = vld [vmem:[#allocation3 + $0x30] sm:$0xf] }
 0x294   : > { %1103 = vst [vmem:[#allocation3 + $0x50] sm:$0xff] %v1101_v52 }
 0x295   : > { %1281 = vmatpush.bf16.msra.mxu0 %v3469_v53  ;;  %1299 = vmatpush.bf16.msrb.mxu1 %v3473_v55  ;;  %v3771_v55 = vld [vmem:[#allocation3 + $0x34] sm:$0xf0] }
 0x296   : > { %v1083_v28 = vpop.permute.xlu0 %1082  ;;  %v3445_v60 = vor.u32 %v3771_v55, %v3444_v44 }
 0x297   : > { %v1085_v0 = vrot.slane %v1083_v28, 4  ;;  %v1068_v2 = vpop.permute.xlu1 %1067  ;;  %v3436_v28 = vld [vmem:[#allocation3 + $0x20] sm:$0xf] }
 0x298   : > { %v1070_v5 = vrot.slane %v1068_v2, 4 }
 0x299   : > { %v1086_v61 = vsel %vm457_vm4, %v1084_v63, %v1085_v0  ;;  %v3768_v63 = vld [vmem:[#allocation3 + $0x24] sm:$0xf] }
 0x29a   : > { %v1071_v49 = vsel %vm457_vm4, %v1069_v4, %v1070_v5  ;;  %v1087_v12 = vsel %vm1012_vm7, %v4628_v11, %v1086_v61  ;;  %v994_v11 = vrot.slane %v991_v47, 4  ;;  %1537 = vrot.lane.b32.xlu2 %v4596_v48, %s5700_s26  ;;  %1799 = vrot.lane.b32.xlu0 %v4645_v39, %s4068_s13  ;;  %v3770_v48 = vld [vmem:[#allocation3 + $0x34] sm:$0xf]  ;;  %s5702_s26 = smov 7   ;;  %v3769_v4 = vld [vmem:[#allocation3 + $0x24] sm:$0xf0] }
 0x29b   : > { %v1073_v1 = vsel %vm5724_vm3, %v1066_v24, %v1071_v49  ;;  %1089 = vst [vmem:[#allocation3 + $0x48] sm:$0xff] %v1087_v12  ;;  %v3460_v17 = vld [vmem:[#allocation3 + $0x50] sm:$0xf]  ;;  %v3774_v58 = vld [vmem:[#allocation3 + $0x54] sm:$0xf]  ;;  %v3449_v39 = vor.u32 %v3770_v48, %v3446_v56  ;;  %v3437_v61 = vor.u32 %v3769_v4, %v3436_v28 }
 0x29c   : > { %1075 = vst [vmem:[#allocation3 + $0x40] sm:$0xff] %v1073_v1  ;;  %v3461_v20 = vor.u32 %v3775_v7, %v3460_v17  ;;  %v3465_v21 = vor.u32 %v3774_v58, %v3462_v13  ;;  %v3438_v5 = vld [vmem:[#allocation3 + $0x28] sm:$0xf0] }
 0x29d   : > { %v3441_v49 = vor.u32 %v3768_v63, %v3438_v5  ;;  %v1427_v56 = vld [vmem:[#allocation2 + $0xc] sm:$0xf]  ;;  %v1671_v5 = vld [vmem:[#allocation2 + $0x1c] sm:$0xf] }
 0x29e   : > { %v993_v22 = vpop.permute.xlu0 %992  ;;  %1282 = vmatpush.bf16.msra.mxu0 %v3461_v20  ;;  %1300 = vmatpush.bf16.msrb.mxu1 %v3465_v21 }
 0x29f   : > { %v995_v25 = vrot.slane %v993_v22, 4  ;;  %v1006_v26 = vpop.permute.xlu1 %1005  ;;  %v3422_v22 = vld [vmem:[#allocation3 + $0x8] sm:$0xf0] }
 0x2a0   : > { %v1009_v31 = vrot.slane %v1006_v26, 4 }
 0x2a1   : > { %v996_v32 = vsel %vm457_vm4, %v994_v11, %v995_v25 }
 0x2a2   : > { %v998_v45 = vsel %vm5708_vm13, %v991_v47, %v996_v32  ;;  %v1011_v24 = vsel %vm457_vm4, %v1009_v31, %v1010_v27  ;;  %v3773_v33 = vld [vmem:[#allocation3 + $0x44] sm:$0xf0]  ;;  %v3454_v34 = vld [vmem:[#allocation3 + $0x48] sm:$0xf0]  ;;  %1934 = vrot.lane.b32.xlu2 %v1859_v6, %s5702_s26  ;;  %s4070_s26 = smov 83   ;;  %vm5786_vm13 = vmmov %vm5785_vm15 }
 0x2a3   : > { %1000 = vst [vmem:[#allocation3 + $0x10] sm:$0xff] %v998_v45  ;;  %v1013_v35 = vsel %vm1012_vm7, %v1006_v26, %v1011_v24  ;;  %v3452_v37 = vld [vmem:[#allocation3 + $0x40] sm:$0xf]  ;;  %v3772_v38 = vld [vmem:[#allocation3 + $0x44] sm:$0xf] }
 0x2a4   : > { %1015 = vst [vmem:[#allocation3 + $0x18] sm:$0xff] %v1013_v35  ;;  %v3453_v54 = vor.u32 %v3773_v33, %v3452_v37  ;;  %v3457_v41 = vor.u32 %v3772_v38, %v3454_v34  ;;  %v1705_v31 = vld [vmem:[#allocation2 + $0x1c] sm:$0xf]  ;;  %v1151_v34 = vld [vmem:[%s5658_s5 + $0x8] sm:$0xf] }
 0x2a5   : > { %v1190_v38 = vunpack.c.l.b16 %v1151_v34 }
 0x2a6   : > { %v974_v52 = vpop.permute.xlu0 %973  ;;  %1283 = vmatpush.bf16.msra.mxu0 %v3453_v54  ;;  %1301 = vmatpush.bf16.msrb.mxu1 %v3457_v41 }
 0x2a7   : > { %v977_v47 = vrot.slane %v974_v52, 4  ;;  %v976_v53 = vpop.permute.xlu1 %975  ;;  %v1192_v41 = vpack.c.b16 %v1190_v38, %v1190_v38 }
 0x2a8   : > { %v978_v59 = vrot.slane %v976_v53, 4  ;;  %v1443_v53 = vld [vmem:[#allocation2 + $0xc] sm:$0xf] }
 0x2aa   : > { %v979_v0 = vsel %vm457_vm4, %v977_v47, %v978_v59  ;;  %1284 = vmatpush.bf16.msra.mxu0 %v3445_v60  ;;  %1302 = vmatpush.bf16.msrb.mxu1 %v3449_v39  ;;  %v3428_v12 = vld [vmem:[#allocation3 + $0x10] sm:$0xf]  ;;  %v3766_v13 = vld [vmem:[#allocation3 + $0x14] sm:$0xf]  ;;  %v4713_v60 = vpop.permute.xlu2 %1177 }
 0x2ab   : > { %v981_v2 = vsel %vm5715_vm14, %v974_v52, %v979_v0  ;;  %v3767_v7 = vld [vmem:[#allocation3 + $0x14] sm:$0xf0]  ;;  %v3430_v1 = vld [vmem:[#allocation3 + $0x18] sm:$0xf0]  ;;  %1374 = vrot.lane.b32.xlu2 %v4239_v36, %s4070_s26 }
 0x2ac   : > { %983 = vst [vmem:[#allocation3] sm:$0xff] %v981_v2  ;;  %v3429_v58 = vor.u32 %v3767_v7, %v3428_v12  ;;  %v3433_v20 = vor.u32 %v3766_v13, %v3430_v1  ;;  %v3763_v36 = vld [vmem:[%s5658_s5] sm:$0xff] }
 0x2ae   : > { %1285 = vmatpush.bf16.msra.mxu0 %v3437_v61  ;;  %1303 = vmatpush.bf16.msrb.mxu1 %v3441_v49  ;;  %v1673_v39 = vpop.permute.xlu0 %1672 }
 0x2af   : > { %v1707_v17 = vpop.permute.xlu1 %1706  ;;  %v1674_v63 = vrot.slane %v1673_v39, 4 }
 0x2b0   : > { %v1708_v6 = vrot.slane %v1707_v17, 4 }
 0x2b1   : > { %v1683_v2 = vunpack.c.l.b16 %v1674_v63  ;;  %v1684_v4 = vunpack.c.h.b16 %v1674_v63 }
 0x2b2   : > { %v4679_v21 = vsel %vm5716_vm11, %v1708_v6, %v1707_v17  ;;  %1286 = vmatpush.bf16.msra.mxu0 %v3429_v58  ;;  %1304 = vmatpush.bf16.msrb.mxu1 %v3433_v20  ;;  %v1717_v11 = vunpack.c.l.b16 %v1708_v6  ;;  %v1718_v25 = vunpack.c.h.b16 %v1708_v6  ;;  %v4715_v28 = vpop.permute.xlu2 %1182  ;;  %v2015_v6 = vld [vmem:[#allocation2 + $0x2c] sm:$0xf] }
 0x2b3   : > { %v3420_v26 = vld [vmem:[#allocation3] sm:$0xf]  ;;  %v3764_v27 = vld [vmem:[#allocation3 + $0x4] sm:$0xf]  ;;  %1754 = vrot.lane.b32.xlu2 %v4614_v40, %s4071_s22 }
 0x2b4   : > { %v3421_v32 = vor.u32 %v3765_v10, %v3420_v26  ;;  %v3425_v45 = vor.u32 %v3764_v27, %v3422_v22  ;;  %vm1721_vm1 = vcmp.ne.s32.totalorder %v1717_v11, %v4280_v50  ;;  %vm1722_vm9 = vcmp.ne.s32.totalorder %v1718_v25, %v4283_v51  ;;  %v1491_v22 = vld [vmem:[#allocation2 + $0xc] sm:$0xf] }
 0x2b5   : > { %vm1723_vm7 = vmpackc.low %vm1722_vm9, %vm1721_vm1  ;;  %vm5719_vm1 = vcmask 416768   ;;  %vm5722_vm9 = vcmask 367616  }
 0x2b6   : > { %1287 = vmatpush.bf16.msra.mxu0 %v3421_v32  ;;  %1305 = vmatpush.bf16.msrb.mxu1 %v3425_v45  ;;  %v1725_v24 = vsel %vm1723_vm7, %v1705_v31, 0  ;;  %vm5787_vm7 = vmmov %vm5786_vm13  ;;  %v4722_v9 = vpop.permute.xlu0 %1634 }
 0x2b7   : > { %v4686_v33 = vpop.permute.xlu1 %1172  ;;  %1730 = vrot.lane.b32.xlu0 %v1725_v24, %s4061_s18 }
 0x2b9   : > { %3474 = vmatmul.msk.bf16.vlgmr.msra.gmra.mxu0 %vm5785_vm15, %v3763_v36  ;;  %3476 = vmatmul.msk.bf16.vlgmr.msrb.gmra.mxu1 %vm5786_vm13, %v3763_v36  ;;  %v2001_v36 = vld [vmem:[#allocation2 + $0x2c] sm:$0xf] }
 0x2be   : > { %v4730_v58 = vpop.permute.xlu0 %1598 }
 0x2bf   : > { %v1493_v35 = vpop.permute.xlu1 %1492 }
 0x2c0   : > { %v1494_v37 = vrot.slane %v1493_v35, 4 }
 0x2c2   : > { %v4697_v54 = vsel %vm5719_vm1, %v1494_v37, %v1493_v35  ;;  %v1503_v1 = vunpack.c.l.b16 %v1494_v37  ;;  %v1504_v17 = vunpack.c.h.b16 %v1494_v37  ;;  %vm5721_vm1 = vcmask 859136   ;;  %v1967_v35 = vld [vmem:[#allocation2 + $0x2c] sm:$0xf] }
 0x2c7   : > { %v1445_v44 = vpop.permute.xlu1 %1444 }
 0x2c8   : > { %v1446_v48 = vrot.slane %v1445_v44, 4 }
 0x2c9   : > { %3475 = vmatmul.msk.bf16.gmra.mxu0 %vm5786_vm13, %v1192_v41  ;;  %3477 = vmatmul.msk.bf16.gmra.mxu1 %vm5787_vm7, %v1192_v41  ;;  %vm5788_vm13 = vmpackc.low %vm4309_vm12, %vm4304_vm8  ;;  %vm5718_vm7 = vcmask 39936   ;;  %vm1688_vm8 = vcmp.ne.s32.totalorder %v1684_v4, %v4283_v51 }
 0x2ca   : > { %v4702_v40 = vsel %vm5722_vm9, %v1446_v48, %v1445_v44  ;;  %v1455_v52 = vunpack.c.l.b16 %v1446_v48  ;;  %v1456_v47 = vunpack.c.h.b16 %v1446_v48  ;;  %v1429_v59 = vsel %vm5788_vm13, %v1427_v56, 0  ;;  %v1933_v44 = vld [vmem:[#allocation2 + $0x2c] sm:$0xf] }
 0x2cb   : > { %v4718_v0 = vsel %vm5718_vm7, %v1674_v63, %v1673_v39  ;;  %vm5720_vm7 = vcmask 56320   ;;  %vm5801_vm9 = vnez %v5761_v30 }
 0x2cc   : > { %vm1459_vm15 = vcmp.ne.s32.totalorder %v1455_v52, %v4280_v50  ;;  %vm1460_vm14 = vcmp.ne.s32.totalorder %v1456_v47, %v4283_v51  ;;  %v1477_v52 = vld [vmem:[#allocation2 + $0xc] sm:$0xf]  ;;  %v1448_v47 = vunpack.c.l.b16 %v4702_v40 }
 0x2cd   : > { %vm1461_vm11 = vmpackc.low %vm1460_vm14, %vm1459_vm15  ;;  %vm1687_vm14 = vcmp.ne.s32.totalorder %v1683_v2, %v4280_v50 }
 0x2ce   : > { %v1463_v55 = vsel %vm1461_vm11, %v1443_v53, 0  ;;  %vm1689_vm12 = vmpackc.low %vm1688_vm8, %vm1687_vm14  ;;  %vm5717_vm11 = vcmask 973824   ;;  %vm1507_vm8 = vcmp.ne.s32.totalorder %v1503_v1, %v4280_v50  ;;  %v1449_v53 = vunpack.c.h.b16 %v4702_v40 }
 0x2cf   : > { %1468 = vrot.lane.b32.xlu0 %v1463_v55, %s4070_s26  ;;  %v1691_v8 = vsel %vm1689_vm12, %v1671_v5, 0  ;;  %vm1508_vm12 = vcmp.ne.s32.totalorder %v1504_v17, %v4283_v51 }
 0x2d0   : > { %1696 = vrot.lane.b32.xlu1 %v1691_v8, %s4060_s12 }
 0x2d7   : > { %1434 = vrot.lane.b32.xlu0 %v1429_v59, %s4049_s24 }
 0x2ec   : > { %v2017_v61 = vpop.permute.xlu2 %2016  ;;  %v1969_v26 = vpop.permute.xlu0 %1968 }
 0x2ed   : > { %v2018_v49 = vrot.slane %v2017_v61, 4  ;;  %v1970_v31 = vrot.slane %v1969_v26, 4  ;;  %v4754_v55 = vpop.permute.xlu1 %1896 }
 0x2ee   : > { %v4937_v30 = vrot.slane %v4754_v55, 4 }
 0x2ef   : > { %v4726_v12 = vsel %vm5717_vm11, %v2018_v49, %v2017_v61  ;;  %v2027_v7 = vunpack.c.l.b16 %v2018_v49  ;;  %v2028_v13 = vunpack.c.h.b16 %v2018_v49  ;;  %vm1509_vm11 = vmpackc.low %vm1508_vm12, %vm1507_vm8  ;;  %v4742_v45 = vsel %vm5721_vm1, %v1970_v31, %v1969_v26 }
 0x2f0   : > { %v1511_v11 = vsel %vm1509_vm11, %v1491_v22, 0  ;;  %v1979_v24 = vunpack.c.l.b16 %v1970_v31  ;;  %v1980_v34 = vunpack.c.h.b16 %v1970_v31  ;;  %v1496_v22 = vunpack.c.l.b16 %v4697_v54 }
 0x2f1   : > { %vm2031_vm15 = vcmp.ne.s32.totalorder %v2027_v7, %v4280_v50  ;;  %vm2032_vm13 = vcmp.ne.s32.totalorder %v2028_v13, %v4283_v51 }
 0x2f2   : > { %vm2033_vm14 = vmpackc.low %vm2032_vm13, %vm2031_vm15  ;;  %vm1983_vm11 = vcmp.ne.s32.totalorder %v1979_v24, %v4280_v50  ;;  %vm1984_vm15 = vcmp.ne.s32.totalorder %v1980_v34, %v4283_v51 }
 0x2f3   : > { %v2035_v20 = vsel %vm2033_vm14, %v2015_v6, 0  ;;  %vm1985_vm13 = vmpackc.low %vm1984_vm15, %vm1983_vm11  ;;  %vm1452_vm11 = vcmp.ne.s32.totalorder %v1448_v47, %v4280_v50  ;;  %vm1453_vm15 = vcmp.ne.s32.totalorder %v1449_v53, %v4283_v51  ;;  %v4821_v53 = vrot.slane %v4722_v9, 4 }
 0x2f4   : > { %v4734_v10 = vpop.permute.xlu2 %1537  ;;  %2040 = vrot.lane.b32.xlu1 %v2035_v20, %s4068_s13  ;;  %v1987_v37 = vsel %vm1985_vm13, %v1967_v35, 0  ;;  %vm1454_vm13 = vmpackc.low %vm1453_vm15, %vm1452_vm11 }
 0x2f5   : > { %1992 = vrot.lane.b32.xlu2 %v1987_v37, %s4065_s10  ;;  %v1325_v8 = vpop.permute.xlu1 %1324 }
 0x2f6   : > { %v4765_v1 = vrot.slane %v1325_v8, 4 }
 0x2fc   : > { %v1935_v25 = vpop.permute.xlu2 %1934  ;;  %1516 = vrot.lane.b32.xlu1 %v1511_v11, %s4066_s25  ;;  %v1497_v11 = vunpack.c.h.b16 %v4697_v54 }
 0x2fd   : > { %v1936_v27 = vrot.slane %v1935_v25, 4  ;;  %1482 = vrot.lane.b32.xlu2 %v1477_v52, %s5790_s19 }
 0x2ff   : > { %v4739_v32 = vsel %vm5720_vm7, %v1936_v27, %v1935_v25  ;;  %v1945_v38 = vunpack.c.l.b16 %v1936_v27  ;;  %v1946_v41 = vunpack.c.h.b16 %v1936_v27 }
 0x300   : > { %v1938_v27 = vunpack.c.l.b16 %v4739_v32  ;;  %v1939_v31 = vunpack.c.h.b16 %v4739_v32 }
 0x301   : > { %vm1949_vm14 = vcmp.ne.s32.totalorder %v1945_v38, %v4280_v50  ;;  %vm1950_vm8 = vcmp.ne.s32.totalorder %v1946_v41, %v4283_v51 }
 0x302   : > { %vm1951_vm12 = vmpackc.low %vm1950_vm8, %vm1949_vm14  ;;  %vm1377_vm14 = vcmask 678912   ;;  %vm5723_vm8 = vcmask 629760   ;;  %vm4809_vm7 = vcmp.ne.s32.totalorder %v1939_v31, %v4283_v51 }
 0x303   : > { %v1953_v48 = vsel %vm1951_vm12, %v1933_v44, 0  ;;  %vm5792_vm12 = vmpackc.low %vm4406_vm6, %vm4401_vm5  ;;  %v1328_v54 = vsel %vm5723_vm8, %v4765_v1, %v1325_v8  ;;  %vm1500_vm5 = vcmp.ne.s32.totalorder %v1496_v22, %v4280_v50  ;;  %vm1501_vm6 = vcmp.ne.s32.totalorder %v1497_v11, %v4283_v51 }
 0x304   : > { %2006 = vrot.lane.b32.xlu1 %v2001_v36, %s4053_s20  ;;  %v1329_v38 = vunpack.c.l.b16 %v1328_v54  ;;  %v1330_v41 = vunpack.c.h.b16 %v1328_v54  ;;  %vm1502_vm1 = vmpackc.low %vm1501_vm6, %vm1500_vm5  ;;  %vm5802_vm8 = vnez %v5759_v29  ;;  %v1861_v36 = vpop.permute.xlu0 %1860 }
 0x305   : > { %v1375_v4 = vpop.permute.xlu2 %1374  ;;  %vm5803_vm3 = vmpackc.low %vm5801_vm9, %vm5802_vm8  ;;  %vm1637_vm9 = vcmask 1006592   ;;  %v4913_v15 = vrot.slane %v1861_v36, 4 }
 0x306   : > { %v1376_v5 = vrot.slane %v1375_v4, 4  ;;  %vm4842_vm8 = vcmp.ne.s32.totalorder %v1329_v38, %v4280_v50  ;;  %vm5815_vm6 = vmpackc.low %vm4475_vm10, %vm4470_vm0 }
 0x308   : > { %v1378_v61 = vsel %vm1377_vm14, %v1376_v5, %v1375_v4  ;;  %v1386_v35 = vunpack.c.l.b16 %v1376_v5  ;;  %v1387_v37 = vunpack.c.h.b16 %v1376_v5  ;;  %v1638_v5 = vsel %vm1637_vm9, %v4821_v53, %v4722_v9 }
 0x309   : > { %v1379_v17 = vunpack.c.l.b16 %v1378_v61  ;;  %v1380_v6 = vunpack.c.h.b16 %v1378_v61  ;;  %v1336_v61 = vunpack.c.l.b16 %v4765_v1 }
 0x30b   : > { %vm4785_vm11 = vcmp.ne.s32.totalorder %v1379_v17, %v4280_v50  ;;  %vm4790_vm15 = vcmp.ne.s32.totalorder %v1380_v6, %v4283_v51  ;;  %v4869_v6 = vrot.slane %v4730_v58, 4 }
 0x30c   : > { %1958 = vrot.lane.b32.xlu1 %v1953_v48, %s5789_s17 }
 0x336   : > { %v1289_v56 = vpop.f32.mrf.mxu0  ;;  %v1307_v59 = vpop.f32.mrf.mxu1 }
 0x337   : > { %v1290_v39 = vadd.f32 %v1289_v56, %v4686_v33  ;;  %v1308_v63 = vadd.f32 %v1307_v59, %v4686_v33  ;;  %v1711_v56 = vunpack.c.h.b16 %v4679_v21  ;;  %v1909_v59 = vunpack.c.h.b16 %v4937_v30 }
 0x339   : > { %v1316_v2 = vpack.c.bf16 %v1308_v63, %v1290_v39 }
 0x33b   : > { %1319 = vst [vmem:[#allocation2 + $0x4] sm:$0xff] %v1316_v2  ;;  %1480 = vrot.lane.b32.xlu1 %v1316_v2, %s5790_s19  ;;  %v1462_v40 = vsel %vm1454_vm13, %v1316_v2, 0  ;;  %vm1385_vm13 = vmpackc.low %vm4790_vm15, %vm4785_vm11  ;;  %v1510_v52 = vsel %vm1502_vm1, %v1316_v2, 0  ;;  %vm4827_vm11 = vcmp.ne.s32.totalorder %v1386_v35, %v4280_v50  ;;  %vm4832_vm1 = vcmp.ne.s32.totalorder %v1387_v37, %v4283_v51 }
 0x33c   : > { %1466 = vrot.lane.b32.xlu2 %v1462_v40, %s4070_s26  ;;  %1425 = vst [vmem:[#allocation3 + $0x20] sm:$0xff] %v1316_v2  ;;  %s5791_s26 = smov 48   ;;  %vm4847_vm15 = vcmp.ne.s32.totalorder %v1330_v41, %v4283_v51 }
 0x33d   : > { %vm1335_vm5 = vmpackc.low %vm4847_vm15, %vm4842_vm8 }
 0x33e   : > { %v1291_v33 = vpop.f32.mrf.mxu0  ;;  %v1309_v49 = vpop.f32.mrf.mxu1 }
 0x33f   : > { %v1292_v7 = vadd.f32 %v1291_v33, %v4713_v60  ;;  %v1310_v13 = vadd.f32 %v1309_v49, %v4713_v60  ;;  %v1428_v60 = vsel %vm5792_vm12, %v1316_v2, 0  ;;  %vm4804_vm12 = vcmp.ne.s32.totalorder %v1938_v27, %v4280_v50 }
 0x340   : > { %v1337_v33 = vunpack.c.h.b16 %v4765_v1  ;;  %v1639_v49 = vunpack.c.l.b16 %v1638_v5  ;;  %v2021_v1 = vunpack.c.h.b16 %v4726_v12 }
 0x341   : > { %v4767_v20 = vpack.c.bf16 %v1310_v13, %v1292_v7  ;;  %v1640_v7 = vunpack.c.h.b16 %v1638_v5  ;;  %v1646_v5 = vunpack.c.l.b16 %v4821_v53 }
 0x342   : > { %v1358_v25 = vld [vmem:[#allocation2] sm:$0xff]  ;;  %v1359_v26 = vld [vmem:[#allocation2 + $0x8] sm:$0xf] }
 0x343   : > { %1320 = vst [vmem:[#allocation2 + $0x14] sm:$0xff] %v4767_v20  ;;  %1362 = vrot.lane.b32.xlu0 %v1358_v25, %s5791_s26  ;;  %1364 = vrot.lane.b32.xlu1 %v1359_v26, %s5791_s26  ;;  %v1410_v47 = vsel %vm5803_vm3, %v1358_v25, 0  ;;  %v1393_v29 = vsel %vm1385_vm13, %v1358_v25, 0  ;;  %vm1944_vm3 = vmpackc.low %vm4809_vm7, %vm4804_vm12  ;;  %v1373_v40 = vld [vmem:[#allocation2 + $0x8] sm:$0xf]  ;;  %v1343_v17 = vsel %vm1335_vm5, %v1358_v25, 0  ;;  %vm4880_vm12 = vcmp.ne.s32.totalorder %v1336_v61, %v4280_v50 }
 0x344   : > { %1432 = vrot.lane.b32.xlu2 %v1428_v60, %s4049_s24  ;;  %1669 = vst [vmem:[#allocation3 + $0x68] sm:$0xff] %v4767_v20  ;;  %s5804_s24 = smov 3   ;;  %vm1392_vm7 = vmpackc.low %vm4832_vm1, %vm4827_vm11  ;;  %v1409_v8 = vld [vmem:[#allocation2 + $0x8] sm:$0xf]  ;;  %vm1601_vm13 = vcmask 433152   ;;  %vm4885_vm11 = vcmp.ne.s32.totalorder %v1337_v33, %v4283_v51  ;;  %vm1643_vm1 = vcmp.ne.s32.totalorder %v1639_v49, %v4280_v50  ;;  %v1676_v25 = vunpack.c.l.b16 %v4718_v0  ;;  %v1755_v33 = vpop.permute.xlu2 %1754 }
 0x345   : > { %v1394_v13 = vsel %vm1392_vm7, %v1373_v40, 0  ;;  %v1411_v9 = vsel %vm5815_vm6, %v1409_v8, 0  ;;  %v1602_v42 = vsel %vm1601_vm13, %v4869_v6, %v4730_v58  ;;  %v1323_v11 = vld [vmem:[#allocation2 + $0x8] sm:$0xf]  ;;  %vm1342_vm0 = vmpackc.low %vm4885_vm11, %vm4880_vm12  ;;  %v1677_v26 = vunpack.c.h.b16 %v4718_v0 }
 0x346   : > { %v1294_v14 = vpop.f32.mrf.mxu0  ;;  %v1312_v24 = vpop.f32.mrf.mxu1  ;;  %v1603_v60 = vunpack.c.l.b16 %v1602_v42  ;;  %v1604_v27 = vunpack.c.h.b16 %v1602_v42  ;;  %v1344_v58 = vsel %vm1342_vm0, %v1323_v11, 0  ;;  %vm1680_vm8 = vcmp.ne.s32.totalorder %v1676_v25, %v4280_v50 }
 0x347   : > { %v1295_v32 = vadd.f32 %v1294_v14, %v4715_v28  ;;  %v1313_v34 = vadd.f32 %v1312_v24, %v4715_v28  ;;  %vm1681_vm15 = vcmp.ne.s32.totalorder %v1677_v26, %v4283_v51  ;;  %v4911_v0 = vrot.slane %v4734_v10, 4 }
 0x348   : > { %vm1607_vm7 = vcmp.ne.s32.totalorder %v1603_v60, %v4280_v50  ;;  %vm1608_vm5 = vcmp.ne.s32.totalorder %v1604_v27, %v4283_v51  ;;  %vm1682_vm6 = vmpackc.low %vm1681_vm15, %vm1680_vm8  ;;  %vm1863_vm12 = vcmask 187392   ;;  %v1647_v40 = vunpack.c.h.b16 %v4821_v53  ;;  %v4982_v60 = vpop.permute.xlu1 %1696 }
 0x349   : > { %v4813_v28 = vpack.c.bf16 %v1313_v34, %v1295_v32  ;;  %vm1609_vm11 = vmpackc.low %vm1608_vm5, %vm1607_vm7  ;;  %v1549_v14 = vunpack.c.l.b16 %v4911_v0  ;;  %v1550_v24 = vunpack.c.h.b16 %v4911_v0  ;;  %v1972_v32 = vunpack.c.l.b16 %v4742_v45 }
 0x34a   : > { %v4894_v43 = vld [vmem:[#allocation2 + $0x10] sm:$0xff]  ;;  %v1572_v31 = vld [vmem:[#allocation2 + $0x18] sm:$0xf]  ;;  %v1973_v34 = vunpack.c.h.b16 %v4742_v45  ;;  %v1690_v35 = vsel %vm1682_vm6, %v4767_v20, 0  ;;  %v1864_v38 = vsel %vm1863_vm12, %v4913_v15, %v1861_v36  ;;  %v1610_v25 = vunpack.c.l.b16 %v4869_v6 }
 0x34b   : > { %1321 = vst [vmem:[#allocation2 + $0x24] sm:$0xff] %v4813_v28  ;;  %1514 = vrot.lane.b32.xlu0 %v1510_v52, %s4066_s25  ;;  %1414 = vrot.lane.b32.xlu1 %v1410_v47, %s5804_s24  ;;  %v4852_v63 = vsel %vm1944_vm3, %v4813_v28, 0  ;;  %vm1644_vm3 = vcmp.ne.s32.totalorder %v1640_v7, %v4283_v51  ;;  %s5820_s25 = smov 5   ;;  %v1617_v37 = vsel %vm1609_vm11, %v4894_v43, 0  ;;  %vm1976_vm0 = vcmp.ne.s32.totalorder %v1972_v32, %v4280_v50  ;;  %v1525_v45 = vld [vmem:[#allocation2 + $0x18] sm:$0xf] }
 0x34c   : > { %1397 = vrot.lane.b32.xlu2 %v1393_v29, %s5809_s21  ;;  %1931 = vst [vmem:[#allocation3 + $0xb0] sm:$0xff] %v4813_v28  ;;  %vm1645_vm10 = vmpackc.low %vm1644_vm3, %vm1643_vm1  ;;  %vm1553_vm1 = vcmp.ne.s32.totalorder %v1549_v14, %v4280_v50  ;;  %vm1554_vm3 = vcmp.ne.s32.totalorder %v1550_v24, %v4283_v51  ;;  %v1865_v41 = vunpack.c.l.b16 %v1864_v38  ;;  %v1866_v44 = vunpack.c.h.b16 %v1864_v38  ;;  %v1633_v53 = vld [vmem:[#allocation2 + $0x18] sm:$0xf] }
 0x34d   : > { %v1653_v54 = vsel %vm1645_vm10, %v4894_v43, 0  ;;  %vm1977_vm10 = vcmp.ne.s32.totalorder %v1973_v34, %v4283_v51  ;;  %vm1555_vm8 = vmpackc.low %vm1554_vm3, %vm1553_vm1  ;;  %v1710_v47 = vunpack.c.l.b16 %v4679_v21  ;;  %vm1715_vm1 = vcmp.ne.s32.totalorder %v1711_v56, %v4283_v51  ;;  %v1586_v32 = vld [vmem:[#allocation2 + $0x18] sm:$0xf] }
 0x34e   : > { %v1296_v2 = vpop.f32.mrf.mxu0  ;;  %v1314_v4 = vpop.f32.mrf.mxu1  ;;  %vm1978_vm15 = vmpackc.low %vm1977_vm10, %vm1976_vm0  ;;  %v1557_v48 = vsel %vm1555_vm8, %v1525_v45, 0  ;;  %vm1869_vm7 = vcmp.ne.s32.totalorder %v1865_v41, %v4280_v50  ;;  %vm1870_vm5 = vcmp.ne.s32.totalorder %v1866_v44, %v4283_v51  ;;  %v1908_v21 = vunpack.c.l.b16 %v4937_v30 }
 0x34f   : > { %v1986_v52 = vsel %vm1978_vm15, %v4813_v28, 0  ;;  %vm1871_vm6 = vmpackc.low %vm1870_vm5, %vm1869_vm7  ;;  %vm1714_vm11 = vcmp.ne.s32.totalorder %v1710_v47, %v4280_v50  ;;  %v4950_v2 = vpop.permute.xlu0 %1799  ;;  %vm1913_vm10 = vcmp.ne.s32.totalorder %v1909_v59, %v4283_v51  ;;  %vm1650_vm15 = vcmp.ne.s32.totalorder %v1646_v5, %v4280_v50 }
 0x350   : > { %vm1716_vm3 = vmpackc.low %vm1715_vm1, %vm1714_vm11  ;;  %v4959_v8 = vrot.slane %v4950_v2, 4  ;;  %vm4963_vm0 = vcmp.ne.s32.totalorder %v1908_v21, %v4280_v50  ;;  %vm1651_vm7 = vcmp.ne.s32.totalorder %v1647_v40, %v4283_v51  ;;  %vm5725_vm5 = vcmask 695296  }
 0x351   : > { %v1724_v4 = vsel %vm1716_vm3, %v4767_v20, 0  ;;  %vm1914_vm8 = vmpackc.low %vm1913_vm10, %vm4963_vm0  ;;  %v1611_v26 = vunpack.c.h.b16 %v4869_v6  ;;  %vm1540_vm3 = vcmask 351232   ;;  %vm2025_vm10 = vcmp.ne.s32.totalorder %v2021_v1, %v4283_v51 }
 0x352   : > { %v4943_v29 = vld [vmem:[#allocation2 + $0x20] sm:$0xff]  ;;  %v1895_v49 = vld [vmem:[#allocation2 + $0x28] sm:$0xf]  ;;  %v1811_v7 = vunpack.c.l.b16 %v4959_v8  ;;  %v1541_v36 = vsel %vm1540_vm3, %v4911_v0, %v4734_v10  ;;  %v1872_v21 = vunpack.c.l.b16 %v4913_v15  ;;  %v1873_v59 = vunpack.c.h.b16 %v4913_v15 }
 0x353   : > { %1399 = vrot.lane.b32.xlu0 %v1394_v13, %s5809_s21  ;;  %1347 = vrot.lane.b32.xlu1 %v1343_v17, %s5814_s23  ;;  %v1879_v39 = vsel %vm1871_vm6, %v4943_v29, 0  ;;  %v1812_v13 = vunpack.c.h.b16 %v4959_v8  ;;  %v4974_v17 = vrot.slane %v1755_v33, 4  ;;  %v1834_v22 = vld [vmem:[#allocation2 + $0x28] sm:$0xf]  ;;  %v1916_v42 = vsel %vm1914_vm8, %v1895_v49, 0  ;;  %vm1652_vm6 = vmpackc.low %vm1651_vm7, %vm1650_vm15 }
 0x354   : > { %1416 = vrot.lane.b32.xlu2 %v1411_v9, %s5804_s24  ;;  %s5821_s24 = smov 75   ;;  %v2020_v9 = vunpack.c.l.b16 %v4726_v12  ;;  %v1654_v11 = vsel %vm1652_vm6, %v1633_v53, 0  ;;  %vm4986_vm11 = vcmp.ne.s32.totalorder %v1811_v7, %v4280_v50  ;;  %v1787_v6 = vld [vmem:[#allocation2 + $0x28] sm:$0xf]  ;;  %vm5004_vm15 = vcmp.ne.s32.totalorder %v1610_v25, %v4280_v50  ;;  %v1753_v25 = vld [vmem:[#allocation2 + $0x1c] sm:$0xf] }
 0x355   : > { %vm4991_vm1 = vcmp.ne.s32.totalorder %v1812_v13, %v4283_v51  ;;  %vm5009_vm7 = vcmp.ne.s32.totalorder %v1611_v26, %v4283_v51  ;;  %v1542_v38 = vunpack.c.l.b16 %v1541_v36  ;;  %v1543_v45 = vunpack.c.h.b16 %v1541_v36  ;;  %v1848_v61 = vld [vmem:[#allocation2 + $0x28] sm:$0xf] }
 0x356   : > { %vm2024_vm0 = vcmp.ne.s32.totalorder %v2020_v9, %v4280_v50  ;;  %vm1817_vm8 = vmpackc.low %vm4991_vm1, %vm4986_vm11  ;;  %v1765_v53 = vunpack.c.l.b16 %v4974_v17  ;;  %v1766_v7 = vunpack.c.h.b16 %v4974_v17 }
 0x357   : > { %vm2026_vm6 = vmpackc.low %vm2025_vm10, %vm2024_vm0 }
 0x358   : > { %v2034_v34 = vsel %vm2026_vm6, %v4813_v28, 0  ;;  %vm1616_vm11 = vmpackc.low %vm5009_vm7, %vm5004_vm15  ;;  %vm1547_vm15 = vcmp.ne.s32.totalorder %v1543_v45, %v4283_v51  ;;  %vm1802_vm7 = vcmask 72704  }
 0x359   : > { %v1618_v10 = vsel %vm1616_vm11, %v1586_v32, 0 }
 0x35b   : > { %1577 = vrot.lane.b32.xlu0 %v1572_v31, %s5790_s19  ;;  %1657 = vrot.lane.b32.xlu1 %v1653_v54, %s5820_s25  ;;  %v1757_v31 = vsel %vm5725_vm5, %v4974_v17, %v1755_v33  ;;  %vm1899_vm5 = vcmask 990208   ;;  %v2079_v54 = vld [vmem:[%s5655_s2 + $0x58] sm:$0xff] }
 0x35c   : > { %1349 = vrot.lane.b32.xlu2 %v1344_v58, %s5814_s23  ;;  %v1758_v14 = vunpack.c.l.b16 %v1757_v31  ;;  %v1759_v24 = vunpack.c.h.b16 %v1757_v31  ;;  %s4073_s23 = smov 17   ;;  %v2078_v58 = vld [vmem:[%s5655_s2 + $0x50] sm:$0xff] }
 0x35e   : > { %vm1762_vm1 = vcmp.ne.s32.totalorder %v1758_v14, %v4280_v50  ;;  %vm1763_vm0 = vcmp.ne.s32.totalorder %v1759_v24, %v4283_v51 }
 0x35f   : > { %vm1764_vm10 = vmpackc.low %vm1763_vm0, %vm1762_vm1 }
 0x363   : > { %1694 = vrot.lane.b32.xlu0 %v1690_v35, %s4060_s12  ;;  %1621 = vrot.lane.b32.xlu1 %v1617_v37, %s5821_s24  ;;  %s5825_s12 = smov 112   ;;  %v1819_v35 = vsel %vm1817_vm8, %v1787_v6, 0  ;;  %v5021_v37 = vpop.permute.xlu2 %1992  ;;  %vm1546_vm8 = vcmp.ne.s32.totalorder %v1542_v38, %v4280_v50 }
 0x364   : > { %1575 = vrot.lane.b32.xlu2 %v4894_v43, %s5790_s19  ;;  %s5835_s19 = smov 119   ;;  %vm1548_vm6 = vmpackc.low %vm1547_vm15, %vm1546_vm8  ;;  %vm5068_vm15 = vcmp.ne.s32.totalorder %v1872_v21, %v4280_v50 }
 0x366   : > { %v5031_v0 = vpop.permute.xlu1 %2040 }
 0x36b   : > { %1562 = vrot.lane.b32.xlu0 %v1557_v48, %s4071_s22  ;;  %1990 = vrot.lane.b32.xlu1 %v1986_v52, %s4065_s10  ;;  %s5822_s10 = smov 105   ;;  %v5035_v48 = vpop.permute.xlu0 %1730  ;;  %v1772_v52 = vsel %vm1764_vm10, %v4767_v20, 0  ;;  %v5045_v47 = vpop.permute.xlu2 %1482 }
 0x36c   : > { %1742 = vrot.lane.b32.xlu2 %v4767_v20, %s5791_s26  ;;  %v1803_v20 = vsel %vm1802_vm7, %v4959_v8, %v4950_v2  ;;  %v1485_v14 = vrot.slane %v5045_v47, 4 }
 0x36e   : > { %v5050_v56 = vpop.permute.xlu1 %1516 }
 0x373   : > { %2004 = vrot.lane.b32.xlu0 %v4813_v28, %s4053_s20  ;;  %1883 = vrot.lane.b32.xlu1 %v1879_v39, %s5822_s10  ;;  %v1900_v28 = vsel %vm1899_vm5, %v4937_v30, %v4754_v55  ;;  %v1556_v55 = vsel %vm1548_vm6, %v4894_v43, 0  ;;  %v1805_v30 = vunpack.c.h.b16 %v1803_v20  ;;  %v2080_v43 = vld [vmem:[%s5655_s2 + $0x60] sm:$0xff]  ;;  %v1469_v39 = vpop.permute.xlu0 %1468  ;;  %vm1877_vm6 = vcmp.ne.s32.totalorder %v1873_v59, %v4283_v51 }
 0x374   : > { %1728 = vrot.lane.b32.xlu2 %v1724_v4, %s4061_s18  ;;  %s5826_s18 = smov 7   ;;  %v1901_v41 = vunpack.c.l.b16 %v1900_v28  ;;  %v1902_v44 = vunpack.c.h.b16 %v1900_v28  ;;  %v1471_v5 = vrot.slane %v1469_v39, 4 }
 0x375   : > { %vm1809_vm8 = vcmp.ne.s32.totalorder %v1805_v30, %v4283_v51 }
 0x376   : > { %vm1905_vm11 = vcmp.ne.s32.totalorder %v1901_v41, %v4280_v50  ;;  %vm1906_vm1 = vcmp.ne.s32.totalorder %v1902_v44, %v4283_v51  ;;  %v5078_v49 = vpop.permute.xlu1 %2006 }
 0x377   : > { %vm1907_vm0 = vmpackc.low %vm1906_vm1, %vm1905_vm11 }
 0x378   : > { %v1915_v4 = vsel %vm1907_vm0, %v4943_v29, 0  ;;  %vm1878_vm1 = vmpackc.low %vm1877_vm6, %vm5068_vm15  ;;  %vm1769_vm0 = vcmp.ne.s32.totalorder %v1765_v53, %v4280_v50  ;;  %vm5842_vm15 = vcmask 654336   ;;  %vm5843_vm6 = vcmask 392192  }
 0x379   : > { %v1880_v1 = vsel %vm1878_vm1, %v1848_v61, 0  ;;  %vm5845_vm1 = vcmask 23552  }
 0x37b   : > { %1839 = vrot.lane.b32.xlu0 %v1834_v22, %s5825_s12  ;;  %1921 = vrot.lane.b32.xlu1 %v1916_v42, %s5826_s18  ;;  %v1435_v22 = vpop.permute.xlu0 %1434 }
 0x37c   : > { %1659 = vrot.lane.b32.xlu2 %v1654_v11, %s5820_s25  ;;  %v1437_v42 = vrot.slane %v1435_v22, 4  ;;  %v1739_v11 = vld [vmem:[#allocation2 + $0x1c] sm:$0xf] }
 0x37e   : > { %v5093_v31 = vpop.permute.xlu1 %1958 }
 0x383   : > { %2038 = vrot.lane.b32.xlu0 %v2034_v34, %s4068_s13  ;;  %1824 = vrot.lane.b32.xlu1 %v1819_v35, %s5835_s19  ;;  %s5836_s13 = smov 43   ;;  %v321_v34 = vld [vmem:[%s5655_s2] sm:$0xff] }
 0x384   : > { %1623 = vrot.lane.b32.xlu2 %v1618_v10, %s5821_s24 }
 0x38b   : > { %1956 = vrot.lane.b32.xlu0 %v4852_v63, %s5789_s17  ;;  %1776 = vrot.lane.b32.xlu1 %v1772_v52, %s5836_s13  ;;  %v1804_v63 = vunpack.c.l.b16 %v1803_v20  ;;  %s4075_s17 = smov 111  }
 0x38c   : > { %1560 = vrot.lane.b32.xlu2 %v1556_v55, %s4071_s22  ;;  %s4072_s22 = smov 15  }
 0x38d   : > { %vm5060_vm10 = vcmp.ne.s32.totalorder %v1804_v63, %v4280_v50  ;;  %v1519_v63 = vrot.slane %v5050_v56, 4 }
 0x38e   : > { %vm1810_vm11 = vmpackc.low %vm1809_vm8, %vm5060_vm10  ;;  %vm1770_vm10 = vcmp.ne.s32.totalorder %v1766_v7, %v4283_v51  ;;  %vm5841_vm8 = vcmask 1022976  }
 0x38f   : > { %v1818_v13 = vsel %vm1810_vm11, %v4943_v29, 0  ;;  %vm5844_vm11 = vcmask 629760  }
 0x393   : > { %1919 = vrot.lane.b32.xlu0 %v1915_v4, %s5826_s18  ;;  %2093 = vperm.xlu1 %3927, %v2080_v43   ;;  %s5873_s18 = smov 127  }
 0x394   : > { %1837 = vrot.lane.b32.xlu2 %v4943_v29, %s5825_s12 }
 0x396   : > { %v1467_v40 = vpop.permute.xlu2 %1466 }
 0x397   : > { %v1470_v8 = vrot.slane %v1467_v40, 4 }
 0x399   : > { %v1472_v33 = vsel %vm457_vm4, %v1470_v8, %v1471_v5 }
 0x39a   : > { %v1473_v9 = vsel %vm1377_vm14, %v1467_v40, %v1472_v33  ;;  %vm1771_vm14 = vmpackc.low %vm1770_vm10, %vm1769_vm0  ;;  %vm5846_vm0 = vcmask 367616   ;;  %vm5847_vm10 = vcmask 416768  }
 0x39b   : > { %1822 = vrot.lane.b32.xlu0 %v1818_v13, %s5835_s19  ;;  %1475 = vst [vmem:[#allocation3 + $0x30] sm:$0xff] %v1473_v9  ;;  %2707 = vrot.lane.b32.xlu1 %v4216_v23, %s4072_s22  ;;  %v1773_v27 = vsel %vm1771_vm14, %v1753_v25, 0  ;;  %vm5848_vm14 = vmmov %vm5842_vm15  ;;  %s3842_s19 = sshll.u32 %s4142_s9, 4 }
 0x39c   : > { %1885 = vrot.lane.b32.xlu2 %v1880_v1, %s5822_s10  ;;  %s5865_s10 = smov 1  }
 0x39e   : > { %v1433_v17 = vpop.permute.xlu2 %1432 }
 0x39f   : > { %v1436_v29 = vrot.slane %v1433_v17, 4 }
 0x3a1   : > { %v1438_v26 = vsel %vm457_vm4, %v1436_v29, %v1437_v42  ;;  %v1733_v29 = vrot.slane %v5035_v48, 4 }
 0x3a2   : > { %v1439_v12 = vsel %vm5841_vm8, %v1433_v17, %v1438_v26  ;;  %vm5849_vm8 = vcmask 39936  }
 0x3a3   : > { %1744 = vrot.lane.b32.xlu0 %v1739_v11, %s5791_s26  ;;  %1441 = vst [vmem:[#allocation3 + $0x28] sm:$0xff] %v1439_v12  ;;  %2845 = vrot.lane.b32.xlu1 %v4203_v19, %s4073_s23  ;;  %s296_s26 = sand.u32 1, %s4033_s28  }
 0x3a4   : > { %1778 = vrot.lane.b32.xlu2 %v1773_v27, %s5836_s13  ;;  %s4074_s13 = smov 113   ;;  %s3335_s21 = sshll.u32 %s296_s26, 4 }
 0x3a5   : > { %s3256_s9 = scalar_lea.sflag [#allocation5], %s296_s26 }
 0x3a6   : > { %v1398_v6 = vpop.permute.xlu2 %1397 }
 0x3a7   : > { %v1401_v15 = vrot.slane %v1398_v6, 4 }
 0x3ab   : > { %2088 = vperm.xlu0 %3915, %v2079_v54  }
 0x3ac   : > { %2083 = vperm.xlu2 %3916, %v2078_v58   ;;  %v1699_v58 = vrot.slane %v4982_v60, 4 }
 0x3ad   : > { %v1481_v36 = vpop.permute.xlu1 %1480 }
 0x3ae   : > { %v1484_v24 = vrot.slane %v1481_v36, 4  ;;  %v1417_v32 = vpop.permute.xlu2 %1416 }
 0x3af   : > { %v1419_v30 = vrot.slane %v1417_v32, 4 }
 0x3b0   : > { %v1486_v35 = vsel %vm457_vm4, %v1484_v24, %v1485_v14 }
 0x3b1   : > { %v1487_v38 = vsel %vm5842_vm15, %v1481_v36, %v1486_v35  ;;  %vm5853_vm15 = vcmask 916480  }
 0x3b2   : > { %1489 = vst [vmem:[#allocation3 + $0x38] sm:$0xff] %v1487_v38 }
 0x3b3   : > { %327 = vperm.xlu0 %3915, %v321_v34  }
 0x3b4   : > { %2487 = vrot.lane.b32.xlu2 %v4203_v19, %s4074_s13 }
 0x3b5   : > { %v1363_v45 = vpop.permute.xlu0 %1362  ;;  %v1365_v10 = vpop.permute.xlu1 %1364 }
 0x3b6   : > { %v1366_v28 = vrot.slane %v1363_v45, 4  ;;  %v1367_v41 = vrot.slane %v1365_v10, 4  ;;  %v1350_v44 = vpop.permute.xlu2 %1349 }
 0x3b7   : > { %v1352_v40 = vrot.slane %v1350_v44, 4 }
 0x3b8   : > { %v1368_v52 = vsel %vm457_vm4, %v1366_v28, %v1367_v41  ;;  %v1995_v28 = vrot.slane %v5021_v37, 4 }
 0x3b9   : > { %v1369_v55 = vsel %vm5843_vm6, %v1363_v45, %v1368_v52  ;;  %vm5854_vm6 = vcmask 859136  }
 0x3ba   : > { %1371 = vst [vmem:[#allocation3 + $0x8] sm:$0xff] %v1369_v55 }
 0x3bb   : > { %2347 = vrot.lane.b32.xlu0 %v4216_v23, %s4075_s17 }
 0x3bd   : > { %v1515_v47 = vpop.permute.xlu0 %1514  ;;  %v1415_v20 = vpop.permute.xlu1 %1414 }
 0x3be   : > { %v1518_v19 = vrot.slane %v1515_v47, 4  ;;  %v1418_v43 = vrot.slane %v1415_v20, 4  ;;  %v1576_v21 = vpop.permute.xlu2 %1575 }
 0x3bf   : > { %v1579_v22 = vrot.slane %v1576_v21, 4 }
 0x3c0   : > { %v1520_v59 = vsel %vm457_vm4, %v1518_v19, %v1519_v63  ;;  %v1420_v39 = vsel %vm457_vm4, %v1418_v43, %v1419_v30 }
 0x3c1   : > { %v1521_v4 = vsel %vm5844_vm11, %v1515_v47, %v1520_v59  ;;  %v1421_v2 = vsel %vm5845_vm1, %v1415_v20, %v1420_v39 }
 0x3c2   : > { %1523 = vst [vmem:[#allocation3 + $0x40] sm:$0xff] %v1521_v4 }
 0x3c3   : > { %1423 = vst [vmem:[#allocation3 + $0x18] sm:$0xff] %v1421_v2 }
 0x3c5   : > { %v1400_v5 = vpop.permute.xlu0 %1399  ;;  %v1348_v23 = vpop.permute.xlu1 %1347 }
 0x3c6   : > { %v1402_v8 = vrot.slane %v1400_v5, 4  ;;  %v1351_v56 = vrot.slane %v1348_v23, 4  ;;  %v5121_v61 = vpop.permute.xlu2 %1742 }
 0x3c8   : > { %v1403_v33 = vsel %vm457_vm4, %v1401_v15, %v1402_v8  ;;  %v1353_v53 = vsel %vm457_vm4, %v1351_v56, %v1352_v40  ;;  %v3538_v15 = vld [vmem:[#allocation3 + $0x68] sm:$0xf0]  ;;  %v2009_v40 = vrot.slane %v5078_v49, 4 }
 0x3c9   : > { %v1405_v7 = vsel %vm5846_vm0, %v1398_v6, %v1403_v33  ;;  %v1355_v13 = vsel %vm5847_vm10, %v1348_v23, %v1353_v53  ;;  %v3793_v23 = vld [vmem:[#allocation3 + $0x64] sm:$0xf0]  ;;  %vm5859_vm0 = vcmask 392192   ;;  %vm2246_vm10 = vcmask 719872  }
 0x3ca   : > { %1407 = vst [vmem:[#allocation3 + $0x10] sm:$0xff] %v1405_v7 }
 0x3cb   : > { %1357 = vst [vmem:[#allocation3] sm:$0xff] %v1355_v13 }
 0x3cd   : > { %v1578_v9 = vpop.permute.xlu0 %1577  ;;  %v1658_v1 = vpop.permute.xlu1 %1657 }
 0x3ce   : > { %v1580_v17 = vrot.slane %v1578_v9, 4  ;;  %v1729_v42 = vpop.permute.xlu2 %1728  ;;  %v1661_v24 = vrot.slane %v1658_v1, 4 }
 0x3cf   : > { %v1732_v11 = vrot.slane %v1729_v42, 4 }
 0x3d0   : > { %v1581_v25 = vsel %vm457_vm4, %v1579_v22, %v1580_v17 }
 0x3d1   : > { %v1582_v26 = vsel %vm5848_vm14, %v1576_v21, %v1581_v25  ;;  %v1734_v12 = vsel %vm457_vm4, %v1732_v11, %v1733_v29  ;;  %v2786_v29 = vld [vmem:[#allocation2 + $0x2c] sm:$0xf]  ;;  %vm2490_vm14 = vcmask 924672  }
 0x3d2   : > { %1584 = vst [vmem:[#allocation3 + $0x50] sm:$0xff] %v1582_v26  ;;  %v1735_v27 = vsel %vm1601_vm13, %v1729_v42, %v1734_v12  ;;  %vm5851_vm13 = vcmask 130048  }
 0x3d3   : > { %1737 = vst [vmem:[#allocation3 + $0x78] sm:$0xff] %v1735_v27  ;;  %v2788_v27 = vld [vmem:[#allocation2 + $0x3c] sm:$0xf] }
 0x3d5   : > { %v1695_v6 = vpop.permute.xlu0 %1694  ;;  %v1622_v54 = vpop.permute.xlu1 %1621 }
 0x3d6   : > { %v1698_v36 = vrot.slane %v1695_v6, 4  ;;  %v1660_v14 = vpop.permute.xlu2 %1659  ;;  %v1625_v44 = vrot.slane %v1622_v54, 4 }
 0x3d7   : > { %v1662_v32 = vrot.slane %v1660_v14, 4 }
 0x3d8   : > { %v1700_v48 = vsel %vm457_vm4, %v1698_v36, %v1699_v58 }
 0x3d9   : > { %v1701_v34 = vsel %vm1637_vm9, %v1695_v6, %v1700_v48  ;;  %v1663_v35 = vsel %vm457_vm4, %v1661_v24, %v1662_v32  ;;  %vm5850_vm9 = vcmask 613376   ;;  %v3528_v17 = vld [vmem:[#allocation3 + $0x50] sm:$0xf]  ;;  %v3790_v42 = vld [vmem:[#allocation3 + $0x54] sm:$0xf]  ;;  %v3938_v6 = vpack.i.bf16 %v2788_v27, %v2786_v29 }
 0x3da   : > { %1703 = vst [vmem:[#allocation3 + $0x70] sm:$0xff] %v1701_v34  ;;  %v1665_v38 = vsel %vm5849_vm8, %v1658_v1, %v1663_v35  ;;  %v3795_v47 = vld [vmem:[#allocation3 + $0x74] sm:$0xf0]  ;;  %v3546_v19 = vld [vmem:[#allocation3 + $0x78] sm:$0xf0]  ;;  %vm2547_vm8 = vcmask 121856  }
 0x3db   : > { %1667 = vst [vmem:[#allocation3 + $0x60] sm:$0xff] %v1665_v38  ;;  %3939 = vrot.lane.b32.xlu0 %v3938_v6, %s5825_s12  ;;  %v3520_v48 = vld [vmem:[#allocation3 + $0x40] sm:$0xf]  ;;  %v3788_v34 = vld [vmem:[#allocation3 + $0x44] sm:$0xf] }
 0x3dc   : > { %v2782_v35 = vld [vmem:[#allocation2 + $0xc] sm:$0xf]  ;;  %v3782_v29 = vld [vmem:[#allocation3 + $0x14] sm:$0xf] }
 0x3dd   : > { %v1563_v45 = vpop.permute.xlu0 %1562  ;;  %v1991_v10 = vpop.permute.xlu1 %1990 }
 0x3de   : > { %v1994_v41 = vrot.slane %v1991_v10, 4  ;;  %v1624_v60 = vpop.permute.xlu2 %1623  ;;  %v1565_v7 = vrot.slane %v1563_v45, 4 }
 0x3df   : > { %v1626_v52 = vrot.slane %v1624_v60, 4 }
 0x3e0   : > { %v1996_v55 = vsel %vm457_vm4, %v1994_v41, %v1995_v28  ;;  %v2784_v28 = vld [vmem:[#allocation2 + $0x1c] sm:$0xf] }
 0x3e1   : > { %v1997_v20 = vsel %vm1863_vm12, %v1991_v10, %v1996_v55  ;;  %v3544_v63 = vld [vmem:[#allocation3 + $0x70] sm:$0xf]  ;;  %v3794_v30 = vld [vmem:[#allocation3 + $0x74] sm:$0xf]  ;;  %v1627_v43 = vsel %vm457_vm4, %v1625_v44, %v1626_v52  ;;  %vm5852_vm12 = vcmask 695296   ;;  %v3943_v44 = vpack.i.bf16 %v2784_v28, %v2782_v35 }
 0x3e2   : > { %1999 = vst [vmem:[#allocation3 + $0xc0] sm:$0xff] %v1997_v20  ;;  %v3545_v21 = vor.u32 %v3795_v47, %v3544_v63  ;;  %v3549_v59 = vor.u32 %v3794_v30, %v3546_v19  ;;  %v1629_v39 = vsel %vm5850_vm9, %v1622_v54, %v1627_v43  ;;  %v3536_v37 = vld [vmem:[#allocation3 + $0x60] sm:$0xf]  ;;  %v3792_v4 = vld [vmem:[#allocation3 + $0x64] sm:$0xf]  ;;  %v2043_v63 = vrot.slane %v5031_v0, 4 }
 0x3e3   : > { %1631 = vst [vmem:[#allocation3 + $0x58] sm:$0xff] %v1629_v39  ;;  %v3537_v56 = vor.u32 %v3793_v23, %v3536_v37  ;;  %v3541_v33 = vor.u32 %v3792_v4, %v3538_v15  ;;  %v3787_v52 = vld [vmem:[#allocation3 + $0x34] sm:$0xf0]  ;;  %v3514_v55 = vld [vmem:[#allocation3 + $0x38] sm:$0xf0]  ;;  %3944 = vrot.lane.b32.xlu0 %v3943_v44, %s5825_s12  ;;  %vm2350_vm9 = vcmask 908288  }
 0x3e4   : > { %2259 = vmatpush.bf16.msra.mxu2 %v3545_v21  ;;  %2295 = vmatpush.bf16.msrb.mxu0 %v3549_v59  ;;  %v3512_v43 = vld [vmem:[#allocation3 + $0x30] sm:$0xf]  ;;  %v3786_v21 = vld [vmem:[#allocation3 + $0x34] sm:$0xf]  ;;  %v3785_v23 = vld [vmem:[#allocation3 + $0x24] sm:$0xf0] }
 0x3e5   : > { %v2005_v2 = vpop.permute.xlu0 %2004  ;;  %v5142_v5 = vpop.permute.xlu1 %1883  ;;  %v3513_v37 = vor.u32 %v3787_v52, %v3512_v43  ;;  %v3517_v4 = vor.u32 %v3786_v21, %v3514_v55  ;;  %v3506_v15 = vld [vmem:[#allocation3 + $0x28] sm:$0xf0]  ;;  %v3480_v44 = vld [vmem:[%s5659_s6] sm:$0xf]  ;;  %v3779_v52 = vld [vmem:[%s5659_s6 + $0x4] sm:$0xf0] }
 0x3e6   : > { %v2008_v8 = vrot.slane %v2005_v2, 4  ;;  %v1561_v53 = vpop.permute.xlu2 %1560  ;;  %v1887_v59 = vrot.slane %v5142_v5, 4  ;;  %v3481_v43 = vor.u32 %v3779_v52, %v3480_v44 }
 0x3e7   : > { %v1564_v13 = vrot.slane %v1561_v53, 4 }
 0x3e8   : > { %v2010_v9 = vsel %vm457_vm4, %v2008_v8, %v2009_v40  ;;  %2260 = vmatpush.bf16.msra.mxu2 %v3537_v56  ;;  %2296 = vmatpush.bf16.msrb.mxu0 %v3541_v33  ;;  %v3504_v56 = vld [vmem:[#allocation3 + $0x20] sm:$0xf]  ;;  %v3784_v33 = vld [vmem:[#allocation3 + $0x24] sm:$0xf] }
 0x3e9   : > { %v2011_v1 = vsel %vm5851_vm13, %v2005_v2, %v2010_v9  ;;  %v1566_v22 = vsel %vm457_vm4, %v1564_v13, %v1565_v7  ;;  %v3505_v13 = vor.u32 %v3785_v23, %v3504_v56  ;;  %v3509_v9 = vor.u32 %v3784_v33, %v3506_v15 }
 0x3ea   : > { %2013 = vst [vmem:[#allocation3 + $0xc8] sm:$0xff] %v2011_v1  ;;  %v1568_v49 = vsel %vm5852_vm12, %v1561_v53, %v1566_v22  ;;  %v3791_v11 = vld [vmem:[#allocation3 + $0x54] sm:$0xf0]  ;;  %v3530_v25 = vld [vmem:[#allocation3 + $0x58] sm:$0xf0]  ;;  %v1961_v1 = vrot.slane %v5093_v31, 4 }
 0x3eb   : > { %1570 = vst [vmem:[#allocation3 + $0x48] sm:$0xff] %v1568_v49  ;;  %v3529_v26 = vor.u32 %v3791_v11, %v3528_v17  ;;  %v3533_v12 = vor.u32 %v3790_v42, %v3530_v25  ;;  %v3496_v42 = vld [vmem:[#allocation3 + $0x10] sm:$0xf]  ;;  %v3783_v25 = vld [vmem:[#allocation3 + $0x14] sm:$0xf0] }
 0x3ed   : > { %v1840_v54 = vpop.permute.xlu0 %1839  ;;  %v5149_v58 = vpop.permute.xlu1 %1921  ;;  %2261 = vmatpush.bf16.msra.mxu2 %v3529_v26  ;;  %2297 = vmatpush.bf16.msrb.mxu0 %v3533_v12  ;;  %v3498_v26 = vld [vmem:[#allocation3 + $0x18] sm:$0xf0] }
 0x3ee   : > { %v1842_v36 = vrot.slane %v1840_v54, 4  ;;  %v1838_v14 = vpop.permute.xlu2 %1837 }
 0x3ef   : > { %v1841_v24 = vrot.slane %v1838_v14, 4 }
 0x3f1   : > { %v1843_v32 = vsel %vm457_vm4, %v1841_v24, %v1842_v36  ;;  %v3497_v24 = vor.u32 %v3783_v25, %v3496_v42 }
 0x3f2   : > { %v1844_v38 = vsel %vm5853_vm15, %v1838_v14, %v1843_v32  ;;  %v3789_v45 = vld [vmem:[#allocation3 + $0x44] sm:$0xf0]  ;;  %v3522_v10 = vld [vmem:[#allocation3 + $0x48] sm:$0xf0]  ;;  %v3501_v32 = vor.u32 %v3782_v29, %v3498_v26  ;;  %vm5864_vm15 = vnez %v5751_v62 }
 0x3f3   : > { %1846 = vst [vmem:[#allocation3 + $0x98] sm:$0xff] %v1844_v38  ;;  %v3521_v41 = vor.u32 %v3789_v45, %v3520_v48  ;;  %v3525_v60 = vor.u32 %v3788_v34, %v3522_v10  ;;  %v3586_v14 = vld [vmem:[#allocation3 + $0xc8] sm:$0xf0]  ;;  %v3584_v48 = vld [vmem:[#allocation3 + $0xc0] sm:$0xf] }
 0x3f4   : > { %v3804_v38 = vld [vmem:[#allocation3 + $0xc4] sm:$0xf]  ;;  %v3488_v45 = vld [vmem:[#allocation3] sm:$0xf] }
 0x3f5   : > { %v2039_v47 = vpop.permute.xlu0 %2038  ;;  %v5154_v20 = vpop.permute.xlu1 %1824  ;;  %2262 = vmatpush.bf16.msra.mxu2 %v3521_v41  ;;  %2298 = vmatpush.bf16.msrb.mxu0 %v3525_v60  ;;  %v3780_v10 = vld [vmem:[#allocation3 + $0x4] sm:$0xf]  ;;  %v3589_v60 = vor.u32 %v3804_v38, %v3586_v14 }
 0x3f6   : > { %v2042_v30 = vrot.slane %v2039_v47, 4  ;;  %v1886_v19 = vpop.permute.xlu2 %1885 }
 0x3f7   : > { %v1888_v39 = vrot.slane %v1886_v19, 4 }
 0x3f8   : > { %v2044_v2 = vsel %vm457_vm4, %v2042_v30, %v2043_v63  ;;  %v3490_v63 = vld [vmem:[#allocation3 + $0x8] sm:$0xf0] }
 0x3f9   : > { %v2045_v40 = vsel %vm1802_vm7, %v2039_v47, %v2044_v2  ;;  %v1889_v8 = vsel %vm457_vm4, %v1887_v59, %v1888_v39  ;;  %2263 = vmatpush.bf16.msra.mxu2 %v3513_v37  ;;  %2299 = vmatpush.bf16.msrb.mxu0 %v3517_v4  ;;  %v3781_v47 = vld [vmem:[#allocation3 + $0x4] sm:$0xf0]  ;;  %v3493_v19 = vor.u32 %v3780_v10, %v3490_v63  ;;  %v1924_v39 = vrot.slane %v5149_v58, 4  ;;  %v3576_v2 = vld [vmem:[#allocation3 + $0xb0] sm:$0xf] }
 0x3fa   : > { %v1891_v0 = vsel %vm5854_vm6, %v5142_v5, %v1889_v8  ;;  %v2190_v53 = vunpack.c.l.b16 %v2045_v40  ;;  %v2191_v7 = vunpack.c.h.b16 %v2045_v40  ;;  %v3805_v5 = vld [vmem:[#allocation3 + $0xc4] sm:$0xf0]  ;;  %v3489_v30 = vor.u32 %v3781_v47, %v3488_v45  ;;  %v3802_v40 = vld [vmem:[#allocation3 + $0xb4] sm:$0xf]  ;;  %v3778_v47 = vld [vmem:[%s5659_s6 + $0x4] sm:$0xf] }
 0x3fb   : > { %1893 = vst [vmem:[#allocation3 + $0xa0] sm:$0xff] %v1891_v0  ;;  %v3585_v35 = vor.u32 %v3805_v5, %v3584_v48  ;;  %v5185_v58 = vld [vmem:[%s5659_s6 + $0x10] sm:$0xff] }
 0x3fc   : > { %v2218_v22 = vpack.c.b16 %v2190_v53, %v2190_v53  ;;  %v2219_v17 = vpack.c.b16 %v2191_v7, %v2191_v7  ;;  %v1827_v7 = vrot.slane %v5154_v20, 4  ;;  %v2103_v42 = vunpack.c.l.b16 %v5185_v58  ;;  %v2706_v20 = vld [vmem:[#allocation2 + $0x3c] sm:$0xf] }
 0x3fd   : > { %v1957_v49 = vpop.permute.xlu0 %1956  ;;  %v1777_v11 = vpop.permute.xlu1 %1776  ;;  %2264 = vmatpush.bf16.msra.mxu2 %v3505_v13  ;;  %2300 = vmatpush.bf16.msrb.mxu0 %v3509_v9 }
 0x3fe   : > { %v1960_v12 = vrot.slane %v1957_v49, 4  ;;  %v1780_v27 = vrot.slane %v1777_v11, 4  ;;  %v1779_v6 = vpop.permute.xlu2 %1778  ;;  %v2254_v54 = vsel %vm457_vm4, %v2218_v22, 0  ;;  %v2257_v36 = vsel %vm457_vm4, %v2219_v17, 0 }
 0x3ff   : > { %v1781_v31 = vrot.slane %v1779_v6, 4  ;;  %2279 = vmatpush.bf16.msrb.mxu3 %v2254_v54  ;;  %2315 = vmatpush.bf16.msra.mxu1 %v2257_v36  ;;  %v2107_v54 = vpack.c.b16 %v2103_v42, %v2103_v42  ;;  %v2104_v42 = vunpack.c.h.b16 %v5185_v58  ;;  %v2640_v6 = vld [vmem:[#allocation2 + $0x2c] sm:$0xf] }
 0x400   : > { %v1962_v34 = vsel %vm457_vm4, %v1960_v12, %v1961_v1 }
 0x401   : > { %v1963_v28 = vsel %vm1899_vm5, %v1957_v49, %v1962_v34  ;;  %v1782_v41 = vsel %vm457_vm4, %v1780_v27, %v1781_v31  ;;  %2265 = vmatpush.bf16.msra.mxu2 %v3497_v24  ;;  %2301 = vmatpush.bf16.msrb.mxu0 %v3501_v32  ;;  %vm5855_vm5 = vcmask 56320   ;;  %v1746_v32 = vrot.slane %v5121_v61, 4 }
 0x402   : > { %1965 = vst [vmem:[#allocation3 + $0xb8] sm:$0xff] %v1963_v28  ;;  %v1783_v55 = vsel %vm1540_vm3, %v1777_v11, %v1782_v41  ;;  %v3568_v22 = vld [vmem:[#allocation3 + $0xa0] sm:$0xf]  ;;  %v3800_v17 = vld [vmem:[#allocation3 + $0xa4] sm:$0xf]  ;;  %vm5856_vm3 = vcmask 973824  }
 0x403   : > { %1785 = vst [vmem:[#allocation3 + $0x88] sm:$0xff] %v1783_v55  ;;  %2280 = vmatpush.bf16.msrb.mxu3 %v3585_v35  ;;  %2316 = vmatpush.bf16.msra.mxu1 %v3589_v60  ;;  %v2704_v11 = vld [vmem:[#allocation2 + $0x2c] sm:$0xf]  ;;  %v3799_v35 = vld [vmem:[#allocation3 + $0x94] sm:$0xf0] }
 0x404   : > { %v3562_v28 = vld [vmem:[#allocation3 + $0x98] sm:$0xf0] }
 0x405   : > { %v1920_v21 = vpop.permute.xlu0 %1919  ;;  %v5177_v59 = vpop.permute.xlu1 %2093  ;;  %2266 = vmatpush.bf16.msra.mxu2 %v3489_v30  ;;  %2302 = vmatpush.bf16.msrb.mxu0 %v3493_v19 }
 0x406   : > { %v1923_v37 = vrot.slane %v1920_v21, 4  ;;  %v5213_v44 = vpop.permute.xlu2 %2083 }
 0x408   : > { %v1925_v4 = vsel %vm457_vm4, %v1923_v37, %v1924_v39  ;;  %2267 = vmatmul.bf16.vlgmr.msra.gmra.mxu2 %v3481_v43  ;;  %2303 = vmatmul.bf16.vlgmr.msrb.gmra.mxu0 %v3481_v43 }
 0x409   : > { %v1927_v23 = vsel %vm5855_vm5, %v1920_v21, %v1925_v4  ;;  %v3803_v15 = vld [vmem:[#allocation3 + $0xb4] sm:$0xf0]  ;;  %v3578_v8 = vld [vmem:[#allocation3 + $0xb8] sm:$0xf0] }
 0x40a   : > { %1929 = vst [vmem:[#allocation3 + $0xa8] sm:$0xff] %v1927_v23  ;;  %v3577_v0 = vor.u32 %v3803_v15, %v3576_v2  ;;  %v3581_v56 = vor.u32 %v3802_v40, %v3578_v8  ;;  %v3797_v55 = vld [vmem:[#allocation3 + $0x84] sm:$0xf0]  ;;  %v3554_v19 = vld [vmem:[#allocation3 + $0x88] sm:$0xf0] }
 0x40b   : > { %v2700_v8 = vld [vmem:[#allocation2 + $0xc] sm:$0xf] }
 0x40c   : > { %2281 = vmatpush.bf16.msrb.mxu3 %v3577_v0  ;;  %2317 = vmatpush.bf16.msra.mxu1 %v3581_v56  ;;  %v2702_v0 = vld [vmem:[#allocation2 + $0x1c] sm:$0xf] }
 0x40d   : > { %v1823_v33 = vpop.permute.xlu0 %1822  ;;  %v5187_v53 = vpop.permute.xlu1 %2707 }
 0x40e   : > { %v1826_v13 = vrot.slane %v1823_v33, 4  ;;  %v5191_v9 = vrot.slane %v5187_v53, 4  ;;  %v2488_v37 = vpop.permute.xlu2 %2487 }
 0x40f   : > { %v2489_v15 = vrot.slane %v2488_v37, 4 }
 0x410   : > { %v1828_v1 = vsel %vm457_vm4, %v1826_v13, %v1827_v7  ;;  %v2718_v29 = vunpack.c.l.b16 %v5191_v9  ;;  %v2719_v49 = vunpack.c.h.b16 %v5191_v9 }
 0x411   : > { %v1830_v25 = vsel %vm5856_vm3, %v1823_v33, %v1828_v1  ;;  %v3801_v26 = vld [vmem:[#allocation3 + $0xa4] sm:$0xf0]  ;;  %v3570_v5 = vld [vmem:[#allocation3 + $0xa8] sm:$0xf0]  ;;  %v2710_v33 = vsel %vm2547_vm8, %v5191_v9, %v5187_v53 }
 0x412   : > { %1832 = vst [vmem:[#allocation3 + $0x90] sm:$0xff] %v1830_v25  ;;  %v3569_v12 = vor.u32 %v3801_v26, %v3568_v22  ;;  %v3573_v27 = vor.u32 %v3800_v17, %v3570_v5  ;;  %vm2722_vm7 = vcmp.ne.s32.totalorder %v2718_v29, %v4280_v50  ;;  %vm2723_vm11 = vcmp.ne.s32.totalorder %v2719_v49, %v4283_v51 }
 0x413   : > { %vm5200_vm1 = vmpackc.low %vm2723_vm11, %vm2722_vm7  ;;  %v2711_v29 = vunpack.c.l.b16 %v2710_v33  ;;  %v2712_v49 = vunpack.c.h.b16 %v2710_v33 }
 0x414   : > { %2282 = vmatpush.bf16.msrb.mxu3 %v3569_v12  ;;  %2318 = vmatpush.bf16.msra.mxu1 %v3573_v27  ;;  %v2730_v36 = vsel %vm5200_vm1, %v2704_v11, 0  ;;  %v2732_v14 = vsel %vm5200_vm1, %v2706_v20, 0  ;;  %v2728_v56 = vsel %vm5200_vm1, %v2702_v0, 0  ;;  %v2108_v27 = vpack.c.b16 %v2104_v42, %v2104_v42 }
 0x415   : > { %v1745_v31 = vpop.permute.xlu0 %1744  ;;  %v3948_v24 = vpack.i.bf16 %v2732_v14, %v2730_v36  ;;  %vm2715_vm3 = vcmp.ne.s32.totalorder %v2711_v29, %v4280_v50  ;;  %vm2716_vm7 = vcmp.ne.s32.totalorder %v2712_v49, %v4283_v51 }
 0x416   : > { %v1747_v48 = vrot.slane %v1745_v31, 4 }
 0x417   : > { %3949 = vrot.lane.b32.xlu1 %v3948_v24, %s4074_s13 }
 0x418   : > { %v1748_v34 = vsel %vm457_vm4, %v1746_v32, %v1747_v48  ;;  %2272 = vmatmul.bf16.gmra.mxu2 %v2107_v54  ;;  %2308 = vmatmul.bf16.gmra.mxu0 %v2107_v54  ;;  %v2642_v54 = vld [vmem:[#allocation2 + $0x3c] sm:$0xf] }
 0x419   : > { %v1749_v38 = vsel %vm5859_vm0, %v5121_v61, %v1748_v34  ;;  %v3560_v45 = vld [vmem:[#allocation3 + $0x90] sm:$0xf]  ;;  %v3798_v10 = vld [vmem:[#allocation3 + $0x94] sm:$0xf]  ;;  %v3482_v61 = vld [vmem:[%s5659_s6 + $0x8] sm:$0xf0] }
 0x41a   : > { %1751 = vst [vmem:[#allocation3 + $0x80] sm:$0xff] %v1749_v38  ;;  %v3561_v41 = vor.u32 %v3799_v35, %v3560_v45  ;;  %v3565_v60 = vor.u32 %v3798_v10, %v3562_v28  ;;  %v3485_v39 = vor.u32 %v3778_v47, %v3482_v61  ;;  %v2499_v35 = vunpack.c.l.b16 %v2489_v15 }
 0x41b   : > { %v2500_v38 = vunpack.c.h.b16 %v2489_v15 }
 0x41c   : > { %2283 = vmatpush.bf16.msrb.mxu3 %v3561_v41  ;;  %2319 = vmatpush.bf16.msra.mxu1 %v3565_v60  ;;  %v2636_v41 = vld [vmem:[#allocation2 + $0xc] sm:$0xf]  ;;  %v2638_v60 = vld [vmem:[#allocation2 + $0x1c] sm:$0xf] }
 0x41d   : > { %v5215_v52 = vpop.permute.xlu0 %2088 }
 0x421   : > { %v3552_v63 = vld [vmem:[#allocation3 + $0x80] sm:$0xf]  ;;  %v3796_v30 = vld [vmem:[#allocation3 + $0x84] sm:$0xf] }
 0x422   : > { %v3553_v43 = vor.u32 %v3797_v55, %v3552_v63  ;;  %v3557_v21 = vor.u32 %v3796_v30, %v3554_v19 }
 0x424   : > { %2284 = vmatpush.bf16.msrb.mxu3 %v3553_v43  ;;  %2320 = vmatpush.bf16.msra.mxu1 %v3557_v21 }
 0x425   : > { %v328_v4 = vpop.permute.xlu0 %327 }
 0x426   : > { %v381_v2 = vadd.f32 %v4328_v18, %v328_v4  ;;  %v400_v23 = vadd.f32 %v4325_v16, %v328_v4  ;;  %v2491_v18 = vsel %vm2490_vm14, %v2489_v15, %v2488_v37  ;;  %v2726_v16 = vsel %vm5200_vm1, %v2700_v8, 0 }
 0x427   : > { %3590 = vmatmul.msk.bf16.vlgmr.msrb.gmra.mxu3 %vm2246_vm10, %v3485_v39  ;;  %3592 = vmatmul.msk.bf16.vlgmr.msra.gmra.mxu1 %vm2246_vm10, %v3485_v39  ;;  %v2492_v13 = vunpack.c.l.b16 %v2491_v18  ;;  %v2493_v1 = vunpack.c.h.b16 %v2491_v18  ;;  %v3953_v17 = vpack.i.bf16 %v2728_v56, %v2726_v16  ;;  %vm5868_vm1 = vnez %v5739_v57  ;;  %v5331_v56 = vpop.permute.xlu1 %2845 }
 0x428   : > { %v5227_v40 = vpack.c.bf16 %v400_v23, %v381_v2  ;;  %v2648_v24 = vsel %vm5868_vm1, %v2640_v6, 0  ;;  %v2650_v32 = vsel %vm5868_vm1, %v2642_v54, 0  ;;  %v2644_v55 = vsel %vm5868_vm1, %v2636_v41, 0 }
 0x429   : > { %vm5248_vm13 = vcmp.ne.s32.totalorder %v2492_v13, %v4280_v50  ;;  %vm5253_vm12 = vcmp.ne.s32.totalorder %v2493_v1, %v4283_v51  ;;  %v3958_v45 = vpack.i.bf16 %v2650_v32, %v2648_v24  ;;  %v2646_v47 = vsel %vm5868_vm1, %v2638_v60, 0 }
 0x42a   : > { %2332 = vst [vmem:[#allocation2 + $0x4] sm:$0xff] %v5227_v40  ;;  %2797 = vrot.lane.b32.xlu2 %v5227_v40, %s5825_s12  ;;  %vm5284_vm0 = vmpackc.low %vm5253_vm12, %vm5248_vm13  ;;  %vm2504_vm13 = vcmp.ne.s32.totalorder %v2500_v38, %v4283_v51  ;;  %v3963_v30 = vpack.i.bf16 %v2646_v47, %v2644_v55  ;;  %vm5879_vm1 = vcmask 130048  }
 0x42d   : > { %v2348_v7 = vpop.permute.xlu0 %2347 }
 0x42e   : > { %v5240_v22 = vrot.slane %v2348_v7, 4 }
 0x430   : > { %v2351_v11 = vsel %vm2350_vm9, %v5240_v22, %v2348_v7 }
 0x431   : > { %v2352_v25 = vunpack.c.l.b16 %v2351_v11  ;;  %v2353_v26 = vunpack.c.h.b16 %v2351_v11  ;;  %v5245_v5 = vld [vmem:[#allocation2] sm:$0xff]  ;;  %v2564_v20 = vld [vmem:[#allocation2 + $0x8] sm:$0xf] }
 0x432   : > { %v2571_v58 = vsel %vm4379_vm2, %v5245_v5, 0  ;;  %v2572_v12 = vsel %vm5864_vm15, %v2564_v20, 0  ;;  %3954 = vrot.lane.b32.xlu2 %v3953_v17, %s4074_s13  ;;  %v2627_v36 = vld [vmem:[#allocation2 + $0x4] sm:$0xff]  ;;  %v2506_v10 = vsel %vm5284_vm0, %v5245_v5, 0 }
 0x433   : > { %vm2356_vm6 = vcmp.ne.s32.totalorder %v2352_v25, %v4280_v50  ;;  %vm2357_vm5 = vcmp.ne.s32.totalorder %v2353_v26, %v4283_v51  ;;  %2587 = vrot.lane.b32.xlu0 %v2571_v58, %s5865_s10  ;;  %2589 = vrot.lane.b32.xlu1 %v2572_v12, %s5865_s10  ;;  %2631 = vst [vmem:[#allocation3 + $0x80] sm:$0xff] %v2627_v36  ;;  %v2480_v61 = vld [vmem:[#allocation2 + $0x8] sm:$0xf] }
 0x434   : > { %vm5269_vm11 = vmpackc.low %vm2357_vm5, %vm2356_vm6  ;;  %v2424_v19 = vld [vmem:[#allocation2 + $0x8] sm:$0xf]  ;;  %vm5876_vm5 = vnez %v5749_v46 }
 0x435   : > { %v2366_v31 = vsel %vm5269_vm11, %v5245_v5, 0  ;;  %vm5290_vm6 = vmpackc.low %vm2716_vm7, %vm2715_vm3  ;;  %v2643_v57 = vsel %vm5876_vm5, %v5227_v40, 0  ;;  %vm5877_vm3 = vcmask 916480   ;;  %vm5878_vm7 = vcmask 7168  }
 0x436   : > { %v2725_v28 = vsel %vm5290_vm6, %v5227_v40, 0 }
 0x437   : > { %3591 = vmatmul.msk.bf16.gmra.mxu3 %vm2246_vm10, %v2108_v27  ;;  %3593 = vmatmul.msk.bf16.gmra.mxu1 %vm2246_vm10, %v2108_v27  ;;  %vm2503_vm10 = vcmp.ne.s32.totalorder %v2499_v35, %v4280_v50 }
 0x438   : > { %vm5309_vm12 = vmpackc.low %vm2504_vm13, %vm2503_vm10  ;;  %vm5880_vm10 = vcmask 1039360  }
 0x439   : > { %v2507_v43 = vsel %vm5309_vm12, %v2480_v61, 0 }
 0x43a   : > { %2522 = vrot.lane.b32.xlu2 %v2506_v10, %s4072_s22 }
 0x43b   : > { %3959 = vrot.lane.b32.xlu0 %v3958_v45, %s5873_s18  ;;  %2741 = vrot.lane.b32.xlu1 %v2725_v28, %s4074_s13 }
 0x442   : > { %2441 = vrot.lane.b32.xlu2 %v2424_v19, %s4053_s20 }
 0x443   : > { %3964 = vrot.lane.b32.xlu1 %v3963_v30, %s5873_s18  ;;  %2524 = vrot.lane.b32.xlu0 %v2507_v43, %s4072_s22 }
 0x44b   : > { %2439 = vrot.lane.b32.xlu1 %v5245_v5, %s4053_s20  ;;  %2659 = vrot.lane.b32.xlu0 %v2643_v57, %s5873_s18 }
 0x44d   : > { %v5324_v21 = vpop.permute.xlu0 %3939 }
 0x455   : > { %v5326_v39 = vpop.permute.xlu0 %3944 }
 0x456   : > { %v3946_v37 = vunpack.i.l.bf16 %v5326_v39 }
 0x458   : > { %v2814_v4 = vrot.slane %v3946_v37, 4 }
 0x484   : > { %v2798_v2 = vpop.permute.xlu2 %2797 }
 0x485   : > { %v2813_v23 = vrot.slane %v2798_v2, 4  ;;  %v2304_v15 = vpop.f32.mrf.mxu0 }
 0x486   : > { %v2305_v58 = vadd.f32 %v2304_v15, %v5213_v44 }
 0x487   : > { %v2821_v8 = vsel %vm457_vm4, %v2813_v23, %v2814_v4 }
 0x488   : > { %v2822_v0 = vsel %vm5877_vm3, %v2798_v2, %v2821_v8 }
 0x489   : > { %2833 = vst [vmem:[#allocation3 + $0xe0] sm:$0xff] %v2822_v0  ;;  %v5333_v13 = vpop.permute.xlu1 %3949 }
 0x48b   : > { %v2268_v18 = vpop.f32.mrf.mxu2 }
 0x48c   : > { %v5335_v25 = vpop.permute.xlu2 %3954  ;;  %v2269_v12 = vadd.f32 %v2268_v18, %v5213_v44 }
 0x48d   : > { %v2306_v16 = vpop.f32.mrf.mxu0  ;;  %v3956_v53 = vunpack.i.l.bf16 %v5335_v25 }
 0x48e   : > { %v2307_v41 = vadd.f32 %v2306_v16, %v5215_v52 }
 0x48f   : > { %v2758_v24 = vrot.slane %v3956_v53, 4 }
 0x493   : > { %v2270_v33 = vpop.f32.mrf.mxu2 }
 0x494   : > { %v2523_v44 = vpop.permute.xlu2 %2522  ;;  %v2271_v60 = vadd.f32 %v2270_v33, %v5215_v52 }
 0x495   : > { %v2309_v7 = vpop.f32.mrf.mxu0  ;;  %v2538_v4 = vrot.slane %v2523_v44, 4 }
 0x496   : > { %v2310_v0 = vadd.f32 %v2309_v7, %v5177_v59 }
 0x49b   : > { %v2273_v1 = vpop.f32.mrf.mxu2 }
 0x49c   : > { %v2274_v18 = vadd.f32 %v2273_v1, %v5177_v59  ;;  %v2442_v33 = vpop.permute.xlu2 %2441 }
 0x49d   : > { %v2311_v17 = vpop.f32.mrf.mxu0 }
 0x4a3   : > { %v2275_v42 = vpop.f32.mrf.mxu2 }
 0x4a4   : > { %v2322_v29 = vpop.f32.mrf.mxu1 }
 0x4a5   : > { %v2588_v49 = vpop.permute.xlu0 %2587  ;;  %v2590_v11 = vpop.permute.xlu1 %2589  ;;  %v2323_v54 = vadd.f32 %v2322_v29, %v2305_v58 }
 0x4a6   : > { %v2603_v26 = vrot.slane %v2588_v49, 4  ;;  %v2604_v20 = vrot.slane %v2590_v11, 4 }
 0x4a8   : > { %v2611_v9 = vsel %vm457_vm4, %v2603_v26, %v2604_v20 }
 0x4a9   : > { %v2612_v27 = vsel %vm5878_vm7, %v2588_v49, %v2611_v9  ;;  %v2456_v9 = vrot.slane %v2442_v33, 4 }
 0x4aa   : > { %2623 = vst [vmem:[#allocation3 + $0x60] sm:$0xff] %v2612_v27  ;;  %v2286_v6 = vpop.f32.mrf.mxu3 }
 0x4ab   : > { %v2287_v36 = vadd.f32 %v2286_v6, %v2269_v12 }
 0x4ac   : > { %v2324_v32 = vpop.f32.mrf.mxu1 }
 0x4ad   : > { %v5342_v35 = vpack.c.bf16 %v2323_v54, %v2287_v36  ;;  %v5344_v38 = vpop.permute.xlu0 %3959  ;;  %v2742_v45 = vpop.permute.xlu1 %2741  ;;  %v2325_v61 = vadd.f32 %v2324_v32, %v2307_v41 }
 0x4ae   : > { %v2757_v10 = vrot.slane %v2742_v45, 4 }
 0x4af   : > { %2336 = vst [vmem:[#allocation2 + $0x14] sm:$0xff] %v5342_v35  ;;  %2801 = vrot.lane.b32.xlu1 %v5342_v35, %s5825_s12 }
 0x4b0   : > { %v2765_v28 = vsel %vm457_vm4, %v2757_v10, %v2758_v24  ;;  %2632 = vst [vmem:[#allocation3 + $0x88] sm:$0xff] %v5342_v35 }
 0x4b1   : > { %v2766_v55 = vsel %vm2490_vm14, %v2742_v45, %v2765_v28  ;;  %v2727_v28 = vsel %vm5290_vm6, %v5342_v35, 0 }
 0x4b2   : > { %2777 = vst [vmem:[#allocation3 + $0xc0] sm:$0xff] %v2766_v55  ;;  %v2288_v47 = vpop.f32.mrf.mxu3 }
 0x4b3   : > { %v2289_v30 = vadd.f32 %v2288_v47, %v2271_v60  ;;  %v2645_v60 = vsel %vm5876_vm5, %v5342_v35, 0 }
 0x4b4   : > { %v2327_v19 = vpop.f32.mrf.mxu1 }
 0x4b5   : > { %v5354_v43 = vpack.c.bf16 %v2325_v61, %v2289_v30  ;;  %v5356_v57 = vpop.permute.xlu1 %3964  ;;  %v2525_v37 = vpop.permute.xlu0 %2524  ;;  %v2328_v11 = vadd.f32 %v2327_v19, %v2310_v0  ;;  %v2359_v0 = vunpack.c.l.b16 %v5240_v22 }
 0x4b6   : > { %v2539_v2 = vrot.slane %v2525_v37, 4  ;;  %v5358_v23 = vld [vmem:[#allocation2 + $0x10] sm:$0xff]  ;;  %v2426_v15 = vld [vmem:[#allocation2 + $0x18] sm:$0xf]  ;;  %v3966_v17 = vunpack.i.l.bf16 %v5356_v57 }
 0x4b7   : > { %2337 = vst [vmem:[#allocation2 + $0x24] sm:$0xff] %v5354_v43  ;;  %2443 = vrot.lane.b32.xlu0 %v5358_v23, %s4053_s20  ;;  %v2573_v52 = vsel %vm4379_vm2, %v5358_v23, 0  ;;  %2445 = vrot.lane.b32.xlu1 %v2426_v15, %s4053_s20  ;;  %v2566_v29 = vld [vmem:[#allocation2 + $0x18] sm:$0xf]  ;;  %v2368_v49 = vsel %vm5269_vm11, %v5358_v23, 0  ;;  %v2508_v54 = vsel %vm5284_vm0, %v5358_v23, 0 }
 0x4b8   : > { %v2546_v8 = vsel %vm457_vm4, %v2538_v4, %v2539_v2  ;;  %2591 = vrot.lane.b32.xlu2 %v2573_v52, %s5865_s10  ;;  %2633 = vst [vmem:[#allocation3 + $0x90] sm:$0xff] %v5354_v43  ;;  %v2482_v20 = vld [vmem:[#allocation2 + $0x18] sm:$0xf]  ;;  %v2574_v58 = vsel %vm5864_vm15, %v2566_v29, 0  ;;  %v2676_v12 = vrot.slane %v3966_v17, 4  ;;  %v2729_v2 = vsel %vm5290_vm6, %v5354_v43, 0 }
 0x4b9   : > { %v2548_v16 = vsel %vm2547_vm8, %v2523_v44, %v2546_v8  ;;  %v2509_v36 = vsel %vm5309_vm12, %v2482_v20, 0  ;;  %v2647_v3 = vsel %vm5876_vm5, %v5354_v43, 0 }
 0x4ba   : > { %2559 = vst [vmem:[#allocation3 + $0x40] sm:$0xff] %v2548_v16  ;;  %v2291_v42 = vpop.f32.mrf.mxu3 }
 0x4bb   : > { %v2292_v26 = vadd.f32 %v2291_v42, %v2274_v18  ;;  %v2360_v18 = vunpack.c.h.b16 %v5240_v22 }
 0x4bc   : > { %v2329_v53 = vpop.f32.mrf.mxu1 }
 0x4bd   : > { %v5377_v7 = vpack.c.bf16 %v2328_v11, %v2292_v26  ;;  %v2440_v59 = vpop.permute.xlu1 %2439  ;;  %v2660_v1 = vpop.permute.xlu0 %2659  ;;  %vm2364_vm13 = vcmp.ne.s32.totalorder %v2360_v18, %v4283_v51  ;;  %v2340_v11 = vld [vmem:[#allocation2 + $0x8] sm:$0xf]  ;;  %v2847_v53 = vrot.slane %v5331_v56, 4 }
 0x4be   : > { %v2455_v27 = vrot.slane %v2440_v59, 4  ;;  %v2675_v6 = vrot.slane %v2660_v1, 4  ;;  %v2428_v41 = vld [vmem:[#allocation2 + $0x28] sm:$0xf]  ;;  %v5404_v55 = vld [vmem:[#allocation2 + $0x20] sm:$0xff] }
 0x4bf   : > { %2338 = vst [vmem:[#allocation2 + $0x34] sm:$0xff] %v5377_v7  ;;  %2593 = vrot.lane.b32.xlu0 %v2574_v58, %s5865_s10  ;;  %2526 = vrot.lane.b32.xlu1 %v2508_v54, %s4072_s22  ;;  %v2510_v47 = vsel %vm5284_vm0, %v5404_v55, 0  ;;  %v2568_v61 = vld [vmem:[#allocation2 + $0x28] sm:$0xf]  ;;  %v2575_v19 = vsel %vm4379_vm2, %v5404_v55, 0  ;;  %v2649_v42 = vsel %vm5876_vm5, %v5377_v7, 0  ;;  %v3957_v58 = vunpack.i.h.bf16 %v5335_v25 }
 0x4c0   : > { %2634 = vst [vmem:[#allocation3 + $0x98] sm:$0xff] %v5377_v7  ;;  %v2463_v24 = vsel %vm457_vm4, %v2455_v27, %v2456_v9  ;;  %v2683_v32 = vsel %vm457_vm4, %v2675_v6, %v2676_v12  ;;  %2528 = vrot.lane.b32.xlu2 %v2509_v36, %s4072_s22  ;;  %v2576_v30 = vsel %vm5864_vm15, %v2568_v61, 0  ;;  %v2484_v4 = vld [vmem:[#allocation2 + $0x28] sm:$0xf]  ;;  %v2731_v62 = vsel %vm5290_vm6, %v5377_v7, 0 }
 0x4c1   : > { %v2464_v45 = vsel %vm5879_vm1, %v2440_v59, %v2463_v24  ;;  %v2684_v10 = vsel %vm5880_vm10, %v2660_v1, %v2683_v32  ;;  %v2511_v52 = vsel %vm5309_vm12, %v2484_v4, 0  ;;  %v2344_v17 = vld [vmem:[#allocation2 + $0x28] sm:$0xf]  ;;  %v2370_v34 = vsel %vm5269_vm11, %v5404_v55, 0 }
 0x4c2   : > { %2475 = vst [vmem:[#allocation3 + $0x20] sm:$0xff] %v2464_v45  ;;  %v2293_v44 = vpop.f32.mrf.mxu3  ;;  %v2857_v6 = vunpack.c.h.b16 %v2847_v53  ;;  %v3947_v32 = vunpack.i.h.bf16 %v5326_v39  ;;  %vm5887_vm1 = vcmask 916480  }
 0x4c3   : > { %2695 = vst [vmem:[#allocation3 + $0xa0] sm:$0xff] %v2684_v10  ;;  %v3967_v10 = vunpack.i.h.bf16 %v5356_v57  ;;  %v2838_v44 = vld [vmem:[#allocation2 + $0xc] sm:$0xf] }
 0x4c4   : > { %vm2861_vm7 = vcmp.ne.s32.totalorder %v2857_v6, %v4283_v51 }
 0x4c5   : > { %v2678_v61 = vrot.slane %v3967_v10, 4 }
 0x4c6   : > { %v2569_v37 = vld [vmem:[#allocation2 + $0x30] sm:$0xff]  ;;  %v2486_v8 = vld [vmem:[#allocation2 + $0x38] sm:$0xf] }
 0x4c7   : > { %2745 = vrot.lane.b32.xlu0 %v2727_v28, %s4074_s13  ;;  %2449 = vrot.lane.b32.xlu1 %v2428_v41, %s4053_s20  ;;  %v2577_v15 = vsel %vm4379_vm2, %v2569_v37, 0  ;;  %v2430_v16 = vld [vmem:[#allocation2 + $0x38] sm:$0xf]  ;;  %v2513_v33 = vsel %vm5309_vm12, %v2486_v8, 0  ;;  %vm2363_vm2 = vcmp.ne.s32.totalorder %v2359_v0, %v4280_v50  ;;  %v2512_v26 = vsel %vm5284_vm0, %v2569_v37, 0 }
 0x4c8   : > { %2663 = vrot.lane.b32.xlu2 %v2645_v60, %s5873_s18  ;;  %vm5445_vm3 = vmpackc.low %vm2364_vm13, %vm2363_vm2  ;;  %v2570_v29 = vld [vmem:[#allocation2 + $0x38] sm:$0xf]  ;;  %vm2407_vm12 = vcmask 138240   ;;  %v2372_v1 = vsel %vm5269_vm11, %v2569_v37, 0  ;;  %v2840_v28 = vld [vmem:[#allocation2 + $0x1c] sm:$0xf] }
 0x4c9   : > { %v2371_v63 = vsel %vm5445_vm3, %v2344_v17, 0  ;;  %v2367_v20 = vsel %vm5445_vm3, %v2340_v11, 0  ;;  %v2578_v46 = vsel %vm5864_vm15, %v2570_v29, 0  ;;  %v2848_v9 = vsel %vm2407_vm12, %v2847_v53, %v5331_v56  ;;  %v2342_v56 = vld [vmem:[#allocation2 + $0x18] sm:$0xf]  ;;  %vm5889_vm13 = vmmov %vm5887_vm1 }
 0x4ca   : > { %v2849_v48 = vunpack.c.l.b16 %v2848_v9  ;;  %v2850_v59 = vunpack.c.h.b16 %v2848_v9  ;;  %v2369_v5 = vsel %vm5445_vm3, %v2342_v56, 0  ;;  %v2346_v36 = vld [vmem:[#allocation2 + $0x38] sm:$0xf]  ;;  %v2816_v60 = vrot.slane %v3947_v32, 4 }
 0x4cb   : > { %v2373_v14 = vsel %vm5445_vm3, %v2346_v36, 0  ;;  %vm5888_vm2 = vcmask 130048   ;;  %vm5890_vm3 = vcmask 7168   ;;  %v3961_v36 = vunpack.i.l.bf16 %v5344_v38 }
 0x4cc   : > { %vm2853_vm15 = vcmp.ne.s32.totalorder %v2849_v48, %v4280_v50  ;;  %vm2854_vm0 = vcmp.ne.s32.totalorder %v2850_v59, %v4283_v51 }
 0x4cd   : > { %vm5483_vm5 = vmpackc.low %vm2854_vm0, %vm2853_vm15 }
 0x4ce   : > { %v2869_v12 = vsel %vm5483_vm5, %v5377_v7, 0  ;;  %v2863_v27 = vsel %vm5483_vm5, %v5227_v40, 0  ;;  %v2865_v40 = vsel %vm5483_vm5, %v5342_v35, 0  ;;  %vm5891_vm15 = vmmov %vm5888_vm2 }
 0x4cf   : > { %2447 = vrot.lane.b32.xlu0 %v5404_v55, %s4053_s20  ;;  %2530 = vrot.lane.b32.xlu1 %v2510_v47, %s4072_s22  ;;  %vm5892_vm0 = vmmov %vm5880_vm10 }
 0x4d0   : > { %2805 = vrot.lane.b32.xlu2 %v5354_v43, %s5825_s12 }
 0x4d7   : > { %2597 = vrot.lane.b32.xlu0 %v2576_v30, %s5865_s10  ;;  %2809 = vrot.lane.b32.xlu1 %v5377_v7, %s5825_s12  ;;  %v2962_v7 = vld [vmem:[%s5655_s2 + $0x68] sm:$0xff] }
 0x4d8   : > { %2595 = vrot.lane.b32.xlu2 %v2575_v19, %s5865_s10 }
 0x4df   : > { %2749 = vrot.lane.b32.xlu0 %v2729_v2, %s4074_s13  ;;  %2599 = vrot.lane.b32.xlu1 %v2577_v15, %s5865_s10 }
 0x4e0   : > { %2532 = vrot.lane.b32.xlu2 %v2511_v52, %s4072_s22  ;;  %v3941_v52 = vunpack.i.l.bf16 %v5324_v21 }
 0x4e7   : > { %2453 = vrot.lane.b32.xlu0 %v2430_v16, %s4053_s20  ;;  %2536 = vrot.lane.b32.xlu1 %v2513_v33, %s4072_s22 }
 0x4e8   : > { %2667 = vrot.lane.b32.xlu2 %v2647_v3, %s5873_s18  ;;  %v2818_v3 = vrot.slane %v3941_v52, 4 }
 0x4ef   : > { %2392 = vrot.lane.b32.xlu0 %v2371_v63, %s4073_s23  ;;  %2671 = vrot.lane.b32.xlu1 %v2649_v42, %s5873_s18  ;;  %s298_s18 = scalar_lea.vmem [#allocation4], %s3335_s21 }
 0x4f0   : > { %2451 = vrot.lane.b32.xlu2 %v2569_v37, %s4053_s20  ;;  %s3269_s20 = sshll.u32 %s298_s18, 4  ;;  %s3270_s20 = int_to_ptr.vmem [resolvable:$true] %s3269_s20 }
 0x4f7   : > { %2534 = vrot.lane.b32.xlu0 %v2512_v26, %s4072_s22  ;;  %2384 = vrot.lane.b32.xlu1 %v2367_v20, %s4073_s23 }
 0x4f8   : > { %2601 = vrot.lane.b32.xlu2 %v2578_v46, %s5865_s10  ;;  %s3267_s10 = scalar_lea.hbm %s5661_s8, %s3842_s19  ;;  %s3999_s19 = scalar_lea.hbm %s5661_s8, 32 }
 0x4f9   : > { %s3271_s12 = sshll.u32 %s3267_s10, 4  ;;  %s3272_s12 = int_to_ptr.hbm [resolvable:$true] %s3271_s12 }
 0x4fa   : > { %s3993_s22 = sshra.s32 %s3272_s12, 4  ;;  %s3994_s22 = int_to_ptr.hbm [resolvable:$true] %s3993_s22 }
 0x4fb   : > { %p4000_p0 = scmp.lt.s32.totalorder %s3994_s22, %s5661_s8 }
 0x4ff   : > { %2382 = vrot.lane.b32.xlu0 %v2366_v31, %s4073_s23  ;;  %2394 = vrot.lane.b32.xlu1 %v2372_v1, %s4073_s23  ;;  %v2867_v31 = vsel %vm5483_vm5, %v5354_v43, 0  ;;  %v2856_v43 = vunpack.c.l.b16 %v2847_v53  ;;  %vm5893_vm5 = vmmov %vm5890_vm3 }
 0x500   : > { %2753 = vrot.lane.b32.xlu2 %v2731_v62, %s4074_s13 }
 0x501   : > { %vm2860_vm6 = vcmp.ne.s32.totalorder %v2856_v43, %v4280_v50  ;;  %v2844_v50 = vld [vmem:[#allocation2 + $0x3c] sm:$0xf] }
 0x502   : > { %vm5522_vm11 = vmpackc.low %vm2861_vm7, %vm2860_vm6 }
 0x503   : > { %v2870_v35 = vsel %vm5522_vm11, %v2844_v50, 0  ;;  %v2864_v19 = vsel %vm5522_vm11, %v2838_v44, 0  ;;  %v2866_v37 = vsel %vm5522_vm11, %v2840_v28, 0  ;;  %v2680_v50 = vrot.slane %v3961_v36, 4  ;;  %vm5894_vm6 = vmmov %vm5887_vm1 }
 0x504   : > { %v3973_v15 = vpack.i.bf16 %v2866_v37, %v2864_v19  ;;  %v3942_v44 = vunpack.i.h.bf16 %v5324_v21  ;;  %vm5895_vm7 = vmmov %vm5890_vm3 }
 0x507   : > { %2388 = vrot.lane.b32.xlu0 %v2369_v5, %s4073_s23  ;;  %2887 = vrot.lane.b32.xlu1 %v2867_v31, %s4075_s17 }
 0x508   : > { %2390 = vrot.lane.b32.xlu2 %v2370_v34, %s4073_s23  ;;  %v2760_v34 = vrot.slane %v3957_v58, 4  ;;  %v3708_v58 = vld [vmem:[#allocation3 + $0xe0] sm:$0xf] }
 0x50f   : > { %2891 = vrot.lane.b32.xlu0 %v2869_v12, %s4075_s17  ;;  %2879 = vrot.lane.b32.xlu1 %v2863_v27, %s4075_s17 }
 0x510   : > { %2386 = vrot.lane.b32.xlu2 %v2368_v49, %s4073_s23  ;;  %v2842_v49 = vld [vmem:[#allocation2 + $0x2c] sm:$0xf] }
 0x511   : > { %v2868_v51 = vsel %vm5522_vm11, %v2842_v49, 0  ;;  %vm5896_vm11 = vmmov %vm5888_vm2 }
 0x512   : > { %v2592_v54 = vpop.permute.xlu2 %2591  ;;  %v3968_v45 = vpack.i.bf16 %v2870_v35, %v2868_v51 }
 0x513   : > { %v2605_v20 = vrot.slane %v2592_v54, 4 }
 0x517   : > { %2883 = vrot.lane.b32.xlu0 %v2865_v40, %s4075_s17  ;;  %2965 = vperm.xlu1 %3927, %v2962_v7  }
 0x518   : > { %2396 = vrot.lane.b32.xlu2 %v2373_v14, %s4073_s23  ;;  %s3995_s23 = scalar_lea.hbm %s3994_s22, 16 }
 0x519   : > { %p3996_p11 = scmp.ne.s32.totalorder %s3994_s22, %s3995_s23  ;;  %p4001_p1 = scmp.lt.s32.totalorder %s3999_s19, %s3995_s23 }
 0x51a   : > { %v2529_v24 = vpop.permute.xlu2 %2528 }
 0x51b   : > { %v2541_v53 = vrot.slane %v2529_v24, 4  ;;  %p3997_p12 = pnand %p3996_p11, %p4159_p5  ;;  %p4002_p2 = por %p4001_p1, %p4000_p0 }
 0x51d   : > { %p3998_p13 = pneg %p3997_p12 }
 0x51f   : > { %p4003_p3 = pnand %p4002_p2, %p3998_p13 }
 0x520   : > { %3969 = vrot.lane.b32.xlu2 %v3968_v45, %s4075_s17 }
 0x521   : > { %v2802_v41 = vpop.permute.xlu1 %2801 }
 0x522   : > { %v2664_v55 = vpop.permute.xlu2 %2663  ;;  %v2815_v47 = vrot.slane %v2802_v41, 4 }
 0x523   : > { %v2677_v30 = vrot.slane %v2664_v55, 4 }
 0x524   : > { %v2823_v39 = vsel %vm457_vm4, %v2815_v47, %v2816_v60 }
 0x525   : > { %v2685_v57 = vsel %vm457_vm4, %v2677_v30, %v2678_v61  ;;  %v2824_v4 = vsel %vm5887_vm1, %v2802_v41, %v2823_v39 }
 0x526   : > { %v2686_v2 = vsel %vm5880_vm10, %v2664_v55, %v2685_v57  ;;  %2834 = vst [vmem:[#allocation3 + $0xe8] sm:$0xff] %v2824_v4  ;;  %v2820_v55 = vrot.slane %v3942_v44, 4  ;;  %v3951_v4 = vunpack.i.l.bf16 %v5333_v13  ;;  %v3644_v44 = vld [vmem:[#allocation3 + $0x60] sm:$0xf] }
 0x527   : > { %2696 = vst [vmem:[#allocation3 + $0xa8] sm:$0xff] %v2686_v2 }
 0x528   : > { %3974 = vrot.lane.b32.xlu2 %v3973_v15, %s4075_s17  ;;  %v2762_v52 = vrot.slane %v3951_v4, 4 }
 0x529   : > { %v2444_v8 = vpop.permute.xlu0 %2443  ;;  %v2446_v0 = vpop.permute.xlu1 %2445 }
 0x52a   : > { %v2457_v18 = vrot.slane %v2444_v8, 4  ;;  %v2806_v16 = vpop.permute.xlu2 %2805  ;;  %v2458_v33 = vrot.slane %v2446_v0, 4 }
 0x52b   : > { %v2817_v17 = vrot.slane %v2806_v16, 4 }
 0x52c   : > { %v2465_v22 = vsel %vm457_vm4, %v2457_v18, %v2458_v33 }
 0x52d   : > { %v2825_v63 = vsel %vm457_vm4, %v2817_v17, %v2818_v3  ;;  %v2466_v42 = vsel %vm5888_vm2, %v2444_v8, %v2465_v22 }
 0x52e   : > { %v2826_v29 = vsel %vm5889_vm13, %v2806_v16, %v2825_v63  ;;  %2476 = vst [vmem:[#allocation3 + $0x28] sm:$0xff] %v2466_v42 }
 0x52f   : > { %2835 = vst [vmem:[#allocation3 + $0xf0] sm:$0xff] %v2826_v29 }
 0x531   : > { %v2594_v11 = vpop.permute.xlu0 %2593  ;;  %v2527_v26 = vpop.permute.xlu1 %2526 }
 0x532   : > { %v2606_v46 = vrot.slane %v2594_v11, 4  ;;  %v2596_v9 = vpop.permute.xlu2 %2595  ;;  %v2540_v48 = vrot.slane %v2527_v26, 4 }
 0x533   : > { %v2607_v47 = vrot.slane %v2596_v9, 4 }
 0x534   : > { %v2613_v59 = vsel %vm457_vm4, %v2605_v20, %v2606_v46  ;;  %v2549_v1 = vsel %vm457_vm4, %v2540_v48, %v2541_v53  ;;  %v3835_v46 = vld [vmem:[#allocation3 + $0xe4] sm:$0xf0] }
 0x535   : > { %v2614_v62 = vsel %vm5890_vm3, %v2592_v54, %v2613_v59  ;;  %v2550_v56 = vsel %vm2547_vm8, %v2527_v26, %v2549_v1  ;;  %v3952_v26 = vunpack.i.h.bf16 %v5333_v13 }
 0x536   : > { %2624 = vst [vmem:[#allocation3 + $0x68] sm:$0xff] %v2614_v62  ;;  %v3716_v22 = vld [vmem:[#allocation3 + $0xf0] sm:$0xf]  ;;  %v3836_v63 = vld [vmem:[#allocation3 + $0xf4] sm:$0xf] }
 0x537   : > { %2560 = vst [vmem:[#allocation3 + $0x48] sm:$0xff] %v2550_v56 }
 0x539   : > { %v2746_v5 = vpop.permute.xlu0 %2745  ;;  %v2450_v31 = vpop.permute.xlu1 %2449 }
 0x53a   : > { %v2759_v12 = vrot.slane %v2746_v5, 4  ;;  %v2533_v27 = vpop.permute.xlu2 %2532  ;;  %v2460_v23 = vrot.slane %v2450_v31, 4  ;;  %v2764_v31 = vrot.slane %v3952_v26, 4 }
 0x53b   : > { %v2543_v40 = vrot.slane %v2533_v27, 4 }
 0x53c   : > { %v2767_v43 = vsel %vm457_vm4, %v2759_v12, %v2760_v34  ;;  %v3709_v12 = vor.u32 %v3835_v46, %v3708_v58  ;;  %v3676_v58 = vld [vmem:[#allocation3 + $0xa0] sm:$0xf] }
 0x53d   : > { %v2768_v6 = vsel %vm2490_vm14, %v2746_v5, %v2767_v43  ;;  %v3834_v5 = vld [vmem:[#allocation3 + $0xe4] sm:$0xf]  ;;  %v3962_v43 = vunpack.i.h.bf16 %v5344_v38 }
 0x53e   : > { %2778 = vst [vmem:[#allocation3 + $0xc8] sm:$0xff] %v2768_v6 }
 0x541   : > { %v2448_v7 = vpop.permute.xlu0 %2447  ;;  %v2531_v54 = vpop.permute.xlu1 %2530 }
 0x542   : > { %v2459_v14 = vrot.slane %v2448_v7, 4  ;;  %v2668_v25 = vpop.permute.xlu2 %2667  ;;  %v2542_v49 = vrot.slane %v2531_v54, 4 }
 0x543   : > { %v2679_v24 = vrot.slane %v2668_v25, 4 }
 0x544   : > { %v2467_v51 = vsel %vm457_vm4, %v2459_v14, %v2460_v23  ;;  %v2551_v35 = vsel %vm457_vm4, %v2542_v49, %v2543_v40 }
 0x545   : > { %v2468_v32 = vsel %vm5891_vm15, %v2448_v7, %v2467_v51  ;;  %v2687_v45 = vsel %vm457_vm4, %v2679_v24, %v2680_v50  ;;  %v2552_v10 = vsel %vm2547_vm8, %v2531_v54, %v2551_v35  ;;  %v3819_v50 = vld [vmem:[#allocation3 + $0x64] sm:$0xf0]  ;;  %v3646_v24 = vld [vmem:[#allocation3 + $0x68] sm:$0xf0]  ;;  %v2682_v51 = vrot.slane %v3962_v43, 4 }
 0x546   : > { %2477 = vst [vmem:[#allocation3 + $0x30] sm:$0xff] %v2468_v32  ;;  %v2688_v28 = vsel %vm5892_vm0, %v2668_v25, %v2687_v45 }
 0x547   : > { %2697 = vst [vmem:[#allocation3 + $0xb0] sm:$0xff] %v2688_v28  ;;  %v3818_v28 = vld [vmem:[#allocation3 + $0x64] sm:$0xf] }
 0x548   : > { %2561 = vst [vmem:[#allocation3 + $0x50] sm:$0xff] %v2552_v10 }
 0x549   : > { %v2598_v41 = vpop.permute.xlu0 %2597  ;;  %v2810_v60 = vpop.permute.xlu1 %2809 }
 0x54a   : > { %v2608_v61 = vrot.slane %v2598_v41, 4  ;;  %v2452_v30 = vpop.permute.xlu2 %2451  ;;  %v2819_v19 = vrot.slane %v2810_v60, 4 }
 0x54b   : > { %v2461_v1 = vrot.slane %v2452_v30, 4 }
 0x54c   : > { %v2615_v37 = vsel %vm457_vm4, %v2607_v47, %v2608_v61  ;;  %v2827_v39 = vsel %vm457_vm4, %v2819_v19, %v2820_v55  ;;  %v3649_v55 = vor.u32 %v3818_v28, %v3646_v24  ;;  %v3630_v28 = vld [vmem:[#allocation3 + $0x48] sm:$0xf0] }
 0x54d   : > { %v2616_v57 = vsel %vm5893_vm5, %v2596_v9, %v2615_v37  ;;  %v2828_v21 = vsel %vm5894_vm6, %v2810_v60, %v2827_v39  ;;  %v3710_v9 = vld [vmem:[#allocation3 + $0xe8] sm:$0xf0]  ;;  %v3645_v60 = vor.u32 %v3819_v50, %v3644_v44  ;;  %v3815_v44 = vld [vmem:[#allocation3 + $0x44] sm:$0xf0] }
 0x54e   : > { %2625 = vst [vmem:[#allocation3 + $0x70] sm:$0xff] %v2616_v57  ;;  %v3713_v27 = vor.u32 %v3834_v5, %v3710_v9 }
 0x54f   : > { %2836 = vst [vmem:[#allocation3 + $0xf8] sm:$0xff] %v2828_v21 }
 0x551   : > { %v2750_v2 = vpop.permute.xlu0 %2749  ;;  %v2600_v15 = vpop.permute.xlu1 %2599 }
 0x552   : > { %v2761_v8 = vrot.slane %v2750_v2, 4  ;;  %v2602_v0 = vpop.permute.xlu2 %2601  ;;  %v2609_v18 = vrot.slane %v2600_v15, 4 }
 0x553   : > { %v2610_v16 = vrot.slane %v2602_v0, 4 }
 0x554   : > { %v2769_v33 = vsel %vm457_vm4, %v2761_v8, %v2762_v52  ;;  %v3694_v52 = vld [vmem:[#allocation3 + $0xc8] sm:$0xf0] }
 0x555   : > { %v2770_v3 = vsel %vm2490_vm14, %v2750_v2, %v2769_v33  ;;  %v2617_v17 = vsel %vm457_vm4, %v2609_v18, %v2610_v16  ;;  %v3652_v7 = vld [vmem:[#allocation3 + $0x70] sm:$0xf]  ;;  %v3820_v54 = vld [vmem:[#allocation3 + $0x74] sm:$0xf] }
 0x556   : > { %2779 = vst [vmem:[#allocation3 + $0xd0] sm:$0xff] %v2770_v3  ;;  %v2618_v42 = vsel %vm5895_vm7, %v2600_v15, %v2617_v17  ;;  %v3837_v29 = vld [vmem:[#allocation3 + $0xf4] sm:$0xf0]  ;;  %v3718_v11 = vld [vmem:[#allocation3 + $0xf8] sm:$0xf0] }
 0x557   : > { %2626 = vst [vmem:[#allocation3 + $0x78] sm:$0xff] %v2618_v42  ;;  %v3717_v20 = vor.u32 %v3837_v29, %v3716_v22  ;;  %v3721_v53 = vor.u32 %v3836_v63, %v3718_v11  ;;  %v3831_v15 = vld [vmem:[#allocation3 + $0xc4] sm:$0xf0]  ;;  %v3692_v3 = vld [vmem:[#allocation3 + $0xc0] sm:$0xf] }
 0x558   : > { %v3830_v17 = vld [vmem:[#allocation3 + $0xc4] sm:$0xf]  ;;  %v3693_v22 = vor.u32 %v3831_v15, %v3692_v3  ;;  %v3684_v29 = vld [vmem:[#allocation3 + $0xb0] sm:$0xf] }
 0x559   : > { %v2454_v48 = vpop.permute.xlu0 %2453  ;;  %3186 = vmatpush.bf16.msra.mxu3 %v3717_v20  ;;  %3225 = vmatpush.bf16.msrb.mxu2 %v3721_v53  ;;  %v5573_v59 = vpop.permute.xlu1 %2536  ;;  %v3697_v63 = vor.u32 %v3830_v17, %v3694_v52  ;;  %v3828_v20 = vld [vmem:[#allocation3 + $0xb4] sm:$0xf] }
 0x55a   : > { %v2462_v62 = vrot.slane %v2454_v48, 4  ;;  %v2754_v56 = vpop.permute.xlu2 %2753  ;;  %v2545_v18 = vrot.slane %v5573_v59, 4  ;;  %v3827_v48 = vld [vmem:[#allocation3 + $0xa4] sm:$0xf0]  ;;  %v3678_v59 = vld [vmem:[#allocation3 + $0xa8] sm:$0xf0] }
 0x55b   : > { %v2763_v34 = vrot.slane %v2754_v56, 4  ;;  %v3677_v43 = vor.u32 %v3827_v48, %v3676_v58  ;;  %v3614_v58 = vld [vmem:[#allocation3 + $0x28] sm:$0xf0] }
 0x55c   : > { %v2469_v13 = vsel %vm457_vm4, %v2461_v1, %v2462_v62  ;;  %v5589_v1 = vld [vmem:[#allocation3 + $0x120] sm:$0x33] }
 0x55d   : > { %v2470_v6 = vsel %vm5896_vm11, %v2452_v30, %v2469_v13  ;;  %v2771_v36 = vsel %vm457_vm4, %v2763_v34, %v2764_v31  ;;  %3187 = vmatpush.bf16.msra.mxu3 %v3709_v12  ;;  %3226 = vmatpush.bf16.msrb.mxu2 %v3713_v27  ;;  %v3700_v19 = vld [vmem:[#allocation3 + $0xd0] sm:$0xf]  ;;  %v3832_v37 = vld [vmem:[#allocation3 + $0xd4] sm:$0xf]  ;;  %v3826_v27 = vld [vmem:[#allocation3 + $0xa4] sm:$0xf] }
 0x55e   : > { %2478 = vst [vmem:[#allocation3 + $0x38] sm:$0xff] %v2470_v6  ;;  %v2772_v40 = vsel %vm2490_vm14, %v2754_v56, %v2771_v36  ;;  %v3821_v14 = vld [vmem:[#allocation3 + $0x74] sm:$0xf0]  ;;  %v3654_v23 = vld [vmem:[#allocation3 + $0x78] sm:$0xf0]  ;;  %vm5897_vm14 = vmmov %vm5892_vm0  ;;  %v3681_v6 = vor.u32 %v3826_v27, %v3678_v59  ;;  %v3088_v36 = vunpack.c.h.b16 %v5589_v1 }
 0x55f   : > { %2780 = vst [vmem:[#allocation3 + $0xd8] sm:$0xff] %v2772_v40  ;;  %v3653_v25 = vor.u32 %v3821_v14, %v3652_v7  ;;  %v3657_v49 = vor.u32 %v3820_v54, %v3654_v23  ;;  %v3636_v54 = vld [vmem:[#allocation3 + $0x50] sm:$0xf]  ;;  %v3825_v40 = vld [vmem:[#allocation3 + $0x94] sm:$0xf0] }
 0x560   : > { %v3670_v14 = vld [vmem:[#allocation3 + $0x98] sm:$0xf0] }
 0x561   : > { %v2393_v38 = vpop.permute.xlu0 %2392  ;;  %3173 = vmatpush.bf16.msra.mxu0 %v3653_v25  ;;  %3212 = vmatpush.bf16.msrb.mxu1 %v3657_v49  ;;  %v2672_v35 = vpop.permute.xlu1 %2671  ;;  %v3816_v49 = vld [vmem:[#allocation3 + $0x54] sm:$0xf] }
 0x562   : > { %v2403_v32 = vrot.slane %v2393_v38, 4  ;;  %v2391_v45 = vpop.permute.xlu2 %2390  ;;  %v2681_v10 = vrot.slane %v2672_v35, 4 }
 0x563   : > { %v2402_v41 = vrot.slane %v2391_v45, 4 }
 0x564   : > { %v2689_v47 = vsel %vm457_vm4, %v2681_v10, %v2682_v51  ;;  %v5599_v10 = vld [vmem:[%s5660_s7] sm:$0xff] }
 0x565   : > { %v2411_v61 = vsel %vm457_vm4, %v2402_v41, %v2403_v32  ;;  %v2690_v30 = vsel %vm5897_vm14, %v2672_v35, %v2689_v47  ;;  %3174 = vmatpush.bf16.msra.mxu0 %v3645_v60  ;;  %3213 = vmatpush.bf16.msrb.mxu1 %v3649_v55  ;;  %v3668_v32 = vld [vmem:[#allocation3 + $0x90] sm:$0xf]  ;;  %v3126_v55 = vpack.c.b16 %v3088_v36, %v3088_v36  ;;  %v3823_v47 = vld [vmem:[#allocation3 + $0x84] sm:$0xf0]  ;;  %v3622_v3 = vld [vmem:[#allocation3 + $0x38] sm:$0xf0] }
 0x566   : > { %v2412_v39 = vsel %vm2407_vm12, %v2391_v45, %v2411_v61  ;;  %2698 = vst [vmem:[#allocation3 + $0xb8] sm:$0xff] %v2690_v30  ;;  %v3833_v57 = vld [vmem:[#allocation3 + $0xd4] sm:$0xf0]  ;;  %v3702_v21 = vld [vmem:[#allocation3 + $0xd8] sm:$0xf0]  ;;  %v3669_v41 = vor.u32 %v3825_v40, %v3668_v32 }
 0x567   : > { %2421 = vst [vmem:[#allocation3 + $0x10] sm:$0xff] %v2412_v39  ;;  %v3701_v4 = vor.u32 %v3833_v57, %v3700_v19  ;;  %v3705_v2 = vor.u32 %v3832_v37, %v3702_v21  ;;  %v3824_v45 = vld [vmem:[#allocation3 + $0x94] sm:$0xf]  ;;  %v3662_v61 = vld [vmem:[#allocation3 + $0x88] sm:$0xf0]  ;;  %v2971_v57 = vunpack.c.h.b16 %v5599_v10 }
 0x568   : > { %v3673_v60 = vor.u32 %v3824_v45, %v3670_v14  ;;  %v3628_v19 = vld [vmem:[#allocation3 + $0x40] sm:$0xf]  ;;  %v3814_v37 = vld [vmem:[#allocation3 + $0x44] sm:$0xf] }
 0x569   : > { %v2535_v8 = vpop.permute.xlu0 %2534  ;;  %3188 = vmatpush.bf16.msra.mxu3 %v3701_v4  ;;  %3227 = vmatpush.bf16.msrb.mxu2 %v3705_v2  ;;  %v2385_v0 = vpop.permute.xlu1 %2384  ;;  %v3629_v15 = vor.u32 %v3815_v44, %v3628_v19  ;;  %v3633_v52 = vor.u32 %v3814_v37, %v3630_v28 }
 0x56a   : > { %v2544_v16 = vrot.slane %v2535_v8, 4  ;;  %v5585_v33 = vpop.permute.xlu2 %2386  ;;  %v2399_v31 = vrot.slane %v2385_v0, 4  ;;  %v3822_v0 = vld [vmem:[#allocation3 + $0x84] sm:$0xf] }
 0x56b   : > { %v2400_v21 = vrot.slane %v5585_v33, 4 }
 0x56c   : > { %v2553_v42 = vsel %vm457_vm4, %v2544_v16, %v2545_v18  ;;  %v3813_v16 = vld [vmem:[#allocation3 + $0x34] sm:$0xf0] }
 0x56d   : > { %v2554_v11 = vsel %vm2547_vm8, %v2535_v8, %v2553_v42  ;;  %3189 = vmatpush.bf16.msra.mxu3 %v3693_v22  ;;  %3228 = vmatpush.bf16.msrb.mxu2 %v3697_v63  ;;  %v3829_v26 = vld [vmem:[#allocation3 + $0xb4] sm:$0xf0]  ;;  %v3686_v53 = vld [vmem:[#allocation3 + $0xb8] sm:$0xf0]  ;;  %v3660_v8 = vld [vmem:[#allocation3 + $0x80] sm:$0xf]  ;;  %v3665_v22 = vor.u32 %v3822_v0, %v3662_v61 }
 0x56e   : > { %2562 = vst [vmem:[#allocation3 + $0x58] sm:$0xff] %v2554_v11  ;;  %v3685_v46 = vor.u32 %v3829_v26, %v3684_v29  ;;  %v3689_v9 = vor.u32 %v3828_v20, %v3686_v53  ;;  %v3661_v17 = vor.u32 %v3823_v47, %v3660_v8  ;;  %vm5898_vm8 = vcmask 1041408   ;;  %v3620_v26 = vld [vmem:[#allocation3 + $0x30] sm:$0xf]  ;;  %v3812_v20 = vld [vmem:[#allocation3 + $0x34] sm:$0xf] }
 0x56f   : > { %v3171_v63 = vsel %vm5898_vm8, %v3126_v55, 0  ;;  %v3621_v48 = vor.u32 %v3813_v16, %v3620_v26  ;;  %v3625_v59 = vor.u32 %v3812_v20, %v3622_v3  ;;  %v2924_v16 = vld [vmem:[%s5660_s7 + $0x8] sm:$0xf] }
 0x570   : > { %v2972_v3 = vunpack.c.l.b16 %v2924_v16 }
 0x571   : > { %v2383_v62 = vpop.permute.xlu0 %2382  ;;  %3190 = vmatpush.bf16.msra.mxu3 %v3685_v46  ;;  %3229 = vmatpush.bf16.msrb.mxu2 %v3689_v9  ;;  %v2395_v56 = vpop.permute.xlu1 %2394  ;;  %v2974_v46 = vpack.c.b16 %v2971_v57, %v2971_v57 }
 0x572   : > { %v2398_v5 = vrot.slane %v2383_v62, 4  ;;  %v2397_v34 = vpop.permute.xlu2 %2396  ;;  %v2404_v12 = vrot.slane %v2395_v56, 4  ;;  %v2975_v26 = vpack.c.b16 %v2972_v3, %v2972_v3 }
 0x573   : > { %v2405_v13 = vrot.slane %v2397_v34, 4  ;;  %v3810_v34 = vld [vmem:[#allocation3 + $0x24] sm:$0xf] }
 0x574   : > { %v2406_v7 = vsel %vm457_vm4, %v2398_v5, %v2399_v31  ;;  %v3612_v31 = vld [vmem:[#allocation3 + $0x20] sm:$0xf]  ;;  %v3617_v36 = vor.u32 %v3810_v34, %v3614_v58 }
 0x575   : > { %v2408_v23 = vsel %vm2407_vm12, %v2383_v62, %v2406_v7  ;;  %v3817_v25 = vld [vmem:[#allocation3 + $0x54] sm:$0xf0]  ;;  %v3638_v50 = vld [vmem:[#allocation3 + $0x58] sm:$0xf0]  ;;  %v2413_v24 = vsel %vm457_vm4, %v2404_v12, %v2405_v13  ;;  %3191 = vmatpush.bf16.msra.mxu3 %v3677_v43  ;;  %3230 = vmatpush.bf16.msrb.mxu2 %v3681_v6  ;;  %v3087_v12 = vunpack.c.l.b16 %v5589_v1 }
 0x576   : > { %2419 = vst [vmem:[#allocation3] sm:$0xff] %v2408_v23  ;;  %v3637_v51 = vor.u32 %v3817_v25, %v3636_v54  ;;  %v3641_v38 = vor.u32 %v3816_v49, %v3638_v50  ;;  %v2414_v35 = vsel %vm2407_vm12, %v2395_v56, %v2413_v24  ;;  %v3811_v56 = vld [vmem:[#allocation3 + $0x24] sm:$0xf0]  ;;  %v3604_v50 = vld [vmem:[#allocation3 + $0x10] sm:$0xf] }
 0x577   : > { %2422 = vst [vmem:[#allocation3 + $0x18] sm:$0xff] %v2414_v35  ;;  %v3613_v6 = vor.u32 %v3811_v56, %v3612_v31  ;;  %v3808_v24 = vld [vmem:[#allocation3 + $0x14] sm:$0xf]  ;;  %v3125_v1 = vpack.c.b16 %v3087_v12, %v3087_v12 }
 0x578   : > { %3175 = vmatpush.bf16.msra.mxu0 %v3637_v51  ;;  %3214 = vmatpush.bf16.msrb.mxu1 %v3641_v38 }
 0x579   : > { %v2389_v30 = vpop.permute.xlu0 %2388  ;;  %3192 = vmatpush.bf16.msra.mxu3 %v3669_v41  ;;  %3231 = vmatpush.bf16.msrb.mxu2 %v3673_v60  ;;  %v2888_v39 = vpop.permute.xlu1 %2887  ;;  %v2970_v41 = vunpack.c.l.b16 %v5599_v10 }
 0x57a   : > { %v2401_v4 = vrot.slane %v2389_v30, 4  ;;  %v3970_v2 = vpop.permute.xlu2 %3969  ;;  %v2899_v53 = vrot.slane %v2888_v39, 4 }
 0x57b   : > { %v3971_v18 = vunpack.i.l.bf16 %v3970_v2  ;;  %v3972_v9 = vunpack.i.h.bf16 %v3970_v2 }
 0x57c   : > { %v2409_v42 = vsel %vm457_vm4, %v2400_v21, %v2401_v4  ;;  %3176 = vmatpush.bf16.msra.mxu0 %v3629_v15  ;;  %3215 = vmatpush.bf16.msrb.mxu1 %v3633_v52  ;;  %v2973_v21 = vpack.c.b16 %v2970_v41, %v2970_v41 }
 0x57d   : > { %v2410_v29 = vsel %vm2407_vm12, %v5585_v33, %v2409_v42  ;;  %v2900_v11 = vrot.slane %v3971_v18, 4  ;;  %3193 = vmatpush.bf16.msra.mxu3 %v3661_v17  ;;  %3232 = vmatpush.bf16.msrb.mxu2 %v3665_v22  ;;  %v2902_v27 = vrot.slane %v3972_v9, 4  ;;  %v3596_v47 = vld [vmem:[#allocation3] sm:$0xf]  ;;  %v3806_v61 = vld [vmem:[#allocation3 + $0x4] sm:$0xf]  ;;  %vm5899_vm12 = vmmov %vm5898_vm8 }
 0x57e   : > { %2420 = vst [vmem:[#allocation3 + $0x8] sm:$0xff] %v2410_v29  ;;  %v3809_v40 = vld [vmem:[#allocation3 + $0x14] sm:$0xf0]  ;;  %v3606_v14 = vld [vmem:[#allocation3 + $0x18] sm:$0xf0]  ;;  %v3168_v30 = vsel %vm5899_vm12, %v3125_v1, 0 }
 0x57f   : > { %v2907_v62 = vsel %vm457_vm4, %v2899_v53, %v2900_v11  ;;  %v3605_v35 = vor.u32 %v3809_v40, %v3604_v50  ;;  %v3609_v32 = vor.u32 %v3808_v24, %v3606_v14 }
 0x580   : > { %3177 = vmatpush.bf16.msra.mxu0 %v3621_v48  ;;  %3216 = vmatpush.bf16.msrb.mxu1 %v3625_v59  ;;  %v2908_v33 = vsel %vm2350_vm9, %v2888_v39, %v2907_v62 }
 0x581   : > { %3243 = vmatpush.bf16.msrb.mxu3 %v3171_v63  ;;  %v2892_v5 = vpop.permute.xlu0 %2891  ;;  %2917 = vst [vmem:[#allocation3 + $0x110] sm:$0xff] %v2908_v33  ;;  %3233 = vmatmul.bf16.vlgmr.msrb.gmra.mxu2 %v2974_v46  ;;  %v2880_v7 = vpop.permute.xlu1 %2879 }
 0x582   : > { %3194 = vmatmul.bf16.vlgmr.msra.gmra.mxu3 %v2974_v46  ;;  %v2901_v13 = vrot.slane %v2892_v5, 4  ;;  %v3975_v43 = vpop.permute.xlu2 %3974  ;;  %v2895_v51 = vrot.slane %v2880_v7, 4 }
 0x583   : > { %v3976_v54 = vunpack.i.l.bf16 %v3975_v43  ;;  %v3977_v38 = vunpack.i.h.bf16 %v3975_v43 }
 0x584   : > { %v2909_v23 = vsel %vm457_vm4, %v2901_v13, %v2902_v27  ;;  %3178 = vmatpush.bf16.msra.mxu0 %v3613_v6  ;;  %3217 = vmatpush.bf16.msrb.mxu1 %v3617_v36 }
 0x585   : > { %v2910_v25 = vsel %vm2350_vm9, %v2892_v5, %v2909_v23  ;;  %v2896_v49 = vrot.slane %v3976_v54, 4  ;;  %v3807_v44 = vld [vmem:[#allocation3 + $0x4] sm:$0xf0]  ;;  %v3598_v28 = vld [vmem:[#allocation3 + $0x8] sm:$0xf0]  ;;  %v2898_v19 = vrot.slane %v3977_v38, 4 }
 0x586   : > { %2918 = vst [vmem:[#allocation3 + $0x118] sm:$0xff] %v2910_v25  ;;  %v3597_v39 = vor.u32 %v3807_v44, %v3596_v47  ;;  %v3601_v57 = vor.u32 %v3806_v61, %v3598_v28 }
 0x587   : > { %v2903_v45 = vsel %vm457_vm4, %v2895_v51, %v2896_v49 }
 0x588   : > { %3179 = vmatpush.bf16.msra.mxu0 %v3605_v35  ;;  %3218 = vmatpush.bf16.msrb.mxu1 %v3609_v32  ;;  %v2904_v60 = vsel %vm2350_vm9, %v2880_v7, %v2903_v45  ;;  %v3840_v10 = vld [vmem:[#allocation3 + $0x114] sm:$0xf]  ;;  %v3732_v52 = vld [vmem:[#allocation3 + $0x110] sm:$0xf] }
 0x589   : > { %v2884_v55 = vpop.permute.xlu0 %2883  ;;  %2915 = vst [vmem:[#allocation3 + $0x100] sm:$0xff] %v2904_v60  ;;  %v2966_v58 = vpop.permute.xlu1 %2965 }
 0x58a   : > { %v2897_v37 = vrot.slane %v2884_v55, 4 }
 0x58c   : > { %v2905_v4 = vsel %vm457_vm4, %v2897_v37, %v2898_v19  ;;  %3180 = vmatpush.bf16.msra.mxu0 %v3597_v39  ;;  %3219 = vmatpush.bf16.msrb.mxu1 %v3601_v57  ;;  %vm3163_vm4 = vcmask 293888  }
 0x58d   : > { %v2906_v2 = vsel %vm2350_vm9, %v2884_v55, %v2905_v4  ;;  %v3734_v15 = vld [vmem:[#allocation3 + $0x118] sm:$0xf0]  ;;  %v3841_v8 = vld [vmem:[#allocation3 + $0x114] sm:$0xf0] }
 0x58e   : > { %2916 = vst [vmem:[#allocation3 + $0x108] sm:$0xff] %v2906_v2  ;;  %v3737_v0 = vor.u32 %v3840_v10, %v3734_v15  ;;  %v3733_v18 = vor.u32 %v3841_v8, %v3732_v52 }
 0x58f   : > { %3181 = vmatmul.bf16.vlgmr.msra.gmra.mxu0 %v2973_v21  ;;  %3220 = vmatmul.bf16.vlgmr.msrb.gmra.mxu1 %v2973_v21 }
 0x590   : > { %3204 = vmatpush.bf16.msrb.mxu0 %v3168_v30  ;;  %3244 = vmatpush.bf16.msrb.mxu3 %v3737_v0  ;;  %v3724_v17 = vld [vmem:[#allocation3 + $0x100] sm:$0xf]  ;;  %v3838_v63 = vld [vmem:[#allocation3 + $0x104] sm:$0xf] }
 0x594   : > { %3205 = vmatpush.bf16.msrb.mxu0 %v3733_v18 }
 0x595   : > { %v3839_v22 = vld [vmem:[#allocation3 + $0x104] sm:$0xf0]  ;;  %v3726_v42 = vld [vmem:[#allocation3 + $0x108] sm:$0xf0] }
 0x596   : > { %v3725_v29 = vor.u32 %v3839_v22, %v3724_v17  ;;  %v3729_v11 = vor.u32 %v3838_v63, %v3726_v42 }
 0x598   : > { %3206 = vmatpush.bf16.msrb.mxu0 %v3725_v29  ;;  %3245 = vmatpush.bf16.msrb.mxu3 %v3729_v11 }
 0x59b   : > { %3739 = vmatmul.msk.bf16.vlgmr.msrb.gmra.mxu3 %vm3163_vm4, %v2975_v26 }
 0x59f   : > { %3738 = vmatmul.msk.bf16.vlgmr.msrb.gmra.mxu0 %vm3163_vm4, %v2975_v26 }
 0x604   : > { %v3234_v53 = vpop.f32.mrf.mxu2 }
 0x605   : > { %v3195_v20 = vpop.f32.mrf.mxu3 }
 0x60c   : > { %v3182_v46 = vpop.f32.mrf.mxu0  ;;  %v3221_v9 = vpop.f32.mrf.mxu1 }
 0x60d   : > { %v3197_v48 = vpop.f32.mrf.mxu3  ;;  %v3236_v59 = vpop.f32.mrf.mxu2  ;;  %v3183_v33 = vadd.f32 %v3182_v46, %v2966_v58  ;;  %v3222_v5 = vadd.f32 %v3221_v9, %v2966_v58 }
 0x60f   : > { %v3196_v31 = vadd.f32 %v3195_v20, %v3183_v33  ;;  %v3235_v12 = vadd.f32 %v3234_v53, %v3222_v5 }
 0x614   : > { %v3184_v62 = vpop.f32.mrf.mxu0  ;;  %v3223_v56 = vpop.f32.mrf.mxu1 }
 0x61c   : > { %v3208_v34 = vpop.f32.mrf.mxu0 }
 0x61d   : > { %v3209_v27 = vadd.f32 %v3208_v34, %v3196_v31 }
 0x61e   : > { %v3247_v13 = vpop.f32.mrf.mxu3 }
 0x61f   : > { %v3251_v43 = vmax.f32 %v3209_v27, 0.0  ;;  %v3248_v6 = vadd.f32 %v3247_v13, %v3235_v12 }
 0x621   : > { %3253 = vst [vmem:[%s298_s18] sm:$0xff] %v3251_v43  ;;  %v3252_v36 = vmax.f32 %v3248_v6, 0.0 }
 0x623   : > { %3254 = vst [vmem:[%s298_s18 + $0x8] sm:$0xff] %v3252_v36 }
 0x624   : > { %v3210_v7 = vpop.f32.mrf.mxu0 }
 0x625   : > { %4006 = shalt.err (!%p4003_p3)
}
 0x626   : > { %3843 = dma.vmem_to_hbm [thread:$0]  (%p4159_p5), %s3270_s20, 256, %s3272_s12, %s3256_s9   ;;  %v3249_v54 = vpop.f32.mrf.mxu3 }
 0x627 PF: > { %p3849_p4 = scmp.ge.s32.totalorder %s4041_s30, 2  ;;  %s3283_s26 = sand.u32 1, %s4029_s27  }
 0x628   : > { %s3284_s24 = scalar_lea.sflag [#allocation5], %s3283_s26 }
 0x629   : > { %p3846_p7 = pnand %p3849_p4, %p4163_p6 }
 0x62b   : > { %p3847_p8 = pneg %p3846_p7 }
 0x62d   : > { %4024 = dma.done.wait (%p3847_p8), %s3284_s24, 256  }
 0x62e   : > { %4026 = vsyncadd (%p3847_p8), %s3284_s24, 4294967040  ;;  %p18_p9 = scmp.ge.s32.totalorder %s4146_s11, 4   ;;  %s5900_s27 = smov %s4033_s28 }
 0x62f   : > { %s5901_s28 = smov %s4037_s29  ;;  %s5902_s29 = smov %s4157_s14 }
 0x630   : > { %s5903_s30 = smov %s4146_s11  ;;  %20 = sbr.rel (!%p18_p9) target bundleno = 3 (0x3), region = 87 }
 0x635   :  { %3290 = vsyncpa [#allocation5], 1 }
 0x636   :  { %3292 = vsyncpa [#allocation5 + $0x1], 1 }

</bundles_post_ra>
